<compile_context>
chip_gen: v6e
topology: v6e:2x2x1
jax: 0.10.0
libtpu: 0.0.40
codegen_flags: <defaults>
</compile_context>

<pallas_src>
import functools

import jax
import jax.numpy as jnp
from jax.experimental import pallas as pl
from jax.experimental.pallas import tpu as pltpu

LEAK = 0.2
BN_EPS = 0.8  # nn.BatchNorm1d(out_feat, 0.8): second positional arg is eps


def _round_up(n, m):
    return ((n + m - 1) // m) * m


def _leaky_relu(h):
    return jnp.where(h > 0, h, LEAK * h)


def _make_kernel(in_pad):
    """Builds the fused-MLP kernel with static layer offsets into the packed
    wA buffer (w1 | w2 column-chunks | w3 column-chunks, all 128 lanes wide)."""

    off_w2 = in_pad            # two (128, 128) chunks of w2
    off_w3 = in_pad + 256      # four (256, 128) chunks of w3

    def kernel(x_ref, p_ref, wA_hbm, wB_hbm, wC_hbm, o_ref,
               wA_buf, wB_buf, wC_buf, sems):
        # Issue all three weight DMAs immediately; wait on each just-in-time so
        # wB / wC transfers hide behind layers 1-3 / layer-4 compute.
        cpA = pltpu.make_async_copy(wA_hbm, wA_buf, sems.at[0])
        cpB = pltpu.make_async_copy(wB_hbm, wB_buf, sems.at[1])
        cpC = pltpu.make_async_copy(wC_hbm, wC_buf, sems.at[2])
        cpA.start(); cpB.start(); cpC.start()

        h = x_ref[...]                                     # (B, in_pad) f32

        def bn_leaky(z, g_row, b_row, width):
            # BatchNorm1d (training mode): per-batch mean, biased variance,
            # eps=0.8; gamma/beta rows come from the packed param slab.
            gamma = p_ref[g_row:g_row + 1, :width]
            beta = p_ref[b_row:b_row + 1, :width]
            mu = jnp.mean(z, axis=0, keepdims=True)
            var = jnp.mean((z - mu) ** 2, axis=0, keepdims=True)
            zn = (z - mu) * jax.lax.rsqrt(var + BN_EPS) * gamma + beta
            return _leaky_relu(zn)

        cpA.wait()

        # block 1: Linear(in, 128) + bias -> LeakyReLU   (normalize=False)
        z = jnp.dot(h.astype(jnp.bfloat16), wA_buf[0:in_pad, :],
                    preferred_element_type=jnp.float32) + p_ref[0:1, 0:128]
        h = _leaky_relu(z)                                 # (B, 128)

        # block 2: Linear(128, 256) -> BN -> LeakyReLU
        # w2 is stored as two 128-lane column chunks; each dot yields 128 cols.
        hb = h.astype(jnp.bfloat16)
        z = jnp.concatenate(
            [jnp.dot(hb, wA_buf[off_w2 + i * 128: off_w2 + (i + 1) * 128, :],
                     preferred_element_type=jnp.float32) for i in range(2)],
            axis=1)                                        # (B, 256)
        h = bn_leaky(z, 1, 2, 256)

        # block 3: Linear(256, 512) -> BN -> LeakyReLU   (four 256x128 chunks)
        hb = h.astype(jnp.bfloat16)
        z = jnp.concatenate(
            [jnp.dot(hb, wA_buf[off_w3 + i * 256: off_w3 + (i + 1) * 256, :],
                     preferred_element_type=jnp.float32) for i in range(4)],
            axis=1)                                        # (B, 512)
        h = bn_leaky(z, 3, 4, 512)

        # block 4: Linear(512, 1028) -> BN -> LeakyReLU   (cols padded to 1152)
        cpB.wait()
        z = jnp.dot(h.astype(jnp.bfloat16), wB_buf[...],
                    preferred_element_type=jnp.float32)    # (B, 1152)
        h = bn_leaky(z, 5, 6, wB_buf.shape[1])

        # block 5: Linear(1028, out) -> BN -> LeakyReLU   (cols padded to 128)
        cpC.wait()
        z = jnp.dot(h.astype(jnp.bfloat16), wC_buf[...],
                    preferred_element_type=jnp.float32)    # (B, out_pad)
        h = bn_leaky(z, 7, 8, wC_buf.shape[1])

        # Write only the real features; the lane-pad columns are exactly zero
        # and are never stored, so no trailing XLA slice op is needed.
        o_ref[...] = h[:, :o_ref.shape[1]].astype(o_ref.dtype)

    return kernel


def init_params(key, noise_size, n_classes, n_features):
    """PyTorch-default-style init (Embedding ~ N(0,1), Linear ~ U(+-1/sqrt(fan_in)),
    BN gamma=1 / beta=0).  True (unpadded) shapes, f32."""
    dims = [noise_size + n_classes, 128, 256, 512, 1028, n_features]
    params = {}
    key, k_emb = jax.random.split(key)
    params["emb"] = jax.random.normal(k_emb, (n_classes, n_classes), jnp.float32)
    for i in range(5):
        fan_in, fan_out = dims[i], dims[i + 1]
        key, kw, kb = jax.random.split(key, 3)
        bound = 1.0 / (fan_in ** 0.5)
        # weights stored as (in, out) so the kernel computes x @ W
        params[f"w{i+1}"] = jax.random.uniform(
            kw, (fan_in, fan_out), jnp.float32, -bound, bound)
        params[f"b{i+1}"] = jax.random.uniform(
            kb, (1, fan_out), jnp.float32, -bound, bound)
        if i >= 1:  # blocks 2..5 carry BatchNorm affine params
            params[f"g{i+1}"] = jnp.ones((1, fan_out), jnp.float32)
            params[f"be{i+1}"] = jnp.zeros((1, fan_out), jnp.float32)
    return params


def pack_params(params, noise_size, n_classes, n_features):
    """One-time conversion to kernel layout: bf16 weights coalesced into three
    HBM buffers, small params packed into one f32 slab.  b2..b5 are dropped
    (exactly cancelled by the BN per-feature mean subtraction)."""
    in_dim = noise_size + n_classes
    in_pad = _round_up(in_dim, 128)
    h4_pad = _round_up(1028, 128)            # 1152
    out_pad = _round_up(n_features, 128)
    slab_w = max(h4_pad, out_pad)

    def pad2(a, rows, cols):
        return jnp.pad(a, ((0, rows - a.shape[0]), (0, cols - a.shape[1])))

    def col_chunks(w):
        # split an (K, N) weight into N/128 column chunks stacked along rows
        n = w.shape[1]
        return jnp.concatenate(
            [w[:, i * 128:(i + 1) * 128] for i in range(n // 128)], axis=0)

    w1 = pad2(params["w1"], in_pad, 128)
    wA = jnp.concatenate(
        [w1, col_chunks(params["w2"]), col_chunks(params["w3"])],
        axis=0).astype(jnp.bfloat16)                      # (in_pad+1280, 128)
    wB = pad2(params["w4"], 512, h4_pad).astype(jnp.bfloat16)   # (512, 1152)
    wC = pad2(params["w5"], h4_pad, out_pad).astype(jnp.bfloat16)  # (1152, out_pad)

    # Packed small-operand slab (one entry DMA instead of five):
    #   row 0     : b1 (only bias kept; b2..b5 cancel under BN)
    #   rows 1..8 : (gamma, beta) for layers 2..5, zero-padded to slab width
    slab = jnp.zeros((16, slab_w), jnp.float32)
    slab = slab.at[0, :128].set(params["b1"][0])
    for r, (g, b) in enumerate([("g2", "be2"), ("g3", "be3"),
                                ("g4", "be4"), ("g5", "be5")]):
        gw = params[g].shape[1]
        slab = slab.at[1 + 2 * r, :gw].set(params[g][0])
        slab = slab.at[2 + 2 * r, :gw].set(params[b][0])

    return {"emb": params["emb"], "wA": wA, "wB": wB, "wC": wC, "slab": slab}


@functools.partial(jax.jit, static_argnames=("n_features",))
def gen_forward(noise, label, kp, *, n_features):
    # Embedding gather + concat + pad are fused into this jit (no separate HBM
    # round trip of x as its own dispatched op).
    # TODO(synk): could move the gather in-kernel via PrefetchScalarGridSpec
    # (labels as scalar prefetch); kept as jit glue since the table is tiny.
    emb = kp["emb"][label]                                # (B, n_classes)
    x = jnp.concatenate([emb, noise.astype(jnp.float32)], axis=1)
    B, in_dim = x.shape
    in_pad = _round_up(in_dim, 128)
    x = jnp.pad(x, ((0, 0), (0, in_pad - in_dim)))        # zero-pad K to lane multiple

    wA, wB, wC, slab = kp["wA"], kp["wB"], kp["wC"], kp["slab"]

    flops = 2 * B * (wA.shape[0] * wA.shape[1]
                     + wB.shape[0] * wB.shape[1]
                     + wC.shape[0] * wC.shape[1])
    bytes_accessed = (2 * (wA.size + wB.size + wC.size)   # bf16 weight stream
                      + 4 * (x.size + slab.size + B * n_features))
    cost = pl.CostEstimate(flops=flops,
                           transcendentals=256 + 512 + 1152 + 128,  # rsqrt per BN col
                           bytes_accessed=bytes_accessed)

    out = pl.pallas_call(
        _make_kernel(in_pad),
        out_shape=jax.ShapeDtypeStruct((B, n_features), jnp.float32),
        in_specs=[
            pl.BlockSpec(memory_space=pltpu.MemorySpace.VMEM),   # x
            pl.BlockSpec(memory_space=pltpu.MemorySpace.VMEM),   # param slab
            pl.BlockSpec(memory_space=pl.ANY),                   # wA (raw HBM)
            pl.BlockSpec(memory_space=pl.ANY),                   # wB (raw HBM)
            pl.BlockSpec(memory_space=pl.ANY),                   # wC (raw HBM)
        ],
        out_specs=pl.BlockSpec(memory_space=pltpu.MemorySpace.VMEM),
        scratch_shapes=[
            pltpu.VMEM(wA.shape, jnp.bfloat16),
            pltpu.VMEM(wB.shape, jnp.bfloat16),
            pltpu.VMEM(wC.shape, jnp.bfloat16),
            pltpu.SemaphoreType.DMA((3,)),
        ],
        cost_estimate=cost,
        # ~1.8 MB of weight scratch + small operands: safe on v5e/v6e/v7x.
        compiler_params=pltpu.CompilerParams(vmem_limit_bytes=32 * 1024 * 1024),
    )(x, slab, wA, wB, wC)
    return out


def gen_reference(noise, label, params):
    """Pure-JAX reference (original parameterization incl. b2..b5), mirroring
    the kernel's bf16-matmul / f32-accumulate numerics."""
    emb = params["emb"][label]
    h = jnp.concatenate([emb, noise.astype(jnp.float32)], axis=1)
    for i in range(1, 6):
        w = params[f"w{i}"].astype(jnp.bfloat16)
        z = jnp.dot(h.astype(jnp.bfloat16), w,
                    preferred_element_type=jnp.float32) + params[f"b{i}"]
        if i >= 2:
            mu = jnp.mean(z, axis=0, keepdims=True)
            var = jnp.mean((z - mu) ** 2, axis=0, keepdims=True)
            z = (z - mu) * jax.lax.rsqrt(var + BN_EPS) * params[f"g{i}"] + params[f"be{i}"]
        h = _leaky_relu(z)
    return h


if __name__ == "__main__":
    key = jax.random.PRNGKey(0)
    B, noise_size, n_classes, n_features = 8, 32, 4, 16

    k_params, k_noise, k_label = jax.random.split(key, 3)
    params = init_params(k_params, noise_size, n_classes, n_features)
    kp = pack_params(params, noise_size, n_classes, n_features)

    noise = jax.random.normal(k_noise, (B, noise_size), jnp.float32)
    label = jax.random.randint(k_label, (B,), 0, n_classes)

    out = gen_forward(noise, label, kp, n_features=n_features)
    jax.block_until_ready(out)
    assert out.shape == (B, n_features) and out.dtype == jnp.float32

    ref = gen_reference(noise, label, params)
    assert jnp.allclose(out, ref, atol=5e-2, rtol=5e-2), (
        "max abs err = %f" % float(jnp.max(jnp.abs(out - ref))))
    print("KERNEL_OK")
</pallas_src>

<mosaic_0001>
module attributes {stable_mosaic.version = 11 : i64} {
  func.func @kernel(%arg0: memref<8x128xf32, #tpu.memory_space<vmem>>, %arg1: memref<16x1152xf32, #tpu.memory_space<vmem>>, %arg2: memref<1408x128xbf16, #tpu.memory_space<any>>, %arg3: memref<512x1152xbf16, #tpu.memory_space<any>>, %arg4: memref<1152x128xbf16, #tpu.memory_space<any>>, %arg5: memref<8x16xf32, #tpu.memory_space<vmem>>, %arg6: memref<1408x128xbf16, #tpu.memory_space<vmem>>, %arg7: memref<512x1152xbf16, #tpu.memory_space<vmem>>, %arg8: memref<1152x128xbf16, #tpu.memory_space<vmem>>, %arg9: memref<3x!tpu.dma_semaphore, #tpu.memory_space<semaphore_mem>>) attributes {dimension_semantics = [], scalar_prefetch = 0 : i64, scratch_operands = 4 : i64, tpu.core_type = #tpu.core_type<tc>} {
    %c0_i32 = arith.constant 0 : i32
    %0 = tpu.memref_slice %arg9[%c0_i32] : memref<3x!tpu.dma_semaphore, #tpu.memory_space<semaphore_mem>> -> memref<1x!tpu.dma_semaphore, #tpu.memory_space<semaphore_mem>>
    %1 = tpu.memref_squeeze %0 : memref<1x!tpu.dma_semaphore, #tpu.memory_space<semaphore_mem>> -> memref<!tpu.dma_semaphore, #tpu.memory_space<semaphore_mem>>
    tpu.enqueue_dma source(%arg2 : memref<1408x128xbf16, #tpu.memory_space<any>>) target(%arg6 : memref<1408x128xbf16, #tpu.memory_space<vmem>>) target_semaphore(%1 : memref<!tpu.dma_semaphore, #tpu.memory_space<semaphore_mem>>)
    %c1_i32 = arith.constant 1 : i32
    %2 = tpu.memref_slice %arg9[%c1_i32] : memref<3x!tpu.dma_semaphore, #tpu.memory_space<semaphore_mem>> -> memref<1x!tpu.dma_semaphore, #tpu.memory_space<semaphore_mem>>
    %3 = tpu.memref_squeeze %2 : memref<1x!tpu.dma_semaphore, #tpu.memory_space<semaphore_mem>> -> memref<!tpu.dma_semaphore, #tpu.memory_space<semaphore_mem>>
    tpu.enqueue_dma source(%arg3 : memref<512x1152xbf16, #tpu.memory_space<any>>) target(%arg7 : memref<512x1152xbf16, #tpu.memory_space<vmem>>) target_semaphore(%3 : memref<!tpu.dma_semaphore, #tpu.memory_space<semaphore_mem>>)
    %c2_i32 = arith.constant 2 : i32
    %4 = tpu.memref_slice %arg9[%c2_i32] : memref<3x!tpu.dma_semaphore, #tpu.memory_space<semaphore_mem>> -> memref<1x!tpu.dma_semaphore, #tpu.memory_space<semaphore_mem>>
    %5 = tpu.memref_squeeze %4 : memref<1x!tpu.dma_semaphore, #tpu.memory_space<semaphore_mem>> -> memref<!tpu.dma_semaphore, #tpu.memory_space<semaphore_mem>>
    tpu.enqueue_dma source(%arg4 : memref<1152x128xbf16, #tpu.memory_space<any>>) target(%arg8 : memref<1152x128xbf16, #tpu.memory_space<vmem>>) target_semaphore(%5 : memref<!tpu.dma_semaphore, #tpu.memory_space<semaphore_mem>>)
    %c0 = arith.constant 0 : index
    %c0_0 = arith.constant 0 : index
    %6 = vector.load %arg0[%c0, %c0_0] : memref<8x128xf32, #tpu.memory_space<vmem>>, vector<8x128xf32>
    %c0_i32_1 = arith.constant 0 : i32
    %7 = tpu.memref_slice %arg9[%c0_i32_1] : memref<3x!tpu.dma_semaphore, #tpu.memory_space<semaphore_mem>> -> memref<1x!tpu.dma_semaphore, #tpu.memory_space<semaphore_mem>>
    %8 = tpu.memref_squeeze %7 : memref<1x!tpu.dma_semaphore, #tpu.memory_space<semaphore_mem>> -> memref<!tpu.dma_semaphore, #tpu.memory_space<semaphore_mem>>
    tpu.wait_dma2 semaphore(%8 : memref<!tpu.dma_semaphore, #tpu.memory_space<semaphore_mem>>) src(%arg2 : memref<1408x128xbf16, #tpu.memory_space<any>>) dst(%arg6 : memref<1408x128xbf16, #tpu.memory_space<vmem>>)
    %9 = arith.truncf %6 : vector<8x128xf32> to vector<8x128xbf16>
    %c0_2 = arith.constant 0 : index
    %c0_3 = arith.constant 0 : index
    %10 = vector.load %arg6[%c0_2, %c0_3] : memref<1408x128xbf16, #tpu.memory_space<vmem>>, vector<128x128xbf16>
    %cst = arith.constant dense<0.000000e+00> : vector<8x128xf32>
    %11 = tpu.matmul %9, %10, %cst {dimension_numbers = #tpu.dot_dimension_numbers<[1], [0], [0], [1], [0, 0, 1, 1], [], []>} : vector<8x128xbf16>, vector<128x128xbf16>, vector<8x128xf32> -> vector<8x128xf32>
    %c0_4 = arith.constant 0 : index
    %c0_5 = arith.constant 0 : index
    %12 = vector.load %arg1[%c0_4, %c0_5] : memref<16x1152xf32, #tpu.memory_space<vmem>>, vector<1x128xf32>
    %13 = vector.broadcast %12 : vector<1x128xf32> to vector<8x128xf32>
    %14 = arith.addf %11, %13 : vector<8x128xf32>
    %cst_6 = arith.constant 0.000000e+00 : f32
    %15 = vector.broadcast %cst_6 : f32 to vector<8x128xf32>
    %16 = arith.cmpf ogt, %14, %15 : vector<8x128xf32>
    %cst_7 = arith.constant 2.000000e-01 : f32
    %17 = vector.broadcast %cst_7 : f32 to vector<8x128xf32>
    %18 = arith.mulf %17, %14 : vector<8x128xf32>
    %19 = arith.select %16, %14, %18 : vector<8x128xi1>, vector<8x128xf32>
    %20 = arith.truncf %19 : vector<8x128xf32> to vector<8x128xbf16>
    %c128 = arith.constant 128 : index
    %c0_8 = arith.constant 0 : index
    %21 = vector.load %arg6[%c128, %c0_8] : memref<1408x128xbf16, #tpu.memory_space<vmem>>, vector<128x128xbf16>
    %cst_9 = arith.constant dense<0.000000e+00> : vector<8x128xf32>
    %22 = tpu.matmul %20, %21, %cst_9 {dimension_numbers = #tpu.dot_dimension_numbers<[1], [0], [0], [1], [0, 0, 1, 1], [], []>} : vector<8x128xbf16>, vector<128x128xbf16>, vector<8x128xf32> -> vector<8x128xf32>
    %c256 = arith.constant 256 : index
    %c0_10 = arith.constant 0 : index
    %23 = vector.load %arg6[%c256, %c0_10] : memref<1408x128xbf16, #tpu.memory_space<vmem>>, vector<128x128xbf16>
    %cst_11 = arith.constant dense<0.000000e+00> : vector<8x128xf32>
    %24 = tpu.matmul %20, %23, %cst_11 {dimension_numbers = #tpu.dot_dimension_numbers<[1], [0], [0], [1], [0, 0, 1, 1], [], []>} : vector<8x128xbf16>, vector<128x128xbf16>, vector<8x128xf32> -> vector<8x128xf32>
    %25 = tpu.concatenate %22, %24 in 1 : vector<8x128xf32>, vector<8x128xf32> -> vector<8x256xf32>
    %c1 = arith.constant 1 : index
    %c0_12 = arith.constant 0 : index
    %26 = vector.load %arg1[%c1, %c0_12] : memref<16x1152xf32, #tpu.memory_space<vmem>>, vector<1x256xf32>
    %c2 = arith.constant 2 : index
    %c0_13 = arith.constant 0 : index
    %27 = vector.load %arg1[%c2, %c0_13] : memref<16x1152xf32, #tpu.memory_space<vmem>>, vector<1x256xf32>
    %cst_14 = arith.constant dense<0.000000e+00> : vector<256xf32>
    %28 = vector.multi_reduction <add>, %25, %cst_14 [0] : vector<8x256xf32> to vector<256xf32>
    %29 = vector.shape_cast %28 : vector<256xf32> to vector<1x256xf32>
    %cst_15 = arith.constant 8.000000e+00 : f32
    %30 = vector.broadcast %cst_15 : f32 to vector<1x256xf32>
    %31 = arith.divf %29, %30 : vector<1x256xf32>
    %32 = vector.broadcast %31 : vector<1x256xf32> to vector<8x256xf32>
    %33 = arith.subf %25, %32 : vector<8x256xf32>
    %34 = arith.mulf %33, %33 : vector<8x256xf32>
    %cst_16 = arith.constant dense<0.000000e+00> : vector<256xf32>
    %35 = vector.multi_reduction <add>, %34, %cst_16 [0] : vector<8x256xf32> to vector<256xf32>
    %36 = vector.shape_cast %35 : vector<256xf32> to vector<1x256xf32>
    %cst_17 = arith.constant 8.000000e+00 : f32
    %37 = vector.broadcast %cst_17 : f32 to vector<1x256xf32>
    %38 = arith.divf %36, %37 : vector<1x256xf32>
    %39 = vector.broadcast %31 : vector<1x256xf32> to vector<8x256xf32>
    %40 = arith.subf %25, %39 : vector<8x256xf32>
    %cst_18 = arith.constant 8.000000e-01 : f32
    %41 = vector.broadcast %cst_18 : f32 to vector<1x256xf32>
    %42 = arith.addf %38, %41 : vector<1x256xf32>
    %43 = math.rsqrt %42 : vector<1x256xf32>
    %44 = vector.broadcast %43 : vector<1x256xf32> to vector<8x256xf32>
    %45 = arith.mulf %40, %44 : vector<8x256xf32>
    %46 = vector.broadcast %26 : vector<1x256xf32> to vector<8x256xf32>
    %47 = arith.mulf %45, %46 : vector<8x256xf32>
    %48 = vector.broadcast %27 : vector<1x256xf32> to vector<8x256xf32>
    %49 = arith.addf %47, %48 : vector<8x256xf32>
    %cst_19 = arith.constant 0.000000e+00 : f32
    %50 = vector.broadcast %cst_19 : f32 to vector<8x256xf32>
    %51 = arith.cmpf ogt, %49, %50 : vector<8x256xf32>
    %cst_20 = arith.constant 2.000000e-01 : f32
    %52 = vector.broadcast %cst_20 : f32 to vector<8x256xf32>
    %53 = arith.mulf %52, %49 : vector<8x256xf32>
    %54 = arith.select %51, %49, %53 : vector<8x256xi1>, vector<8x256xf32>
    %55 = arith.truncf %54 : vector<8x256xf32> to vector<8x256xbf16>
    %c384 = arith.constant 384 : index
    %c0_21 = arith.constant 0 : index
    %56 = vector.load %arg6[%c384, %c0_21] : memref<1408x128xbf16, #tpu.memory_space<vmem>>, vector<256x128xbf16>
    %cst_22 = arith.constant dense<0.000000e+00> : vector<8x128xf32>
    %57 = tpu.matmul %55, %56, %cst_22 {dimension_numbers = #tpu.dot_dimension_numbers<[1], [0], [0], [1], [0, 0, 1, 1], [], []>} : vector<8x256xbf16>, vector<256x128xbf16>, vector<8x128xf32> -> vector<8x128xf32>
    %c640 = arith.constant 640 : index
    %c0_23 = arith.constant 0 : index
    %58 = vector.load %arg6[%c640, %c0_23] : memref<1408x128xbf16, #tpu.memory_space<vmem>>, vector<256x128xbf16>
    %cst_24 = arith.constant dense<0.000000e+00> : vector<8x128xf32>
    %59 = tpu.matmul %55, %58, %cst_24 {dimension_numbers = #tpu.dot_dimension_numbers<[1], [0], [0], [1], [0, 0, 1, 1], [], []>} : vector<8x256xbf16>, vector<256x128xbf16>, vector<8x128xf32> -> vector<8x128xf32>
    %c896 = arith.constant 896 : index
    %c0_25 = arith.constant 0 : index
    %60 = vector.load %arg6[%c896, %c0_25] : memref<1408x128xbf16, #tpu.memory_space<vmem>>, vector<256x128xbf16>
    %cst_26 = arith.constant dense<0.000000e+00> : vector<8x128xf32>
    %61 = tpu.matmul %55, %60, %cst_26 {dimension_numbers = #tpu.dot_dimension_numbers<[1], [0], [0], [1], [0, 0, 1, 1], [], []>} : vector<8x256xbf16>, vector<256x128xbf16>, vector<8x128xf32> -> vector<8x128xf32>
    %c1152 = arith.constant 1152 : index
    %c0_27 = arith.constant 0 : index
    %62 = vector.load %arg6[%c1152, %c0_27] : memref<1408x128xbf16, #tpu.memory_space<vmem>>, vector<256x128xbf16>
    %cst_28 = arith.constant dense<0.000000e+00> : vector<8x128xf32>
    %63 = tpu.matmul %55, %62, %cst_28 {dimension_numbers = #tpu.dot_dimension_numbers<[1], [0], [0], [1], [0, 0, 1, 1], [], []>} : vector<8x256xbf16>, vector<256x128xbf16>, vector<8x128xf32> -> vector<8x128xf32>
    %64 = tpu.concatenate %57, %59, %61, %63 in 1 : vector<8x128xf32>, vector<8x128xf32>, vector<8x128xf32>, vector<8x128xf32> -> vector<8x512xf32>
    %c3 = arith.constant 3 : index
    %c0_29 = arith.constant 0 : index
    %65 = vector.load %arg1[%c3, %c0_29] : memref<16x1152xf32, #tpu.memory_space<vmem>>, vector<1x512xf32>
    %c4 = arith.constant 4 : index
    %c0_30 = arith.constant 0 : index
    %66 = vector.load %arg1[%c4, %c0_30] : memref<16x1152xf32, #tpu.memory_space<vmem>>, vector<1x512xf32>
    %cst_31 = arith.constant dense<0.000000e+00> : vector<512xf32>
    %67 = vector.multi_reduction <add>, %64, %cst_31 [0] : vector<8x512xf32> to vector<512xf32>
    %68 = vector.shape_cast %67 : vector<512xf32> to vector<1x512xf32>
    %cst_32 = arith.constant 8.000000e+00 : f32
    %69 = vector.broadcast %cst_32 : f32 to vector<1x512xf32>
    %70 = arith.divf %68, %69 : vector<1x512xf32>
    %71 = vector.broadcast %70 : vector<1x512xf32> to vector<8x512xf32>
    %72 = arith.subf %64, %71 : vector<8x512xf32>
    %73 = arith.mulf %72, %72 : vector<8x512xf32>
    %cst_33 = arith.constant dense<0.000000e+00> : vector<512xf32>
    %74 = vector.multi_reduction <add>, %73, %cst_33 [0] : vector<8x512xf32> to vector<512xf32>
    %75 = vector.shape_cast %74 : vector<512xf32> to vector<1x512xf32>
    %cst_34 = arith.constant 8.000000e+00 : f32
    %76 = vector.broadcast %cst_34 : f32 to vector<1x512xf32>
    %77 = arith.divf %75, %76 : vector<1x512xf32>
    %78 = vector.broadcast %70 : vector<1x512xf32> to vector<8x512xf32>
    %79 = arith.subf %64, %78 : vector<8x512xf32>
    %cst_35 = arith.constant 8.000000e-01 : f32
    %80 = vector.broadcast %cst_35 : f32 to vector<1x512xf32>
    %81 = arith.addf %77, %80 : vector<1x512xf32>
    %82 = math.rsqrt %81 : vector<1x512xf32>
    %83 = vector.broadcast %82 : vector<1x512xf32> to vector<8x512xf32>
    %84 = arith.mulf %79, %83 : vector<8x512xf32>
    %85 = vector.broadcast %65 : vector<1x512xf32> to vector<8x512xf32>
    %86 = arith.mulf %84, %85 : vector<8x512xf32>
    %87 = vector.broadcast %66 : vector<1x512xf32> to vector<8x512xf32>
    %88 = arith.addf %86, %87 : vector<8x512xf32>
    %cst_36 = arith.constant 0.000000e+00 : f32
    %89 = vector.broadcast %cst_36 : f32 to vector<8x512xf32>
    %90 = arith.cmpf ogt, %88, %89 : vector<8x512xf32>
    %cst_37 = arith.constant 2.000000e-01 : f32
    %91 = vector.broadcast %cst_37 : f32 to vector<8x512xf32>
    %92 = arith.mulf %91, %88 : vector<8x512xf32>
    %93 = arith.select %90, %88, %92 : vector<8x512xi1>, vector<8x512xf32>
    %c1_i32_38 = arith.constant 1 : i32
    %94 = tpu.memref_slice %arg9[%c1_i32_38] : memref<3x!tpu.dma_semaphore, #tpu.memory_space<semaphore_mem>> -> memref<1x!tpu.dma_semaphore, #tpu.memory_space<semaphore_mem>>
    %95 = tpu.memref_squeeze %94 : memref<1x!tpu.dma_semaphore, #tpu.memory_space<semaphore_mem>> -> memref<!tpu.dma_semaphore, #tpu.memory_space<semaphore_mem>>
    tpu.wait_dma2 semaphore(%95 : memref<!tpu.dma_semaphore, #tpu.memory_space<semaphore_mem>>) src(%arg3 : memref<512x1152xbf16, #tpu.memory_space<any>>) dst(%arg7 : memref<512x1152xbf16, #tpu.memory_space<vmem>>)
    %96 = arith.truncf %93 : vector<8x512xf32> to vector<8x512xbf16>
    %c0_39 = arith.constant 0 : index
    %c0_40 = arith.constant 0 : index
    %97 = vector.load %arg7[%c0_39, %c0_40] : memref<512x1152xbf16, #tpu.memory_space<vmem>>, vector<512x1152xbf16>
    %cst_41 = arith.constant dense<0.000000e+00> : vector<8x1152xf32>
    %98 = tpu.matmul %96, %97, %cst_41 {dimension_numbers = #tpu.dot_dimension_numbers<[1], [0], [0], [1], [0, 0, 1, 1], [], []>} : vector<8x512xbf16>, vector<512x1152xbf16>, vector<8x1152xf32> -> vector<8x1152xf32>
    %c5 = arith.constant 5 : index
    %c0_42 = arith.constant 0 : index
    %99 = vector.load %arg1[%c5, %c0_42] : memref<16x1152xf32, #tpu.memory_space<vmem>>, vector<1x1152xf32>
    %c6 = arith.constant 6 : index
    %c0_43 = arith.constant 0 : index
    %100 = vector.load %arg1[%c6, %c0_43] : memref<16x1152xf32, #tpu.memory_space<vmem>>, vector<1x1152xf32>
    %cst_44 = arith.constant dense<0.000000e+00> : vector<1152xf32>
    %101 = vector.multi_reduction <add>, %98, %cst_44 [0] : vector<8x1152xf32> to vector<1152xf32>
    %102 = vector.shape_cast %101 : vector<1152xf32> to vector<1x1152xf32>
    %cst_45 = arith.constant 8.000000e+00 : f32
    %103 = vector.broadcast %cst_45 : f32 to vector<1x1152xf32>
    %104 = arith.divf %102, %103 : vector<1x1152xf32>
    %105 = vector.broadcast %104 : vector<1x1152xf32> to vector<8x1152xf32>
    %106 = arith.subf %98, %105 : vector<8x1152xf32>
    %107 = arith.mulf %106, %106 : vector<8x1152xf32>
    %cst_46 = arith.constant dense<0.000000e+00> : vector<1152xf32>
    %108 = vector.multi_reduction <add>, %107, %cst_46 [0] : vector<8x1152xf32> to vector<1152xf32>
    %109 = vector.shape_cast %108 : vector<1152xf32> to vector<1x1152xf32>
    %cst_47 = arith.constant 8.000000e+00 : f32
    %110 = vector.broadcast %cst_47 : f32 to vector<1x1152xf32>
    %111 = arith.divf %109, %110 : vector<1x1152xf32>
    %112 = vector.broadcast %104 : vector<1x1152xf32> to vector<8x1152xf32>
    %113 = arith.subf %98, %112 : vector<8x1152xf32>
    %cst_48 = arith.constant 8.000000e-01 : f32
    %114 = vector.broadcast %cst_48 : f32 to vector<1x1152xf32>
    %115 = arith.addf %111, %114 : vector<1x1152xf32>
    %116 = math.rsqrt %115 : vector<1x1152xf32>
    %117 = vector.broadcast %116 : vector<1x1152xf32> to vector<8x1152xf32>
    %118 = arith.mulf %113, %117 : vector<8x1152xf32>
    %119 = vector.broadcast %99 : vector<1x1152xf32> to vector<8x1152xf32>
    %120 = arith.mulf %118, %119 : vector<8x1152xf32>
    %121 = vector.broadcast %100 : vector<1x1152xf32> to vector<8x1152xf32>
    %122 = arith.addf %120, %121 : vector<8x1152xf32>
    %cst_49 = arith.constant 0.000000e+00 : f32
    %123 = vector.broadcast %cst_49 : f32 to vector<8x1152xf32>
    %124 = arith.cmpf ogt, %122, %123 : vector<8x1152xf32>
    %cst_50 = arith.constant 2.000000e-01 : f32
    %125 = vector.broadcast %cst_50 : f32 to vector<8x1152xf32>
    %126 = arith.mulf %125, %122 : vector<8x1152xf32>
    %127 = arith.select %124, %122, %126 : vector<8x1152xi1>, vector<8x1152xf32>
    %c2_i32_51 = arith.constant 2 : i32
    %128 = tpu.memref_slice %arg9[%c2_i32_51] : memref<3x!tpu.dma_semaphore, #tpu.memory_space<semaphore_mem>> -> memref<1x!tpu.dma_semaphore, #tpu.memory_space<semaphore_mem>>
    %129 = tpu.memref_squeeze %128 : memref<1x!tpu.dma_semaphore, #tpu.memory_space<semaphore_mem>> -> memref<!tpu.dma_semaphore, #tpu.memory_space<semaphore_mem>>
    tpu.wait_dma2 semaphore(%129 : memref<!tpu.dma_semaphore, #tpu.memory_space<semaphore_mem>>) src(%arg4 : memref<1152x128xbf16, #tpu.memory_space<any>>) dst(%arg8 : memref<1152x128xbf16, #tpu.memory_space<vmem>>)
    %130 = arith.truncf %127 : vector<8x1152xf32> to vector<8x1152xbf16>
    %c0_52 = arith.constant 0 : index
    %c0_53 = arith.constant 0 : index
    %131 = vector.load %arg8[%c0_52, %c0_53] : memref<1152x128xbf16, #tpu.memory_space<vmem>>, vector<1152x128xbf16>
    %cst_54 = arith.constant dense<0.000000e+00> : vector<8x128xf32>
    %132 = tpu.matmul %130, %131, %cst_54 {dimension_numbers = #tpu.dot_dimension_numbers<[1], [0], [0], [1], [0, 0, 1, 1], [], []>} : vector<8x1152xbf16>, vector<1152x128xbf16>, vector<8x128xf32> -> vector<8x128xf32>
    %c7 = arith.constant 7 : index
    %c0_55 = arith.constant 0 : index
    %133 = vector.load %arg1[%c7, %c0_55] : memref<16x1152xf32, #tpu.memory_space<vmem>>, vector<1x128xf32>
    %c8 = arith.constant 8 : index
    %c0_56 = arith.constant 0 : index
    %134 = vector.load %arg1[%c8, %c0_56] : memref<16x1152xf32, #tpu.memory_space<vmem>>, vector<1x128xf32>
    %cst_57 = arith.constant dense<0.000000e+00> : vector<128xf32>
    %135 = vector.multi_reduction <add>, %132, %cst_57 [0] : vector<8x128xf32> to vector<128xf32>
    %136 = vector.shape_cast %135 : vector<128xf32> to vector<1x128xf32>
    %cst_58 = arith.constant 8.000000e+00 : f32
    %137 = vector.broadcast %cst_58 : f32 to vector<1x128xf32>
    %138 = arith.divf %136, %137 : vector<1x128xf32>
    %139 = vector.broadcast %138 : vector<1x128xf32> to vector<8x128xf32>
    %140 = arith.subf %132, %139 : vector<8x128xf32>
    %141 = arith.mulf %140, %140 : vector<8x128xf32>
    %cst_59 = arith.constant dense<0.000000e+00> : vector<128xf32>
    %142 = vector.multi_reduction <add>, %141, %cst_59 [0] : vector<8x128xf32> to vector<128xf32>
    %143 = vector.shape_cast %142 : vector<128xf32> to vector<1x128xf32>
    %cst_60 = arith.constant 8.000000e+00 : f32
    %144 = vector.broadcast %cst_60 : f32 to vector<1x128xf32>
    %145 = arith.divf %143, %144 : vector<1x128xf32>
    %146 = vector.broadcast %138 : vector<1x128xf32> to vector<8x128xf32>
    %147 = arith.subf %132, %146 : vector<8x128xf32>
    %cst_61 = arith.constant 8.000000e-01 : f32
    %148 = vector.broadcast %cst_61 : f32 to vector<1x128xf32>
    %149 = arith.addf %145, %148 : vector<1x128xf32>
    %150 = math.rsqrt %149 : vector<1x128xf32>
    %151 = vector.broadcast %150 : vector<1x128xf32> to vector<8x128xf32>
    %152 = arith.mulf %147, %151 : vector<8x128xf32>
    %153 = vector.broadcast %133 : vector<1x128xf32> to vector<8x128xf32>
    %154 = arith.mulf %152, %153 : vector<8x128xf32>
    %155 = vector.broadcast %134 : vector<1x128xf32> to vector<8x128xf32>
    %156 = arith.addf %154, %155 : vector<8x128xf32>
    %cst_62 = arith.constant 0.000000e+00 : f32
    %157 = vector.broadcast %cst_62 : f32 to vector<8x128xf32>
    %158 = arith.cmpf ogt, %156, %157 : vector<8x128xf32>
    %cst_63 = arith.constant 2.000000e-01 : f32
    %159 = vector.broadcast %cst_63 : f32 to vector<8x128xf32>
    %160 = arith.mulf %159, %156 : vector<8x128xf32>
    %161 = arith.select %158, %156, %160 : vector<8x128xi1>, vector<8x128xf32>
    %162 = vector.extract_strided_slice %161 {offsets = [0, 0], sizes = [8, 16], strides = [1, 1]} : vector<8x128xf32> to vector<8x16xf32>
    %c0_64 = arith.constant 0 : index
    %c0_65 = arith.constant 0 : index
    %163 = vector.load %arg5[%c0_64, %c0_65] : memref<8x16xf32, #tpu.memory_space<vmem>>, vector<8x16xf32>
    tpu.vector_store %arg5[%c0_64, %c0_65], %162 {strides = array<i32>} : memref<8x16xf32, #tpu.memory_space<vmem>>, vector<8x16xf32>,
    return
  }
}

</mosaic_0001>

<bundles_post_ra>
// kernel: gen_forward.1
= control target key start
LH: loop header
LB: loop body
LE: loop exit
PB: predicated region body
PF: predicated region fallthrough
CT: control target
= control target key end

     0   :  { %10 = vsyncpa [#allocation7], 0  ;;  %s6414_s0 = inlined_call_operand.vmem [shape: f32[8,128], index: 0, kind: input, shape index: {}]   ;;  %s6415_s1 = inlined_call_operand.hbm [shape: f32[16,1152], index: 1, kind: input, shape index: {}]   ;;  %s6416_s2 = inlined_call_operand.hbm [shape: bf16[1408,128], index: 2, kind: input, shape index: {}]   ;;  %s6417_s3 = inlined_call_operand.hbm [shape: bf16[512,1152], index: 3, kind: input, shape index: {}]   ;;  %s6418_s4 = inlined_call_operand.hbm [shape: bf16[1152,128], index: 4, kind: input, shape index: {}]   ;;  %s6419_s5 = inlined_call_operand.hbm [shape: f32[8,16], index: 5, kind: output, shape index: {}]  }
   0x1   :  { %11 = vsyncpa [#allocation8], 0  ;;  %s6175_s18 = smov [#allocation6]  }
   0x2   :  { %s19_s19 = sshll.u32 %s6175_s18, 4  ;;  %s20_s19 = int_to_ptr.vmem [resolvable:$true] %s19_s19 }
   0x3   :  { %s6073_s20 = scalar_lea.vmem %s20_s19, 2304  ;;  %p6078_p1 = scmp.lt.s32.totalorder %s20_s19, %s20_s19 }
   0x4   :  { %p6074_p0 = scmp.ne.s32.totalorder %s20_s19, %s6073_s20  ;;  %p6079_p2 = scmp.lt.s32.totalorder %s6073_s20, %s6073_s20 }
   0x6   :  { %p6080_p3 = por %p6079_p2, %p6078_p1 }
   0x8   :  { %p6081_p4 = pnand %p6080_p3, %p6074_p0 }
   0xa   :  { %6084 = shalt.err (!%p6081_p4)
}
   0xb   :  { %s6176_s21 = smov 1152   ;;  %s6177_s22 = smov 72  }
   0xc   :  { %25 = dma.hbm_to_vmem [thread:$0]  %s6415_s1, 2304, %s20_s19, [#allocation7], %s6176_s21, %s6176_s21, %s6177_s22  }
   0xd   :  { %6165 = dma.done.wait [#allocation7], 2304  }
   0xe   :  { %6166 = vsyncadd [#allocation7], 4294964992  ;;  %s6178_s25 = smov [#allocation2]   ;;  %s6179_s27 = smov [#allocation3]  }
   0xf   :  { %s37_s26 = sshll.u32 %s6178_s25, 4  ;;  %s49_s28 = sshll.u32 %s6179_s27, 4  ;;  %s38_s26 = int_to_ptr.vmem [resolvable:$true] %s37_s26  ;;  %s50_s28 = int_to_ptr.vmem [resolvable:$true] %s49_s28 }
  0x10   :  { %s6093_s29 = scalar_lea.vmem %s38_s26, 11264  ;;  %p6098_p6 = scmp.lt.s32.totalorder %s38_s26, %s38_s26 }
  0x11   :  { %p6094_p5 = scmp.ne.s32.totalorder %s38_s26, %s6093_s29  ;;  %p6099_p7 = scmp.lt.s32.totalorder %s6093_s29, %s6093_s29 }
  0x13   :  { %p6100_p8 = por %p6099_p7, %p6098_p6 }
  0x15   :  { %p6101_p9 = pnand %p6100_p8, %p6094_p5 }
  0x17   :  { %6104 = shalt.err (!%p6101_p9)  }
  0x18   :  { %40 = dma.hbm_to_vmem [thread:$0]  %s6416_s2, 11264, %s38_s26, [#allocation5] }
  0x19   :  { %s6113_s1 = scalar_lea.vmem %s50_s28, 36864  ;;  %p6118_p11 = scmp.lt.s32.totalorder %s50_s28, %s50_s28 }
  0x1a   :  { %p6114_p10 = scmp.ne.s32.totalorder %s50_s28, %s6113_s1  ;;  %p6119_p12 = scmp.lt.s32.totalorder %s6113_s1, %s6113_s1 }
  0x1c   :  { %p6120_p13 = por %p6119_p12, %p6118_p11 }
  0x1e   :  { %p6121_p0 = pnand %p6120_p13, %p6114_p10 }
  0x20   :  { %6124 = shalt.err (!%p6121_p0)  }
  0x21   :  { %52 = dma.hbm_to_vmem [thread:$0]  %s6417_s3, 36864, %s50_s28, [#allocation5 + $0x1]  ;;  %v6226_v0 = vld [vmem:[%s6414_s0] sm:$0xff] }
  0x22   :  { %s6180_s9 = smov [#allocation4]  }
  0x23   :  { %s61_s10 = sshll.u32 %s6180_s9, 4  ;;  %s62_s10 = int_to_ptr.vmem [resolvable:$true] %s61_s10 }
  0x24   :  { %s6133_s2 = scalar_lea.vmem %s62_s10, 9216  ;;  %p6138_p2 = scmp.lt.s32.totalorder %s62_s10, %s62_s10 }
  0x25   :  { %p6134_p1 = scmp.ne.s32.totalorder %s62_s10, %s6133_s2  ;;  %p6139_p3 = scmp.lt.s32.totalorder %s6133_s2, %s6133_s2 }
  0x27   :  { %p6140_p4 = por %p6139_p3, %p6138_p2 }
  0x29   :  { %p6141_p5 = pnand %p6140_p4, %p6134_p1 }
  0x2b   :  { %6144 = shalt.err (!%p6141_p5)  }
  0x2c   :  { %64 = dma.hbm_to_vmem [thread:$0]  %s6418_s4, 9216, %s62_s10, [#allocation5 + $0x2] }
  0x2d   :  { %6167 = dma.done.wait [#allocation5], 11264 }
  0x2e   :  { %6168 = vsyncadd [#allocation5], 4294956032  ;;  %v6181_v1 = vmov 0.0   ;;  %vm6182_vm0 = vmmov 0   ;;  %v5457_v2 = vld [vmem:[#allocation2 + $0x38] sm:$0xff]   ;;  %v5458_v3 = vld [vmem:[#allocation2 + $0x30] sm:$0xff]   ;;  %v70_v17 = vpack.c.bf16 %v6226_v0, %v6226_v0 }
  0x2f   :  { %5368 = vmatprep.subr.bf16.mxu0 %v6181_v1  ;;  %5384 = vmatprep.mubr.msk.bf16.mxu0 %vm6182_vm0, %v6181_v1  ;;  %v5459_v4 = vld [vmem:[#allocation2 + $0x28] sm:$0xff]   ;;  %v5465_v5 = vld [vmem:[#allocation2 + $0x78] sm:$0xff]   ;;  %v5460_v6 = vld [vmem:[#allocation2 + $0x20] sm:$0xff]  }
  0x30   :  { %5388 = vmatprep.subr.bf16.mxu1 %v6181_v1  ;;  %5404 = vmatprep.mubr.msk.bf16.mxu1 %vm6182_vm0, %v6181_v1  ;;  %v5467_v7 = vld [vmem:[#allocation2 + $0x70] sm:$0xff]   ;;  %v5461_v8 = vld [vmem:[#allocation2 + $0x18] sm:$0xff]   ;;  %v5469_v9 = vld [vmem:[#allocation2 + $0x68] sm:$0xff]  }
  0x31   :  { %5369 = vmatpush3.bf16.msra.mxu0 %v5457_v2  ;;  %5389 = vmatpush3.bf16.msra.mxu1 %v5465_v5  ;;  %v5462_v10 = vld [vmem:[#allocation2 + $0x10] sm:$0xff]   ;;  %v5471_v11 = vld [vmem:[#allocation2 + $0x60] sm:$0xff]   ;;  %v5463_v12 = vld [vmem:[#allocation2 + $0x8] sm:$0xff]  }
  0x32   :  { %5370 = vmatprep.subr.bf16.mxu0 %v6181_v1  ;;  %5390 = vmatprep.subr.bf16.mxu1 %v6181_v1  ;;  %v5473_v13 = vld [vmem:[#allocation2 + $0x58] sm:$0xff]   ;;  %v5464_v14 = vld [vmem:[#allocation2] sm:$0xff]   ;;  %v5475_v15 = vld [vmem:[#allocation2 + $0x50] sm:$0xff]  }
  0x33   :  { %v5466_v16 = vld [vmem:[#allocation2 + $0xb8] sm:$0xff]   ;;  %v5468_v18 = vld [vmem:[#allocation2 + $0xb0] sm:$0xff]   ;;  %v5470_v19 = vld [vmem:[#allocation2 + $0xa8] sm:$0xff]  }
  0x34   :  { %v5472_v20 = vld [vmem:[#allocation2 + $0xa0] sm:$0xff]   ;;  %v5474_v21 = vld [vmem:[#allocation2 + $0x98] sm:$0xff]   ;;  %v5476_v22 = vld [vmem:[#allocation2 + $0x90] sm:$0xff]  }
  0x35   :  { %5371 = vmatpush3.bf16.msra.mxu0 %v5458_v3  ;;  %5391 = vmatpush3.bf16.msra.mxu1 %v5467_v7  ;;  %v5477_v23 = vld [vmem:[#allocation2 + $0x48] sm:$0xff]   ;;  %v5479_v25 = vld [vmem:[#allocation2 + $0x40] sm:$0xff]   ;;  %v5481_v36 = vld [vmem:[#allocation2 + $0x138] sm:$0xff]  }
  0x36   :  { %5372 = vmatprep.subr.bf16.mxu0 %v6181_v1  ;;  %5392 = vmatprep.subr.bf16.mxu1 %v6181_v1  ;;  %v5478_v24 = vld [vmem:[#allocation2 + $0x88] sm:$0xff]   ;;  %v5480_v26 = vld [vmem:[#allocation2 + $0x80] sm:$0xff]   ;;  %v5482_v37 = vld [vmem:[#allocation2 + $0x1b8] sm:$0xff]  }
  0x37   :  { %v87_v27 = vld [vmem:[#allocation6] ss:$0 sm:$0xff]  ;;  %v5483_v38 = vld [vmem:[#allocation2 + $0xf8] sm:$0xff]   ;;  %v5485_v40 = vld [vmem:[#allocation2 + $0x130] sm:$0xff]  }
  0x38   :  { %v5484_v39 = vld [vmem:[#allocation2 + $0x178] sm:$0xff]   ;;  %v5486_v41 = vld [vmem:[#allocation2 + $0x1b0] sm:$0xff]   ;;  %v5489_v44 = vld [vmem:[#allocation2 + $0x128] sm:$0xff]  }
  0x39   :  { %5373 = vmatpush3.bf16.msra.mxu0 %v5459_v4  ;;  %5393 = vmatpush3.bf16.msra.mxu1 %v5469_v9  ;;  %v5487_v42 = vld [vmem:[#allocation2 + $0xf0] sm:$0xff]   ;;  %v5490_v45 = vld [vmem:[#allocation2 + $0x1a8] sm:$0xff]   ;;  %v5493_v48 = vld [vmem:[#allocation2 + $0x120] sm:$0xff]  }
  0x3a   :  { %5374 = vmatprep.subr.bf16.mxu0 %v6181_v1  ;;  %5394 = vmatprep.subr.bf16.mxu1 %v6181_v1  ;;  %v5488_v43 = vld [vmem:[#allocation2 + $0x170] sm:$0xff]   ;;  %v5491_v46 = vld [vmem:[#allocation2 + $0xe8] sm:$0xff]   ;;  %v5494_v49 = vld [vmem:[#allocation2 + $0x1a0] sm:$0xff]  }
  0x3b   :  { %v5492_v47 = vld [vmem:[#allocation2 + $0x168] sm:$0xff]   ;;  %v5495_v50 = vld [vmem:[#allocation2 + $0xe0] sm:$0xff]   ;;  %v5497_v52 = vld [vmem:[#allocation2 + $0x118] sm:$0xff]  }
  0x3c   :  { %v5496_v51 = vld [vmem:[#allocation2 + $0x160] sm:$0xff]   ;;  %v5498_v53 = vld [vmem:[#allocation2 + $0x198] sm:$0xff]   ;;  %v5501_v56 = vld [vmem:[#allocation2 + $0x110] sm:$0xff]  }
  0x3d   :  { %5375 = vmatpush3.bf16.msra.mxu0 %v5460_v6  ;;  %5395 = vmatpush3.bf16.msra.mxu1 %v5471_v11  ;;  %v5499_v54 = vld [vmem:[#allocation2 + $0xd8] sm:$0xff]   ;;  %v5502_v57 = vld [vmem:[#allocation2 + $0x190] sm:$0xff]   ;;  %v5505_v60 = vld [vmem:[#allocation2 + $0x108] sm:$0xff]  }
  0x3e   :  { %5376 = vmatprep.subr.bf16.mxu0 %v6181_v1  ;;  %5396 = vmatprep.subr.bf16.mxu1 %v6181_v1  ;;  %v5500_v55 = vld [vmem:[#allocation2 + $0x158] sm:$0xff]   ;;  %v5503_v58 = vld [vmem:[#allocation2 + $0xd0] sm:$0xff]   ;;  %v5506_v61 = vld [vmem:[#allocation2 + $0x188] sm:$0xff]  }
  0x3f   :  { %v5504_v59 = vld [vmem:[#allocation2 + $0x150] sm:$0xff]   ;;  %v5507_v62 = vld [vmem:[#allocation2 + $0xc8] sm:$0xff]   ;;  %v5509_v0 = vld [vmem:[#allocation2 + $0x100] sm:$0xff]  }
  0x40   :  { %v5508_v63 = vld [vmem:[#allocation2 + $0x148] sm:$0xff]   ;;  %v5510_v2 = vld [vmem:[#allocation2 + $0x180] sm:$0xff]   ;;  %v5513_v5 = vld [vmem:[#allocation2 + $0x238] sm:$0xff]  }
  0x41   :  { %5377 = vmatpush3.bf16.msra.mxu0 %v5461_v8  ;;  %5397 = vmatpush3.bf16.msra.mxu1 %v5473_v13  ;;  %v5511_v3 = vld [vmem:[#allocation2 + $0xc0] sm:$0xff]   ;;  %v5514_v6 = vld [vmem:[#allocation2 + $0x2b8] sm:$0xff]  }
  0x42   :  { %5378 = vmatprep.subr.bf16.mxu0 %v6181_v1  ;;  %5398 = vmatprep.subr.bf16.mxu1 %v6181_v1  ;;  %v5512_v4 = vld [vmem:[#allocation2 + $0x140] sm:$0xff]  }
  0x45   :  { %5379 = vmatpush3.bf16.msra.mxu0 %v5462_v10  ;;  %5399 = vmatpush3.bf16.msra.mxu1 %v5475_v15 }
  0x46   :  { %5380 = vmatprep.subr.bf16.mxu0 %v6181_v1  ;;  %5400 = vmatprep.subr.bf16.mxu1 %v6181_v1 }
  0x49   :  { %5381 = vmatpush3.bf16.msra.mxu0 %v5463_v12  ;;  %5401 = vmatpush3.bf16.msra.mxu1 %v5477_v23 }
  0x4a   :  { %5382 = vmatprep.subr.bf16.mxu0 %v6181_v1  ;;  %5402 = vmatprep.subr.bf16.mxu1 %v6181_v1 }
  0x4d   :  { %5383 = vmatpush3.bf16.msra.mxu0 %v5464_v14  ;;  %5403 = vmatpush3.bf16.msra.mxu1 %v5479_v25 }
  0x4e   :  { %5408 = vmatprep.subr.bf16.mxu0 %v6181_v1  ;;  %5139 = vmatprep.subr.bf16.mxu1 %v5481_v36 }
  0x50   :  { %5385 = vmatmul.mubr.bf16.vlgmr.msra.gmra.mxu0 %v70_v17 }
  0x51   :  { %5409 = vmatpush3.bf16.msra.mxu0 %v5466_v16  ;;  %5424 = vmatprep.mubr.msk.bf16.mxu0 %vm6182_vm0, %v6181_v1 }
  0x52   :  { %5410 = vmatprep.subr.bf16.mxu0 %v6181_v1 }
  0x55   :  { %5411 = vmatpush3.bf16.msra.mxu0 %v5468_v18 }
  0x56   :  { %5412 = vmatprep.subr.bf16.mxu0 %v6181_v1 }
  0x59   :  { %5413 = vmatpush3.bf16.msra.mxu0 %v5470_v19 }
  0x5a   :  { %5414 = vmatprep.subr.bf16.mxu0 %v6181_v1 }
  0x5d   :  { %5415 = vmatpush3.bf16.msra.mxu0 %v5472_v20 }
  0x5e   :  { %5416 = vmatprep.subr.bf16.mxu0 %v6181_v1 }
  0x61   :  { %5417 = vmatpush3.bf16.msra.mxu0 %v5474_v21 }
  0x62   :  { %5418 = vmatprep.subr.bf16.mxu0 %v6181_v1 }
  0x65   :  { %5419 = vmatpush3.bf16.msra.mxu0 %v5476_v22 }
  0x66   :  { %5420 = vmatprep.subr.bf16.mxu0 %v6181_v1 }
  0x69   :  { %5421 = vmatpush3.bf16.msra.mxu0 %v5478_v24 }
  0x6a   :  { %5422 = vmatprep.subr.bf16.mxu0 %v6181_v1 }
  0x6d   :  { %5423 = vmatpush3.bf16.msra.mxu0 %v5480_v26 }
  0x6e   :  { %5161 = vmatprep.subr.bf16.mxu0 %v5482_v37 }
 0x110   :  { %v170_v28 = vpop.f32.mrf.mxu0 }
 0x111   :  { %v171_v29 = vadd.f32 %v170_v28, %v87_v27 }
 0x112   :  { %v5386_v30 = vpop.f32.mrf.mxu0 }
 0x113   :  { %vm176_vm1 = vcmp.gt.f32.partialorder %v171_v29, 0.0  ;;  %v177_v31 = vmul.f32 0.2, %v171_v29 }
 0x114   :  { %v173_v32 = vpop.f32.mrf.mxu0 }
 0x115   :  { %v178_v33 = vsel %vm176_vm1, %v171_v29, %v177_v31 }
 0x116   :  { %v5387_v34 = vpop.f32.mrf.mxu0  ;;  %v179_v35 = vpack.c.bf16 %v178_v33, %v178_v33 }
 0x118   :  { %5405 = vmatmul.mubr.bf16.vlgmr.msra.gmra.mxu1 %v179_v35  ;;  %5425 = vmatmul.mubr.bf16.vlgmr.msra.gmra.mxu0 %v179_v35 }
 0x119   :  { %5140 = vmatpush3.bf16.msra.mxu1 %v5483_v38  ;;  %5162 = vmatpush3.bf16.msra.mxu0 %v5484_v39 }
 0x11a   :  { %5141 = vmatprep.subr.bf16.mxu1 %v5485_v40  ;;  %5163 = vmatprep.subr.bf16.mxu0 %v5486_v41 }
 0x11d   :  { %5142 = vmatpush3.bf16.msra.mxu1 %v5487_v42  ;;  %5164 = vmatpush3.bf16.msra.mxu0 %v5488_v43 }
 0x11e   :  { %5143 = vmatprep.subr.bf16.mxu1 %v5489_v44  ;;  %5165 = vmatprep.subr.bf16.mxu0 %v5490_v45 }
 0x121   :  { %5144 = vmatpush3.bf16.msra.mxu1 %v5491_v46  ;;  %5166 = vmatpush3.bf16.msra.mxu0 %v5492_v47 }
 0x122   :  { %5145 = vmatprep.subr.bf16.mxu1 %v5493_v48  ;;  %5167 = vmatprep.subr.bf16.mxu0 %v5494_v49  ;;  %v432_v49 = vlaneseq }
 0x125   :  { %5146 = vmatpush3.bf16.msra.mxu1 %v5495_v50  ;;  %5168 = vmatpush3.bf16.msra.mxu0 %v5496_v51  ;;  %v6263_v50 = vshrl.u32 %v432_v49, 7 }
 0x126   :  { %5147 = vmatprep.subr.bf16.mxu1 %v5497_v52  ;;  %5169 = vmatprep.subr.bf16.mxu0 %v5498_v53  ;;  %v389_v52 = vld [vmem:[#allocation6 + $0x1] ss:$8 sm:$0x3] }
 0x127   :  { %v6266_v51 = vsub.s32 0, %v6263_v50  ;;  %v6269_v53 = vsub.s32 1, %v6263_v50 }
 0x129   :  { %5148 = vmatpush3.bf16.msra.mxu1 %v5499_v54  ;;  %5170 = vmatpush3.bf16.msra.mxu0 %v5500_v55  ;;  %v391_v54 = vld [vmem:[#allocation6 + $0x2] ss:$8 sm:$0x3]  ;;  %v435_v55 = vrot.slane %v389_v52, %v6266_v51 }
 0x12a   :  { %5149 = vmatprep.subr.bf16.mxu1 %v5501_v56  ;;  %5171 = vmatprep.subr.bf16.mxu0 %v5502_v57  ;;  %v439_v57 = vrot.slane %v389_v52, %v6269_v53 }
 0x12d   :  { %5150 = vmatpush3.bf16.msra.mxu1 %v5503_v58  ;;  %5172 = vmatpush3.bf16.msra.mxu0 %v5504_v59 }
 0x12e   :  { %5151 = vmatprep.subr.bf16.mxu1 %v5505_v60  ;;  %5173 = vmatprep.subr.bf16.mxu0 %v5506_v61  ;;  %v448_v60 = vrot.slane %v391_v54, %v6266_v51 }
 0x131   :  { %5152 = vmatpush3.bf16.msra.mxu1 %v5507_v62  ;;  %5174 = vmatpush3.bf16.msra.mxu0 %v5508_v63  ;;  %v452_v62 = vrot.slane %v391_v54, %v6269_v53 }
 0x132   :  { %5153 = vmatprep.subr.bf16.mxu1 %v5509_v0  ;;  %5175 = vmatprep.subr.bf16.mxu0 %v5510_v2 }
 0x135   :  { %5154 = vmatpush3.bf16.msra.mxu1 %v5511_v3  ;;  %5176 = vmatpush3.bf16.msra.mxu0 %v5512_v4 }
 0x136   :  { %5183 = vmatprep.subr.bf16.mxu1 %v5513_v5  ;;  %5205 = vmatprep.subr.bf16.mxu0 %v5514_v6 }
 0x1d8   :  { %v278_v7 = vpop.f32.mrf.mxu1  ;;  %v382_v8 = vpop.f32.mrf.mxu0 }
 0x1d9   :  { %v392_v9 = vrot.slane %v278_v7, 4  ;;  %v398_v10 = vrot.slane %v382_v8, 4 }
 0x1da   :  { %v5406_v11 = vpop.f32.mrf.mxu1  ;;  %v5426_v12 = vpop.f32.mrf.mxu0 }
 0x1db   :  { %v393_v13 = vadd.f32 %v392_v9, %v278_v7  ;;  %v399_v14 = vadd.f32 %v398_v10, %v382_v8  ;;  %v5515_v10 = vld [vmem:[#allocation2 + $0x1f8] sm:$0xff]   ;;  %v5517_v12 = vld [vmem:[#allocation2 + $0x230] sm:$0xff]  }
 0x1dc   :  { %v281_v15 = vpop.f32.mrf.mxu1  ;;  %v385_v16 = vpop.f32.mrf.mxu0  ;;  %v5516_v11 = vld [vmem:[#allocation2 + $0x278] sm:$0xff]  }
 0x1dd   :  { %v394_v17 = vrot.slane %v393_v13, 2  ;;  %v400_v18 = vrot.slane %v399_v14, 2  ;;  %v5520_v15 = vld [vmem:[#allocation2 + $0x270] sm:$0xff]   ;;  %v5521_v16 = vld [vmem:[#allocation2 + $0x228] sm:$0xff]  }
 0x1de   :  { %v5407_v19 = vpop.f32.mrf.mxu1  ;;  %v5427_v20 = vpop.f32.mrf.mxu0 }
 0x1df   :  { %v395_v21 = vadd.f32 %v394_v17, %v393_v13  ;;  %v401_v22 = vadd.f32 %v400_v18, %v399_v14  ;;  %v5518_v13 = vld [vmem:[#allocation2 + $0x2b0] sm:$0xff]   ;;  %v5522_v17 = vld [vmem:[#allocation2 + $0x2a8] sm:$0xff]   ;;  %v5525_v20 = vld [vmem:[#allocation2 + $0x220] sm:$0xff]  }
 0x1e0   :  { %v5519_v14 = vld [vmem:[#allocation2 + $0x1f0] sm:$0xff]   ;;  %v5523_v18 = vld [vmem:[#allocation2 + $0x1e8] sm:$0xff]  }
 0x1e1   :  { %v396_v23 = vrot.slane %v395_v21, 1  ;;  %v402_v24 = vrot.slane %v401_v22, 1  ;;  %v5524_v19 = vld [vmem:[#allocation2 + $0x268] sm:$0xff]  }
 0x1e3   :  { %v397_v25 = vadd.f32 %v396_v23, %v395_v21  ;;  %v403_v26 = vadd.f32 %v402_v24, %v401_v22  ;;  %v5526_v21 = vld [vmem:[#allocation2 + $0x2a0] sm:$0xff]   ;;  %v5529_v24 = vld [vmem:[#allocation2 + $0x218] sm:$0xff]  }
 0x1e4   :  { %v5527_v22 = vld [vmem:[#allocation2 + $0x1e0] sm:$0xff]  }
 0x1e5   :  { %v405_v27 = vmul.f32 0.125, %v397_v25  ;;  %v406_v28 = vmul.f32 0.125, %v403_v26  ;;  %v5528_v23 = vld [vmem:[#allocation2 + $0x260] sm:$0xff]   ;;  %v5530_v25 = vld [vmem:[#allocation2 + $0x298] sm:$0xff]  }
 0x1e6   :  { %v5531_v26 = vld [vmem:[#allocation2 + $0x1d8] sm:$0xff]  }
 0x1e7   :  { %v407_v29 = vsub.f32 %v278_v7, %v405_v27  ;;  %v408_v30 = vsub.f32 %v382_v8, %v406_v28  ;;  %v5532_v27 = vld [vmem:[#allocation2 + $0x258] sm:$0xff]   ;;  %v5533_v28 = vld [vmem:[#allocation2 + $0x210] sm:$0xff]  }
 0x1e9   :  { %v409_v31 = vmul.f32 %v407_v29, %v407_v29  ;;  %v410_v32 = vmul.f32 %v408_v30, %v408_v30 }
 0x1eb   :  { %v411_v33 = vrot.slane %v409_v31, 4  ;;  %v417_v34 = vrot.slane %v410_v32, 4 }
 0x1ed   :  { %v412_v35 = vadd.f32 %v411_v33, %v409_v31  ;;  %v418_v36 = vadd.f32 %v417_v34, %v410_v32  ;;  %v5536_v31 = vld [vmem:[#allocation2 + $0x250] sm:$0xff]   ;;  %v5537_v32 = vld [vmem:[#allocation2 + $0x208] sm:$0xff]  }
 0x1ee   :  { %v5538_v33 = vld [vmem:[#allocation2 + $0x288] sm:$0xff]  }
 0x1ef   :  { %v413_v37 = vrot.slane %v412_v35, 2  ;;  %v419_v38 = vrot.slane %v418_v36, 2  ;;  %v5539_v34 = vld [vmem:[#allocation2 + $0x1c8] sm:$0xff]  }
 0x1f1   :  { %v414_v39 = vadd.f32 %v413_v37, %v412_v35  ;;  %v420_v40 = vadd.f32 %v419_v38, %v418_v36  ;;  %v5540_v35 = vld [vmem:[#allocation2 + $0x248] sm:$0xff]   ;;  %v5541_v36 = vld [vmem:[#allocation2 + $0x200] sm:$0xff]  }
 0x1f2   :  { %v5542_v37 = vld [vmem:[#allocation2 + $0x280] sm:$0xff]  }
 0x1f3   :  { %v415_v41 = vrot.slane %v414_v39, 1  ;;  %v421_v42 = vrot.slane %v420_v40, 1  ;;  %v5543_v38 = vld [vmem:[#allocation2 + $0x1c0] sm:$0xff]  }
 0x1f5   :  { %v416_v43 = vadd.f32 %v415_v41, %v414_v39  ;;  %v422_v44 = vadd.f32 %v421_v42, %v420_v40  ;;  %v5544_v39 = vld [vmem:[#allocation2 + $0x240] sm:$0xff]  }
 0x1f7   :  { %v423_v45 = vmul.f32 0.125, %v416_v43  ;;  %v424_v46 = vmul.f32 0.125, %v422_v44 }
 0x1f9   :  { %v425_v47 = vadd.f32 0.8, %v423_v45  ;;  %v426_v48 = vadd.f32 0.8, %v424_v46 }
 0x1fb   :  { %5545 = vrsqrt.f32 %v425_v47 }
 0x1fc   :  { %5547 = vrsqrt.f32 %v426_v48 }
 0x208   :  { %v5546_v56 = vpop.eup %5545 }
 0x209   :  { %v5548_v58 = vpop.eup %5547  ;;  %v429_v59 = vmul.f32 %v5546_v56, %v407_v29  ;;  %v5534_v29 = vld [vmem:[#allocation2 + $0x290] sm:$0xff]  }
 0x20a   :  { %v430_v61 = vmul.f32 %v5548_v58, %v408_v30  ;;  %v5535_v30 = vld [vmem:[#allocation2 + $0x1d0] sm:$0xff]  }
 0x20b   :  { %v442_v63 = vmul.f32 %v435_v55, %v429_v59 }
 0x20c   :  { %v443_v0 = vmul.f32 %v439_v57, %v430_v61 }
 0x20d   :  { %v455_v2 = vadd.f32 %v448_v60, %v442_v63 }
 0x20e   :  { %v456_v3 = vadd.f32 %v452_v62, %v443_v0 }
 0x20f   :  { %vm457_vm2 = vcmp.gt.f32.partialorder %v455_v2, 0.0  ;;  %v459_v4 = vmul.f32 0.2, %v455_v2 }
 0x210   :  { %vm458_vm3 = vcmp.gt.f32.partialorder %v456_v3, 0.0  ;;  %v460_v5 = vmul.f32 0.2, %v456_v3 }
 0x211   :  { %v461_v6 = vsel %vm457_vm2, %v455_v2, %v459_v4 }
 0x212   :  { %v462_v7 = vsel %vm458_vm3, %v456_v3, %v460_v5  ;;  %v6275_v8 = vpack.c.bf16 %v461_v6, %v461_v6 }
 0x213   :  { %v464_v9 = vpack.c.bf16 %v462_v7, %v462_v7 }
 0x215   :  { %625 = vmatprep.mubr.bf16.mxu1 %v464_v9  ;;  %793 = vmatprep.mubr.bf16.mxu0 %v464_v9 }
 0x216   :  { %626 = vmatmul.mubr.bf16.vlgmr.msra.gmra.mxu1 %v6275_v8  ;;  %794 = vmatmul.mubr.bf16.vlgmr.msra.gmra.mxu0 %v6275_v8 }
 0x217   :  { %5184 = vmatpush3.bf16.msra.mxu1 %v5515_v10  ;;  %5206 = vmatpush3.bf16.msra.mxu0 %v5516_v11 }
 0x218   :  { %961 = vmatprep.mubr.bf16.mxu1 %v464_v9  ;;  %1129 = vmatprep.mubr.bf16.mxu0 %v464_v9 }
 0x219   :  { %5185 = vmatprep.subr.bf16.mxu1 %v5517_v12  ;;  %5207 = vmatprep.subr.bf16.mxu0 %v5518_v13 }
 0x21b   :  { %5186 = vmatpush3.bf16.msra.mxu1 %v5519_v14  ;;  %5208 = vmatpush3.bf16.msra.mxu0 %v5520_v15 }
 0x21c   :  { %5187 = vmatprep.subr.bf16.mxu1 %v5521_v16  ;;  %5209 = vmatprep.subr.bf16.mxu0 %v5522_v17 }
 0x21f   :  { %5188 = vmatpush3.bf16.msra.mxu1 %v5523_v18  ;;  %5210 = vmatpush3.bf16.msra.mxu0 %v5524_v19 }
 0x220   :  { %5189 = vmatprep.subr.bf16.mxu1 %v5525_v20  ;;  %5211 = vmatprep.subr.bf16.mxu0 %v5526_v21 }
 0x223   :  { %5190 = vmatpush3.bf16.msra.mxu1 %v5527_v22  ;;  %5212 = vmatpush3.bf16.msra.mxu0 %v5528_v23 }
 0x224   :  { %5191 = vmatprep.subr.bf16.mxu1 %v5529_v24  ;;  %5213 = vmatprep.subr.bf16.mxu0 %v5530_v25 }
 0x227   :  { %5192 = vmatpush3.bf16.msra.mxu1 %v5531_v26  ;;  %5214 = vmatpush3.bf16.msra.mxu0 %v5532_v27 }
 0x228   :  { %5193 = vmatprep.subr.bf16.mxu1 %v5533_v28  ;;  %5215 = vmatprep.subr.bf16.mxu0 %v5534_v29 }
 0x22b   :  { %5194 = vmatpush3.bf16.msra.mxu1 %v5535_v30  ;;  %5216 = vmatpush3.bf16.msra.mxu0 %v5536_v31 }
 0x22c   :  { %5195 = vmatprep.subr.bf16.mxu1 %v5537_v32  ;;  %5217 = vmatprep.subr.bf16.mxu0 %v5538_v33 }
 0x22f   :  { %5196 = vmatpush3.bf16.msra.mxu1 %v5539_v34  ;;  %5218 = vmatpush3.bf16.msra.mxu0 %v5540_v35 }
 0x230   :  { %5197 = vmatprep.subr.bf16.mxu1 %v5541_v36  ;;  %5219 = vmatprep.subr.bf16.mxu0 %v5542_v37 }
 0x233   :  { %5198 = vmatpush3.bf16.msra.mxu1 %v5543_v38  ;;  %5220 = vmatpush3.bf16.msra.mxu0 %v5544_v39 }
 0x236   :  { %962 = vmatmul.mubr.bf16.vlgmr.msra.gmra.mxu1 %v6275_v8  ;;  %1130 = vmatmul.mubr.bf16.vlgmr.msra.gmra.mxu0 %v6275_v8 }
 0x2d6   :  { %v5155_v40 = vpop.f32.mrf.mxu1  ;;  %v5177_v41 = vpop.f32.mrf.mxu0 }
 0x2d8   :  { %v5156_v42 = vpop.f32.mrf.mxu1  ;;  %v5178_v43 = vpop.f32.mrf.mxu0 }
 0x2d9   :  { %v5157_v44 = vadd.f32 %v5156_v42, %v5155_v40  ;;  %v5179_v45 = vadd.f32 %v5178_v43, %v5177_v41 }
 0x2da   :  { %v5158_v46 = vpop.f32.mrf.mxu1  ;;  %v5180_v47 = vpop.f32.mrf.mxu0 }
 0x2db   :  { %v1141_v48 = vrot.slane %v5157_v44, 4  ;;  %v1147_v49 = vrot.slane %v5179_v45, 4  ;;  %v1138_v46 = vld [vmem:[#allocation6 + $0x3] ss:$8 sm:$0xf] }
 0x2dc   :  { %v5159_v52 = vpop.f32.mrf.mxu1  ;;  %v5181_v54 = vpop.f32.mrf.mxu0 }
 0x2dd   :  { %v1142_v55 = vadd.f32 %v5157_v44, %v1141_v48  ;;  %v1148_v56 = vadd.f32 %v5179_v45, %v1147_v49  ;;  %v1140_v49 = vld [vmem:[#allocation6 + $0x4] ss:$8 sm:$0xf]  ;;  %v1221_v52 = vrot.slane %v1138_v46, %v6266_v51 }
 0x2df   :  { %v1143_v57 = vrot.slane %v1142_v55, 2  ;;  %v1149_v58 = vrot.slane %v1148_v56, 2 }
 0x2e1   :  { %v1144_v59 = vadd.f32 %v1143_v57, %v1142_v55  ;;  %v1150_v60 = vadd.f32 %v1149_v58, %v1148_v56  ;;  %v1225_v57 = vrot.slane %v1138_v46, %v6269_v53 }
 0x2e3   :  { %v1145_v61 = vrot.slane %v1144_v59, 1  ;;  %v1151_v62 = vrot.slane %v1150_v60, 1 }
 0x2e5   :  { %v1146_v63 = vadd.f32 %v1145_v61, %v1144_v59  ;;  %v1152_v0 = vadd.f32 %v1151_v62, %v1150_v60  ;;  %v1246_v60 = vrot.slane %v1140_v49, %v6266_v51 }
 0x2e7   :  { %v1165_v2 = vmul.f32 0.125, %v1146_v63  ;;  %v1166_v3 = vmul.f32 0.125, %v1152_v0  ;;  %v1250_v0 = vrot.slane %v1140_v49, %v6269_v53 }
 0x2e9   :  { %v1169_v4 = vsub.f32 %v5157_v44, %v1165_v2  ;;  %v1170_v5 = vsub.f32 %v5179_v45, %v1166_v3 }
 0x2eb   :  { %v1173_v6 = vmul.f32 %v1169_v4, %v1169_v4  ;;  %v1174_v7 = vmul.f32 %v1170_v5, %v1170_v5 }
 0x2ed   :  { %v1177_v8 = vrot.slane %v1173_v6, 4  ;;  %v1183_v9 = vrot.slane %v1174_v7, 4 }
 0x2ef   :  { %v1178_v10 = vadd.f32 %v1177_v8, %v1173_v6  ;;  %v1184_v11 = vadd.f32 %v1183_v9, %v1174_v7 }
 0x2f1   :  { %v1179_v12 = vrot.slane %v1178_v10, 2  ;;  %v1185_v13 = vrot.slane %v1184_v11, 2 }
 0x2f3   :  { %v1180_v14 = vadd.f32 %v1179_v12, %v1178_v10  ;;  %v1186_v15 = vadd.f32 %v1185_v13, %v1184_v11 }
 0x2f5   :  { %v1181_v16 = vrot.slane %v1180_v14, 1  ;;  %v1187_v17 = vrot.slane %v1186_v15, 1 }
 0x2f6   :  { %v5199_v18 = vpop.f32.mrf.mxu1  ;;  %v5221_v19 = vpop.f32.mrf.mxu0 }
 0x2f7   :  { %v1182_v20 = vadd.f32 %v1181_v16, %v1180_v14  ;;  %v1188_v21 = vadd.f32 %v1187_v17, %v1186_v15 }
 0x2f8   :  { %v5200_v22 = vpop.f32.mrf.mxu1  ;;  %v5222_v23 = vpop.f32.mrf.mxu0 }
 0x2f9   :  { %v1201_v24 = vmul.f32 0.125, %v1182_v20  ;;  %v1202_v25 = vmul.f32 0.125, %v1188_v21  ;;  %v5201_v26 = vadd.f32 %v5200_v22, %v5199_v18  ;;  %v5223_v27 = vadd.f32 %v5222_v23, %v5221_v19 }
 0x2fa   :  { %v5202_v28 = vpop.f32.mrf.mxu1  ;;  %v5224_v29 = vpop.f32.mrf.mxu0 }
 0x2fb   :  { %v1205_v30 = vadd.f32 0.8, %v1201_v24  ;;  %v1206_v31 = vadd.f32 0.8, %v1202_v25  ;;  %v1153_v32 = vrot.slane %v5201_v26, 4  ;;  %v1159_v33 = vrot.slane %v5223_v27, 4 }
 0x2fc   :  { %v5203_v34 = vpop.f32.mrf.mxu1  ;;  %v5225_v35 = vpop.f32.mrf.mxu0 }
 0x2fd   :  { %5549 = vrsqrt.f32 %v1205_v30  ;;  %v1154_v36 = vadd.f32 %v5201_v26, %v1153_v32  ;;  %v1160_v37 = vadd.f32 %v5223_v27, %v1159_v33 }
 0x2fe   :  { %5551 = vrsqrt.f32 %v1206_v31 }
 0x2ff   :  { %v1155_v38 = vrot.slane %v1154_v36, 2  ;;  %v1161_v39 = vrot.slane %v1160_v37, 2 }
 0x301   :  { %v1156_v40 = vadd.f32 %v1155_v38, %v1154_v36  ;;  %v1162_v41 = vadd.f32 %v1161_v39, %v1160_v37 }
 0x303   :  { %v1157_v42 = vrot.slane %v1156_v40, 1  ;;  %v1163_v43 = vrot.slane %v1162_v41, 1 }
 0x305   :  { %v1158_v44 = vadd.f32 %v1157_v42, %v1156_v40  ;;  %v1164_v45 = vadd.f32 %v1163_v43, %v1162_v41 }
 0x307   :  { %v1167_v47 = vmul.f32 0.125, %v1158_v44  ;;  %v1168_v48 = vmul.f32 0.125, %v1164_v45 }
 0x309   :  { %v1171_v54 = vsub.f32 %v5201_v26, %v1167_v47  ;;  %v1172_v55 = vsub.f32 %v5223_v27, %v1168_v48  ;;  %v6288_v26 = vsub.s32 2, %v6263_v50  ;;  %v6291_v27 = vsub.s32 3, %v6263_v50 }
 0x30a   :  { %v5550_v56 = vpop.eup %5549 }
 0x30b   :  { %v5552_v58 = vpop.eup %5551  ;;  %v1213_v59 = vmul.f32 %v5550_v56, %v1169_v4  ;;  %v1175_v61 = vmul.f32 %v1171_v54, %v1171_v54  ;;  %v1176_v62 = vmul.f32 %v1172_v55, %v1172_v55  ;;  %v1229_v28 = vrot.slane %v1138_v46, %v6288_v26 }
 0x30c   :  { %v1214_v63 = vmul.f32 %v5552_v58, %v1170_v5  ;;  %v1233_v30 = vrot.slane %v1138_v46, %v6291_v27  ;;  %v1254_v33 = vrot.slane %v1140_v49, %v6288_v26  ;;  %v1258_v35 = vrot.slane %v1140_v49, %v6291_v27 }
 0x30d   :  { %v1238_v2 = vmul.f32 %v1221_v52, %v1213_v59  ;;  %v1189_v3 = vrot.slane %v1175_v61, 4  ;;  %v1195_v6 = vrot.slane %v1176_v62, 4 }
 0x30e   :  { %v1239_v7 = vmul.f32 %v1225_v57, %v1214_v63 }
 0x30f   :  { %v1263_v8 = vadd.f32 %v1246_v60, %v1238_v2  ;;  %v1190_v9 = vadd.f32 %v1189_v3, %v1175_v61  ;;  %v1196_v10 = vadd.f32 %v1195_v6, %v1176_v62 }
 0x310   :  { %v1264_v11 = vadd.f32 %v1250_v0, %v1239_v7 }
 0x311   :  { %vm1267_vm4 = vcmp.gt.f32.partialorder %v1263_v8, 0.0  ;;  %v1271_v12 = vmul.f32 0.2, %v1263_v8  ;;  %v1191_v13 = vrot.slane %v1190_v9, 2  ;;  %v1197_v14 = vrot.slane %v1196_v10, 2 }
 0x312   :  { %vm1268_vm5 = vcmp.gt.f32.partialorder %v1264_v11, 0.0  ;;  %v1272_v4 = vmul.f32 0.2, %v1264_v11 }
 0x313   :  { %v6285_v15 = vsel %vm1267_vm4, %v1263_v8, %v1271_v12  ;;  %v1192_v16 = vadd.f32 %v1191_v13, %v1190_v9  ;;  %v1198_v5 = vadd.f32 %v1197_v14, %v1196_v10 }
 0x314   :  { %v1276_v17 = vsel %vm1268_vm5, %v1264_v11, %v1272_v4 }
 0x315   :  { %v1193_v18 = vrot.slane %v1192_v16, 1  ;;  %v1199_v19 = vrot.slane %v1198_v5, 1 }
 0x317   :  { %v1194_v20 = vadd.f32 %v1193_v18, %v1192_v16  ;;  %v1200_v21 = vadd.f32 %v1199_v19, %v1198_v5 }
 0x319   :  { %v1203_v22 = vmul.f32 0.125, %v1194_v20  ;;  %v1204_v23 = vmul.f32 0.125, %v1200_v21 }
 0x31b   :  { %v1207_v24 = vadd.f32 0.8, %v1203_v22  ;;  %v1208_v25 = vadd.f32 0.8, %v1204_v23 }
 0x31d   :  { %5553 = vrsqrt.f32 %v1207_v24 }
 0x31e   :  { %5555 = vrsqrt.f32 %v1208_v25 }
 0x32a   :  { %v5554_v29 = vpop.eup %5553 }
 0x32b   :  { %v5556_v31 = vpop.eup %5555  ;;  %v1215_v32 = vmul.f32 %v5554_v29, %v1171_v54 }
 0x32c   :  { %v1216_v34 = vmul.f32 %v5556_v31, %v1172_v55 }
 0x32d   :  { %v1240_v36 = vmul.f32 %v1229_v28, %v1215_v32 }
 0x32e   :  { %v1241_v37 = vmul.f32 %v1233_v30, %v1216_v34 }
 0x32f   :  { %v1265_v38 = vadd.f32 %v1254_v33, %v1240_v36 }
 0x330   :  { %v1266_v39 = vadd.f32 %v1258_v35, %v1241_v37 }
 0x331   :  { %vm1269_vm6 = vcmp.gt.f32.partialorder %v1265_v38, 0.0  ;;  %v1273_v40 = vmul.f32 0.2, %v1265_v38 }
 0x332   :  { %vm1270_vm7 = vcmp.gt.f32.partialorder %v1266_v39, 0.0  ;;  %v1274_v41 = vmul.f32 0.2, %v1266_v39 }
 0x333   :  { %v6297_v42 = vsel %vm1269_vm6, %v1265_v38, %v1273_v40 }
 0x334   :  { %v1278_v43 = vsel %vm1270_vm7, %v1266_v39, %v1274_v41 }
 0x335   :  { %6169 = dma.done.wait [#allocation5 + $0x1], 36864 }
 0x336   :  { %6170 = vsyncadd [#allocation5 + $0x1], 4294930432  ;;  %v6299_v44 = vpack.c.bf16 %v1276_v17, %v1276_v17  ;;  %v6301_v45 = vpack.c.bf16 %v1278_v43, %v1278_v43  ;;  %v5557_v46 = vld [vmem:[#allocation3 + $0x1fc] ss:$36 sps:$4 sm:$0xff]   ;;  %v5563_v52 = vld [vmem:[#allocation3 + $0x1b4] ss:$36 sps:$4 sm:$0xff]  }
 0x337   :  { %v5559_v47 = vld [vmem:[#allocation3 + $0x67c] ss:$36 sps:$4 sm:$0xff]   ;;  %3079 = vmatprep.subr.bf16.mxu1 %v5557_v46  ;;  %v5565_v54 = vld [vmem:[#allocation3 + $0x634] ss:$36 sps:$4 sm:$0xff]   ;;  %v5569_v57 = vld [vmem:[#allocation3 + $0x16c] ss:$36 sps:$4 sm:$0xff]  }
 0x338   :  { %3111 = vmatprep.mubr.bf16.mxu1 %v6299_v44  ;;  %3152 = vmatprep.mubr.bf16.mxu0 %v6301_v45  ;;  %v5561_v48 = vld [vmem:[#allocation3 + $0x1f8] ss:$36 sps:$4 sm:$0xff]   ;;  %v5567_v55 = vld [vmem:[#allocation3 + $0x1b0] ss:$36 sps:$4 sm:$0xff]   ;;  %v5573_v59 = vld [vmem:[#allocation3 + $0x168] ss:$36 sps:$4 sm:$0xff]  }
 0x339   :  { %v5562_v49 = vld [vmem:[#allocation3 + $0x678] ss:$36 sps:$4 sm:$0xff]   ;;  %3120 = vmatprep.subr.bf16.mxu0 %v5559_v47  ;;  %3080 = vmatpush1.bf16.msra.mxu1 %v5561_v48  ;;  %v5568_v56 = vld [vmem:[#allocation3 + $0x630] ss:$36 sps:$4 sm:$0xff]   ;;  %v5574_v60 = vld [vmem:[#allocation3 + $0x5e8] ss:$36 sps:$4 sm:$0xff]  }
 0x33a   :  { %3121 = vmatpush1.bf16.msra.mxu0 %v5562_v49  ;;  %3081 = vmatprep.subr.bf16.mxu1 %v5563_v52  ;;  %v5571_v58 = vld [vmem:[#allocation3 + $0x5ec] ss:$36 sps:$4 sm:$0xff]   ;;  %v5575_v61 = vld [vmem:[#allocation3 + $0x124] ss:$36 sps:$4 sm:$0xff]   ;;  %v5581_v2 = vld [vmem:[#allocation3 + $0xdc] ss:$36 sps:$4 sm:$0xff]  }
 0x33b   :  { %3122 = vmatprep.subr.bf16.mxu0 %v5565_v54  ;;  %v5577_v62 = vld [vmem:[#allocation3 + $0x5a4] ss:$36 sps:$4 sm:$0xff]   ;;  %v5583_v3 = vld [vmem:[#allocation3 + $0x55c] ss:$36 sps:$4 sm:$0xff]   ;;  %v5587_v8 = vld [vmem:[#allocation3 + $0x94] ss:$36 sps:$4 sm:$0xff]  }
 0x33c   :  { %v5579_v63 = vld [vmem:[#allocation3 + $0x120] ss:$36 sps:$4 sm:$0xff]   ;;  %v5585_v6 = vld [vmem:[#allocation3 + $0xd8] ss:$36 sps:$4 sm:$0xff]   ;;  %v5591_v10 = vld [vmem:[#allocation3 + $0x90] ss:$36 sps:$4 sm:$0xff]  }
 0x33d   :  { %3082 = vmatpush1.bf16.msra.mxu1 %v5567_v55  ;;  %v5580_v0 = vld [vmem:[#allocation3 + $0x5a0] ss:$36 sps:$4 sm:$0xff]   ;;  %v5586_v7 = vld [vmem:[#allocation3 + $0x558] ss:$36 sps:$4 sm:$0xff]   ;;  %v5592_v11 = vld [vmem:[#allocation3 + $0x510] ss:$36 sps:$4 sm:$0xff]  }
 0x33e   :  { %3123 = vmatpush1.bf16.msra.mxu0 %v5568_v56  ;;  %3083 = vmatprep.subr.bf16.mxu1 %v5569_v57  ;;  %v5589_v9 = vld [vmem:[#allocation3 + $0x514] ss:$36 sps:$4 sm:$0xff]   ;;  %v5593_v12 = vld [vmem:[#allocation3 + $0x4c] ss:$36 sps:$4 sm:$0xff]   ;;  %v5599_v16 = vld [vmem:[#allocation3 + $0x4] ss:$36 sps:$4 sm:$0xff]  }
 0x33f   :  { %3124 = vmatprep.subr.bf16.mxu0 %v5571_v58  ;;  %v5595_v13 = vld [vmem:[#allocation3 + $0x4cc] ss:$36 sps:$4 sm:$0xff]   ;;  %v5601_v5 = vld [vmem:[#allocation3 + $0x484] ss:$36 sps:$4 sm:$0xff]   ;;  %v5605_v19 = vld [vmem:[#allocation3 + $0x43c] ss:$36 sps:$4 sm:$0xff]  }
 0x340   :  { %v5597_v14 = vld [vmem:[#allocation3 + $0x48] ss:$36 sps:$4 sm:$0xff]   ;;  %v5603_v17 = vld [vmem:[#allocation3] ss:$36 sps:$4 sm:$0xff]   ;;  %v5609_v21 = vld [vmem:[#allocation3 + $0x438] ss:$36 sps:$4 sm:$0xff]  }
 0x341   :  { %3084 = vmatpush1.bf16.msra.mxu1 %v5573_v59  ;;  %v5598_v4 = vld [vmem:[#allocation3 + $0x4c8] ss:$36 sps:$4 sm:$0xff]   ;;  %v5604_v18 = vld [vmem:[#allocation3 + $0x480] ss:$36 sps:$4 sm:$0xff]   ;;  %v5610_v22 = vld [vmem:[#allocation3 + $0x8b8] ss:$36 sps:$4 sm:$0xff]  }
 0x342   :  { %3125 = vmatpush1.bf16.msra.mxu0 %v5574_v60  ;;  %3085 = vmatprep.subr.bf16.mxu1 %v5575_v61  ;;  %v5607_v20 = vld [vmem:[#allocation3 + $0x8bc] ss:$36 sps:$4 sm:$0xff]   ;;  %v5611_v23 = vld [vmem:[#allocation3 + $0x3f4] ss:$36 sps:$4 sm:$0xff]   ;;  %v5617_v29 = vld [vmem:[#allocation3 + $0x3ac] ss:$36 sps:$4 sm:$0xff]   ;;  %v6307_v61 = vpack.c.bf16 %v6285_v15, %v6285_v15 }
 0x343   :  { %3126 = vmatprep.subr.bf16.mxu0 %v5577_v62  ;;  %v5613_v24 = vld [vmem:[#allocation3 + $0x874] ss:$36 sps:$4 sm:$0xff]   ;;  %v5619_v30 = vld [vmem:[#allocation3 + $0x82c] ss:$36 sps:$4 sm:$0xff]   ;;  %v5623_v33 = vld [vmem:[#allocation3 + $0x364] ss:$36 sps:$4 sm:$0xff]   ;;  %v6311_v62 = vpack.c.bf16 %v6297_v42, %v6297_v42 }
 0x344   :  { %v5615_v25 = vld [vmem:[#allocation3 + $0x3f0] ss:$36 sps:$4 sm:$0xff]   ;;  %v5621_v31 = vld [vmem:[#allocation3 + $0x3a8] ss:$36 sps:$4 sm:$0xff]   ;;  %v5627_v35 = vld [vmem:[#allocation3 + $0x360] ss:$36 sps:$4 sm:$0xff]  }
 0x345   :  { %3086 = vmatpush1.bf16.msra.mxu1 %v5579_v63  ;;  %v5616_v28 = vld [vmem:[#allocation3 + $0x870] ss:$36 sps:$4 sm:$0xff]   ;;  %v5622_v32 = vld [vmem:[#allocation3 + $0x828] ss:$36 sps:$4 sm:$0xff]   ;;  %v5628_v36 = vld [vmem:[#allocation3 + $0x7e0] ss:$36 sps:$4 sm:$0xff]  }
 0x346   :  { %3127 = vmatpush1.bf16.msra.mxu0 %v5580_v0  ;;  %3087 = vmatprep.subr.bf16.mxu1 %v5581_v2  ;;  %v5625_v34 = vld [vmem:[#allocation3 + $0x7e4] ss:$36 sps:$4 sm:$0xff]   ;;  %v5629_v37 = vld [vmem:[#allocation3 + $0x31c] ss:$36 sps:$4 sm:$0xff]   ;;  %v5635_v41 = vld [vmem:[#allocation3 + $0x2d4] ss:$36 sps:$4 sm:$0xff]  }
 0x347   :  { %3128 = vmatprep.subr.bf16.mxu0 %v5583_v3  ;;  %v5631_v38 = vld [vmem:[#allocation3 + $0x79c] ss:$36 sps:$4 sm:$0xff]   ;;  %v5637_v43 = vld [vmem:[#allocation3 + $0x754] ss:$36 sps:$4 sm:$0xff]   ;;  %v5641_v48 = vld [vmem:[#allocation3 + $0x28c] ss:$36 sps:$4 sm:$0xff]  }
 0x348   :  { %v5633_v39 = vld [vmem:[#allocation3 + $0x318] ss:$36 sps:$4 sm:$0xff]   ;;  %v5639_v46 = vld [vmem:[#allocation3 + $0x2d0] ss:$36 sps:$4 sm:$0xff]   ;;  %v5645_v52 = vld [vmem:[#allocation3 + $0x288] ss:$36 sps:$4 sm:$0xff]  }
 0x349   :  { %3088 = vmatpush1.bf16.msra.mxu1 %v5585_v6  ;;  %v5634_v40 = vld [vmem:[#allocation3 + $0x798] ss:$36 sps:$4 sm:$0xff]   ;;  %v5640_v47 = vld [vmem:[#allocation3 + $0x750] ss:$36 sps:$4 sm:$0xff]   ;;  %v5646_v54 = vld [vmem:[#allocation3 + $0x708] ss:$36 sps:$4 sm:$0xff]  }
 0x34a   :  { %3129 = vmatpush1.bf16.msra.mxu0 %v5586_v7  ;;  %3089 = vmatprep.subr.bf16.mxu1 %v5587_v8  ;;  %v5643_v49 = vld [vmem:[#allocation3 + $0x70c] ss:$36 sps:$4 sm:$0xff]   ;;  %v5647_v55 = vld [vmem:[#allocation3 + $0x244] ss:$36 sps:$4 sm:$0xff]   ;;  %v5661_v2 = vld [vmem:[#allocation3 + $0x1bc] ss:$36 sps:$4 sm:$0xff]  }
 0x34b   :  { %3130 = vmatprep.subr.bf16.mxu0 %v5589_v9  ;;  %v5649_v56 = vld [vmem:[#allocation3 + $0x6c4] ss:$36 sps:$4 sm:$0xff]   ;;  %v5664_v3 = vld [vmem:[#allocation3 + $0x63c] ss:$36 sps:$4 sm:$0xff]   ;;  %v5667_v15 = vld [vmem:[#allocation3 + $0x174] ss:$36 sps:$4 sm:$0xff]  }
 0x34c   :  { %v5651_v57 = vld [vmem:[#allocation3 + $0x240] ss:$36 sps:$4 sm:$0xff]   ;;  %v5659_v6 = vld [vmem:[#allocation3 + $0x1b8] ss:$36 sps:$4 sm:$0xff]   ;;  %v5665_v8 = vld [vmem:[#allocation3 + $0x170] ss:$36 sps:$4 sm:$0xff]  }
 0x34d   :  { %3090 = vmatpush1.bf16.msra.mxu1 %v5591_v10  ;;  %v5652_v58 = vld [vmem:[#allocation3 + $0x6c0] ss:$36 sps:$4 sm:$0xff]   ;;  %v5662_v7 = vld [vmem:[#allocation3 + $0x638] ss:$36 sps:$4 sm:$0xff]   ;;  %v5668_v9 = vld [vmem:[#allocation3 + $0x5f0] ss:$36 sps:$4 sm:$0xff]  }
 0x34e   :  { %3131 = vmatpush1.bf16.msra.mxu0 %v5592_v11  ;;  %3091 = vmatprep.subr.bf16.mxu1 %v5593_v12  ;;  %v5655_v59 = vld [vmem:[#allocation3 + $0x204] ss:$36 sps:$4 sm:$0xff]   ;;  %v5670_v42 = vld [vmem:[#allocation3 + $0x5f4] ss:$36 sps:$4 sm:$0xff]   ;;  %v5673_v10 = vld [vmem:[#allocation3 + $0x12c] ss:$36 sps:$4 sm:$0xff]  }
 0x34f   :  { %3132 = vmatprep.subr.bf16.mxu0 %v5595_v13  ;;  %v5658_v60 = vld [vmem:[#allocation3 + $0x684] ss:$36 sps:$4 sm:$0xff]   ;;  %v5676_v11 = vld [vmem:[#allocation3 + $0x5ac] ss:$36 sps:$4 sm:$0xff]  }
 0x350   :  { %v5653_v63 = vld [vmem:[#allocation3 + $0x200] ss:$36 sps:$4 sm:$0xff]   ;;  %v5671_v12 = vld [vmem:[#allocation3 + $0x128] ss:$36 sps:$4 sm:$0xff]  }
 0x351   :  { %3092 = vmatpush1.bf16.msra.mxu1 %v5597_v14  ;;  %v5656_v0 = vld [vmem:[#allocation3 + $0x680] ss:$36 sps:$4 sm:$0xff]   ;;  %v5674_v13 = vld [vmem:[#allocation3 + $0x5a8] ss:$36 sps:$4 sm:$0xff]  }
 0x352   :  { %3133 = vmatpush1.bf16.msra.mxu0 %v5598_v4  ;;  %3093 = vmatprep.subr.bf16.mxu1 %v5599_v16  ;;  %v5679_v14 = vld [vmem:[#allocation3 + $0xe4] ss:$36 sps:$4 sm:$0xff]  }
 0x353   :  { %3134 = vmatprep.subr.bf16.mxu0 %v5601_v5  ;;  %v5682_v4 = vld [vmem:[#allocation3 + $0x564] ss:$36 sps:$4 sm:$0xff]  }
 0x354   :  { %v5677_v16 = vld [vmem:[#allocation3 + $0xe0] ss:$36 sps:$4 sm:$0xff]  }
 0x355   :  { %3094 = vmatpush1.bf16.msra.mxu1 %v5603_v17  ;;  %v5680_v5 = vld [vmem:[#allocation3 + $0x560] ss:$36 sps:$4 sm:$0xff]  }
 0x356   :  { %3135 = vmatpush1.bf16.msra.mxu0 %v5604_v18  ;;  %3095 = vmatprep.subr.bf16.mxu1 %v5605_v19  ;;  %v5685_v17 = vld [vmem:[#allocation3 + $0x9c] ss:$36 sps:$4 sm:$0xff]  }
 0x357   :  { %3136 = vmatprep.subr.bf16.mxu0 %v5607_v20  ;;  %v5688_v18 = vld [vmem:[#allocation3 + $0x51c] ss:$36 sps:$4 sm:$0xff]  }
 0x358   :  { %v5683_v19 = vld [vmem:[#allocation3 + $0x98] ss:$36 sps:$4 sm:$0xff]  }
 0x359   :  { %3096 = vmatpush2.bf16.msra.mxu1 %v5609_v21  ;;  %v5686_v20 = vld [vmem:[#allocation3 + $0x518] ss:$36 sps:$4 sm:$0xff]  }
 0x35a   :  { %3137 = vmatpush2.bf16.msra.mxu0 %v5610_v22  ;;  %3097 = vmatprep.subr.bf16.mxu1 %v5611_v23  ;;  %v5691_v21 = vld [vmem:[#allocation3 + $0x54] ss:$36 sps:$4 sm:$0xff]  }
 0x35b   :  { %3138 = vmatprep.subr.bf16.mxu0 %v5613_v24  ;;  %v5694_v22 = vld [vmem:[#allocation3 + $0x4d4] ss:$36 sps:$4 sm:$0xff]  }
 0x35c   :  { %v5689_v23 = vld [vmem:[#allocation3 + $0x50] ss:$36 sps:$4 sm:$0xff]  }
 0x35d   :  { %3098 = vmatpush2.bf16.msra.mxu1 %v5615_v25  ;;  %v5692_v24 = vld [vmem:[#allocation3 + $0x4d0] ss:$36 sps:$4 sm:$0xff]  }
 0x35e   :  { %3139 = vmatpush2.bf16.msra.mxu0 %v5616_v28  ;;  %3099 = vmatprep.subr.bf16.mxu1 %v5617_v29  ;;  %v5697_v25 = vld [vmem:[#allocation3 + $0xc] ss:$36 sps:$4 sm:$0xff]  }
 0x35f   :  { %3140 = vmatprep.subr.bf16.mxu0 %v5619_v30  ;;  %v5700_v28 = vld [vmem:[#allocation3 + $0x48c] ss:$36 sps:$4 sm:$0xff]  }
 0x360   :  { %v5695_v29 = vld [vmem:[#allocation3 + $0x8] ss:$36 sps:$4 sm:$0xff]  }
 0x361   :  { %3100 = vmatpush2.bf16.msra.mxu1 %v5621_v31  ;;  %v5698_v30 = vld [vmem:[#allocation3 + $0x488] ss:$36 sps:$4 sm:$0xff]  }
 0x362   :  { %3141 = vmatpush2.bf16.msra.mxu0 %v5622_v32  ;;  %3101 = vmatprep.subr.bf16.mxu1 %v5623_v33  ;;  %v5703_v31 = vld [vmem:[#allocation3 + $0x444] ss:$36 sps:$4 sm:$0xff]  }
 0x363   :  { %3142 = vmatprep.subr.bf16.mxu0 %v5625_v34  ;;  %v5706_v32 = vld [vmem:[#allocation3 + $0x8c4] ss:$36 sps:$4 sm:$0xff]  }
 0x364   :  { %v5701_v33 = vld [vmem:[#allocation3 + $0x440] ss:$36 sps:$4 sm:$0xff]  }
 0x365   :  { %3102 = vmatpush2.bf16.msra.mxu1 %v5627_v35  ;;  %v5704_v34 = vld [vmem:[#allocation3 + $0x8c0] ss:$36 sps:$4 sm:$0xff]  }
 0x366   :  { %3143 = vmatpush2.bf16.msra.mxu0 %v5628_v36  ;;  %3103 = vmatprep.subr.bf16.mxu1 %v5629_v37  ;;  %v5709_v35 = vld [vmem:[#allocation3 + $0x3fc] ss:$36 sps:$4 sm:$0xff]  }
 0x367   :  { %3144 = vmatprep.subr.bf16.mxu0 %v5631_v38  ;;  %v5712_v36 = vld [vmem:[#allocation3 + $0x87c] ss:$36 sps:$4 sm:$0xff]  }
 0x368   :  { %v5707_v37 = vld [vmem:[#allocation3 + $0x3f8] ss:$36 sps:$4 sm:$0xff]  }
 0x369   :  { %3104 = vmatpush2.bf16.msra.mxu1 %v5633_v39  ;;  %v5710_v38 = vld [vmem:[#allocation3 + $0x878] ss:$36 sps:$4 sm:$0xff]  }
 0x36a   :  { %3145 = vmatpush2.bf16.msra.mxu0 %v5634_v40  ;;  %3105 = vmatprep.subr.bf16.mxu1 %v5635_v41  ;;  %v5715_v39 = vld [vmem:[#allocation3 + $0x3b4] ss:$36 sps:$4 sm:$0xff]  }
 0x36b   :  { %3146 = vmatprep.subr.bf16.mxu0 %v5637_v43  ;;  %v5718_v40 = vld [vmem:[#allocation3 + $0x834] ss:$36 sps:$4 sm:$0xff]  }
 0x36c   :  { %v5713_v41 = vld [vmem:[#allocation3 + $0x3b0] ss:$36 sps:$4 sm:$0xff]  }
 0x36d   :  { %3106 = vmatpush2.bf16.msra.mxu1 %v5639_v46  ;;  %v5716_v43 = vld [vmem:[#allocation3 + $0x830] ss:$36 sps:$4 sm:$0xff]  }
 0x36e   :  { %3147 = vmatpush2.bf16.msra.mxu0 %v5640_v47  ;;  %3107 = vmatprep.subr.bf16.mxu1 %v5641_v48  ;;  %v5721_v46 = vld [vmem:[#allocation3 + $0x36c] ss:$36 sps:$4 sm:$0xff]  }
 0x36f   :  { %3148 = vmatprep.subr.bf16.mxu0 %v5643_v49  ;;  %v5724_v47 = vld [vmem:[#allocation3 + $0x7ec] ss:$36 sps:$4 sm:$0xff]  }
 0x370   :  { %v5719_v48 = vld [vmem:[#allocation3 + $0x368] ss:$36 sps:$4 sm:$0xff]  }
 0x371   :  { %3108 = vmatpush2.bf16.msra.mxu1 %v5645_v52  ;;  %v5722_v49 = vld [vmem:[#allocation3 + $0x7e8] ss:$36 sps:$4 sm:$0xff]  }
 0x372   :  { %3149 = vmatpush2.bf16.msra.mxu0 %v5646_v54  ;;  %3109 = vmatprep.subr.bf16.mxu1 %v5647_v55  ;;  %v5727_v52 = vld [vmem:[#allocation3 + $0x324] ss:$36 sps:$4 sm:$0xff]  }
 0x373   :  { %3150 = vmatprep.subr.bf16.mxu0 %v5649_v56  ;;  %v5730_v54 = vld [vmem:[#allocation3 + $0x7a4] ss:$36 sps:$4 sm:$0xff]  }
 0x374   :  { %v5725_v55 = vld [vmem:[#allocation3 + $0x320] ss:$36 sps:$4 sm:$0xff]  }
 0x375   :  { %3110 = vmatpush2.bf16.msra.mxu1 %v5651_v57  ;;  %v5728_v56 = vld [vmem:[#allocation3 + $0x7a0] ss:$36 sps:$4 sm:$0xff]  }
 0x376   :  { %3151 = vmatpush2.bf16.msra.mxu0 %v5652_v58  ;;  %3161 = vmatprep.subr.bf16.mxu1 %v5655_v59  ;;  %v5733_v57 = vld [vmem:[#allocation3 + $0x2dc] ss:$36 sps:$4 sm:$0xff]  }
 0x377   :  { %3202 = vmatprep.subr.bf16.mxu0 %v5658_v60  ;;  %v5736_v58 = vld [vmem:[#allocation3 + $0x75c] ss:$36 sps:$4 sm:$0xff]  }
 0x378   :  { %3112 = vmatmul.mubr.bf16.vlgmr.msra.gmra.mxu1 %v6307_v61  ;;  %v5731_v59 = vld [vmem:[#allocation3 + $0x2d8] ss:$36 sps:$4 sm:$0xff]  }
 0x379   :  { %3153 = vmatmul.mubr.bf16.vlgmr.msra.gmra.mxu0 %v6311_v62  ;;  %3162 = vmatpush1.bf16.msra.mxu1 %v5653_v63  ;;  %v5734_v60 = vld [vmem:[#allocation3 + $0x758] ss:$36 sps:$4 sm:$0xff]  }
 0x37a   :  { %3203 = vmatpush1.bf16.msra.mxu0 %v5656_v0  ;;  %3163 = vmatprep.subr.bf16.mxu1 %v5661_v2  ;;  %v5739_v63 = vld [vmem:[#allocation3 + $0x294] ss:$36 sps:$4 sm:$0xff]  }
 0x37b   :  { %3204 = vmatprep.subr.bf16.mxu0 %v5664_v3  ;;  %3193 = vmatprep.mubr.bf16.mxu1 %v6299_v44  ;;  %v5742_v0 = vld [vmem:[#allocation3 + $0x714] ss:$36 sps:$4 sm:$0xff]  }
 0x37c   :  { %3234 = vmatprep.mubr.bf16.mxu0 %v6301_v45  ;;  %v5737_v2 = vld [vmem:[#allocation3 + $0x290] ss:$36 sps:$4 sm:$0xff]  }
 0x37d   :  { %3164 = vmatpush1.bf16.msra.mxu1 %v5659_v6  ;;  %v5740_v3 = vld [vmem:[#allocation3 + $0x710] ss:$36 sps:$4 sm:$0xff]  }
 0x37e   :  { %3205 = vmatpush1.bf16.msra.mxu0 %v5662_v7  ;;  %3165 = vmatprep.subr.bf16.mxu1 %v5667_v15  ;;  %v5745_v6 = vld [vmem:[#allocation3 + $0x24c] ss:$36 sps:$4 sm:$0xff]  }
 0x37f   :  { %3206 = vmatprep.subr.bf16.mxu0 %v5670_v42  ;;  %v5748_v7 = vld [vmem:[#allocation3 + $0x6cc] ss:$36 sps:$4 sm:$0xff]  }
 0x380   :  { %v5743_v15 = vld [vmem:[#allocation3 + $0x248] ss:$36 sps:$4 sm:$0xff]  }
 0x381   :  { %3166 = vmatpush1.bf16.msra.mxu1 %v5665_v8  ;;  %v5746_v42 = vld [vmem:[#allocation3 + $0x6c8] ss:$36 sps:$4 sm:$0xff]  }
 0x382   :  { %3207 = vmatpush1.bf16.msra.mxu0 %v5668_v9  ;;  %3167 = vmatprep.subr.bf16.mxu1 %v5673_v10  ;;  %v5751_v8 = vld [vmem:[#allocation3 + $0x20c] ss:$36 sps:$4 sm:$0xff]  }
 0x383   :  { %3208 = vmatprep.subr.bf16.mxu0 %v5676_v11  ;;  %v5754_v9 = vld [vmem:[#allocation3 + $0x68c] ss:$36 sps:$4 sm:$0xff]  }
 0x384   :  { %v5749_v10 = vld [vmem:[#allocation3 + $0x208] ss:$36 sps:$4 sm:$0xff]  }
 0x385   :  { %3168 = vmatpush1.bf16.msra.mxu1 %v5671_v12  ;;  %v5752_v11 = vld [vmem:[#allocation3 + $0x688] ss:$36 sps:$4 sm:$0xff]  }
 0x386   :  { %3209 = vmatpush1.bf16.msra.mxu0 %v5674_v13  ;;  %3169 = vmatprep.subr.bf16.mxu1 %v5679_v14  ;;  %v5757_v12 = vld [vmem:[#allocation3 + $0x1c4] ss:$36 sps:$4 sm:$0xff]  }
 0x387   :  { %3210 = vmatprep.subr.bf16.mxu0 %v5682_v4  ;;  %v5760_v13 = vld [vmem:[#allocation3 + $0x644] ss:$36 sps:$4 sm:$0xff]  }
 0x388   :  { %v5755_v14 = vld [vmem:[#allocation3 + $0x1c0] ss:$36 sps:$4 sm:$0xff]  }
 0x389   :  { %3170 = vmatpush1.bf16.msra.mxu1 %v5677_v16  ;;  %v5758_v4 = vld [vmem:[#allocation3 + $0x640] ss:$36 sps:$4 sm:$0xff]  }
 0x38a   :  { %3211 = vmatpush1.bf16.msra.mxu0 %v5680_v5  ;;  %3171 = vmatprep.subr.bf16.mxu1 %v5685_v17  ;;  %v5763_v16 = vld [vmem:[#allocation3 + $0x17c] ss:$36 sps:$4 sm:$0xff]  }
 0x38b   :  { %3212 = vmatprep.subr.bf16.mxu0 %v5688_v18  ;;  %v5766_v5 = vld [vmem:[#allocation3 + $0x5fc] ss:$36 sps:$4 sm:$0xff]  }
 0x38c   :  { %v5761_v17 = vld [vmem:[#allocation3 + $0x178] ss:$36 sps:$4 sm:$0xff]  }
 0x38d   :  { %3172 = vmatpush1.bf16.msra.mxu1 %v5683_v19  ;;  %v5764_v18 = vld [vmem:[#allocation3 + $0x5f8] ss:$36 sps:$4 sm:$0xff]  }
 0x38e   :  { %3213 = vmatpush1.bf16.msra.mxu0 %v5686_v20  ;;  %3173 = vmatprep.subr.bf16.mxu1 %v5691_v21  ;;  %v5769_v19 = vld [vmem:[#allocation3 + $0x134] ss:$36 sps:$4 sm:$0xff]  }
 0x38f   :  { %3214 = vmatprep.subr.bf16.mxu0 %v5694_v22  ;;  %v5772_v20 = vld [vmem:[#allocation3 + $0x5b4] ss:$36 sps:$4 sm:$0xff]  }
 0x390   :  { %v5767_v21 = vld [vmem:[#allocation3 + $0x130] ss:$36 sps:$4 sm:$0xff]  }
 0x391   :  { %3174 = vmatpush1.bf16.msra.mxu1 %v5689_v23  ;;  %v5770_v22 = vld [vmem:[#allocation3 + $0x5b0] ss:$36 sps:$4 sm:$0xff]  }
 0x392   :  { %3215 = vmatpush1.bf16.msra.mxu0 %v5692_v24  ;;  %3175 = vmatprep.subr.bf16.mxu1 %v5697_v25  ;;  %v5775_v23 = vld [vmem:[#allocation3 + $0xec] ss:$36 sps:$4 sm:$0xff]  }
 0x393   :  { %3216 = vmatprep.subr.bf16.mxu0 %v5700_v28  ;;  %v5778_v24 = vld [vmem:[#allocation3 + $0x56c] ss:$36 sps:$4 sm:$0xff]  }
 0x394   :  { %v5773_v25 = vld [vmem:[#allocation3 + $0xe8] ss:$36 sps:$4 sm:$0xff]  }
 0x395   :  { %3176 = vmatpush1.bf16.msra.mxu1 %v5695_v29  ;;  %v5776_v28 = vld [vmem:[#allocation3 + $0x568] ss:$36 sps:$4 sm:$0xff]  }
 0x396   :  { %3217 = vmatpush1.bf16.msra.mxu0 %v5698_v30  ;;  %3177 = vmatprep.subr.bf16.mxu1 %v5703_v31  ;;  %v5781_v29 = vld [vmem:[#allocation3 + $0xa4] ss:$36 sps:$4 sm:$0xff]  }
 0x397   :  { %3218 = vmatprep.subr.bf16.mxu0 %v5706_v32  ;;  %v5784_v30 = vld [vmem:[#allocation3 + $0x524] ss:$36 sps:$4 sm:$0xff]  }
 0x398   :  { %v5779_v31 = vld [vmem:[#allocation3 + $0xa0] ss:$36 sps:$4 sm:$0xff]  }
 0x399   :  { %3178 = vmatpush2.bf16.msra.mxu1 %v5701_v33  ;;  %v5782_v32 = vld [vmem:[#allocation3 + $0x520] ss:$36 sps:$4 sm:$0xff]  }
 0x39a   :  { %3219 = vmatpush2.bf16.msra.mxu0 %v5704_v34  ;;  %3179 = vmatprep.subr.bf16.mxu1 %v5709_v35  ;;  %v5787_v33 = vld [vmem:[#allocation3 + $0x5c] ss:$36 sps:$4 sm:$0xff]  }
 0x39b   :  { %3220 = vmatprep.subr.bf16.mxu0 %v5712_v36  ;;  %v5790_v34 = vld [vmem:[#allocation3 + $0x4dc] ss:$36 sps:$4 sm:$0xff]  }
 0x39c   :  { %v5785_v35 = vld [vmem:[#allocation3 + $0x58] ss:$36 sps:$4 sm:$0xff]  }
 0x39d   :  { %3180 = vmatpush2.bf16.msra.mxu1 %v5707_v37  ;;  %v5788_v36 = vld [vmem:[#allocation3 + $0x4d8] ss:$36 sps:$4 sm:$0xff]  }
 0x39e   :  { %3221 = vmatpush2.bf16.msra.mxu0 %v5710_v38  ;;  %3181 = vmatprep.subr.bf16.mxu1 %v5715_v39  ;;  %v5793_v37 = vld [vmem:[#allocation3 + $0x14] ss:$36 sps:$4 sm:$0xff]  }
 0x39f   :  { %3222 = vmatprep.subr.bf16.mxu0 %v5718_v40  ;;  %v5796_v38 = vld [vmem:[#allocation3 + $0x494] ss:$36 sps:$4 sm:$0xff]  }
 0x3a0   :  { %v5791_v39 = vld [vmem:[#allocation3 + $0x10] ss:$36 sps:$4 sm:$0xff]  }
 0x3a1   :  { %3182 = vmatpush2.bf16.msra.mxu1 %v5713_v41  ;;  %v5794_v40 = vld [vmem:[#allocation3 + $0x490] ss:$36 sps:$4 sm:$0xff]  }
 0x3a2   :  { %3223 = vmatpush2.bf16.msra.mxu0 %v5716_v43  ;;  %3183 = vmatprep.subr.bf16.mxu1 %v5721_v46  ;;  %v5799_v41 = vld [vmem:[#allocation3 + $0x44c] ss:$36 sps:$4 sm:$0xff]  }
 0x3a3   :  { %3224 = vmatprep.subr.bf16.mxu0 %v5724_v47  ;;  %v5802_v43 = vld [vmem:[#allocation3 + $0x8cc] ss:$36 sps:$4 sm:$0xff]  }
 0x3a4   :  { %v5797_v46 = vld [vmem:[#allocation3 + $0x448] ss:$36 sps:$4 sm:$0xff]  }
 0x3a5   :  { %3184 = vmatpush2.bf16.msra.mxu1 %v5719_v48  ;;  %v5800_v47 = vld [vmem:[#allocation3 + $0x8c8] ss:$36 sps:$4 sm:$0xff]  }
 0x3a6   :  { %3225 = vmatpush2.bf16.msra.mxu0 %v5722_v49  ;;  %3185 = vmatprep.subr.bf16.mxu1 %v5727_v52  ;;  %v5805_v48 = vld [vmem:[#allocation3 + $0x404] ss:$36 sps:$4 sm:$0xff]  }
 0x3a7   :  { %3226 = vmatprep.subr.bf16.mxu0 %v5730_v54  ;;  %v5808_v49 = vld [vmem:[#allocation3 + $0x884] ss:$36 sps:$4 sm:$0xff]  }
 0x3a8   :  { %v5803_v52 = vld [vmem:[#allocation3 + $0x400] ss:$36 sps:$4 sm:$0xff]  }
 0x3a9   :  { %3186 = vmatpush2.bf16.msra.mxu1 %v5725_v55  ;;  %v5806_v54 = vld [vmem:[#allocation3 + $0x880] ss:$36 sps:$4 sm:$0xff]  }
 0x3aa   :  { %3227 = vmatpush2.bf16.msra.mxu0 %v5728_v56  ;;  %3187 = vmatprep.subr.bf16.mxu1 %v5733_v57  ;;  %v5811_v55 = vld [vmem:[#allocation3 + $0x3bc] ss:$36 sps:$4 sm:$0xff]  }
 0x3ab   :  { %3228 = vmatprep.subr.bf16.mxu0 %v5736_v58  ;;  %v5814_v56 = vld [vmem:[#allocation3 + $0x83c] ss:$36 sps:$4 sm:$0xff]  }
 0x3ac   :  { %v5809_v57 = vld [vmem:[#allocation3 + $0x3b8] ss:$36 sps:$4 sm:$0xff]  }
 0x3ad   :  { %3188 = vmatpush2.bf16.msra.mxu1 %v5731_v59  ;;  %v5812_v58 = vld [vmem:[#allocation3 + $0x838] ss:$36 sps:$4 sm:$0xff]  }
 0x3ae   :  { %3229 = vmatpush2.bf16.msra.mxu0 %v5734_v60  ;;  %3189 = vmatprep.subr.bf16.mxu1 %v5739_v63  ;;  %v5817_v59 = vld [vmem:[#allocation3 + $0x374] ss:$36 sps:$4 sm:$0xff]  }
 0x3af   :  { %3230 = vmatprep.subr.bf16.mxu0 %v5742_v0  ;;  %v5820_v60 = vld [vmem:[#allocation3 + $0x7f4] ss:$36 sps:$4 sm:$0xff]  }
 0x3b0   :  { %v5815_v63 = vld [vmem:[#allocation3 + $0x370] ss:$36 sps:$4 sm:$0xff]  }
 0x3b1   :  { %3190 = vmatpush2.bf16.msra.mxu1 %v5737_v2  ;;  %v5818_v0 = vld [vmem:[#allocation3 + $0x7f0] ss:$36 sps:$4 sm:$0xff]  }
 0x3b2   :  { %3231 = vmatpush2.bf16.msra.mxu0 %v5740_v3  ;;  %3191 = vmatprep.subr.bf16.mxu1 %v5745_v6  ;;  %v5823_v2 = vld [vmem:[#allocation3 + $0x32c] ss:$36 sps:$4 sm:$0xff]  }
 0x3b3   :  { %3232 = vmatprep.subr.bf16.mxu0 %v5748_v7  ;;  %v5826_v3 = vld [vmem:[#allocation3 + $0x7ac] ss:$36 sps:$4 sm:$0xff]  }
 0x3b4   :  { %v5821_v6 = vld [vmem:[#allocation3 + $0x328] ss:$36 sps:$4 sm:$0xff]  }
 0x3b5   :  { %3192 = vmatpush2.bf16.msra.mxu1 %v5743_v15  ;;  %v5824_v7 = vld [vmem:[#allocation3 + $0x7a8] ss:$36 sps:$4 sm:$0xff]  }
 0x3b6   :  { %3233 = vmatpush2.bf16.msra.mxu0 %v5746_v42  ;;  %3243 = vmatprep.subr.bf16.mxu1 %v5751_v8  ;;  %v5829_v15 = vld [vmem:[#allocation3 + $0x2e4] ss:$36 sps:$4 sm:$0xff]  }
 0x3b7   :  { %3284 = vmatprep.subr.bf16.mxu0 %v5754_v9  ;;  %v5832_v42 = vld [vmem:[#allocation3 + $0x764] ss:$36 sps:$4 sm:$0xff]  }
 0x3b8   :  { %3194 = vmatmul.mubr.bf16.vlgmr.msra.gmra.mxu1 %v6307_v61  ;;  %v5827_v8 = vld [vmem:[#allocation3 + $0x2e0] ss:$36 sps:$4 sm:$0xff]  }
 0x3b9   :  { %3235 = vmatmul.mubr.bf16.vlgmr.msra.gmra.mxu0 %v6311_v62  ;;  %3244 = vmatpush1.bf16.msra.mxu1 %v5749_v10  ;;  %v5830_v9 = vld [vmem:[#allocation3 + $0x760] ss:$36 sps:$4 sm:$0xff]  }
 0x3ba   :  { %3285 = vmatpush1.bf16.msra.mxu0 %v5752_v11  ;;  %3245 = vmatprep.subr.bf16.mxu1 %v5757_v12  ;;  %v5835_v10 = vld [vmem:[#allocation3 + $0x29c] ss:$36 sps:$4 sm:$0xff]  }
 0x3bb   :  { %3286 = vmatprep.subr.bf16.mxu0 %v5760_v13  ;;  %3275 = vmatprep.mubr.bf16.mxu1 %v6299_v44  ;;  %v5838_v11 = vld [vmem:[#allocation3 + $0x71c] ss:$36 sps:$4 sm:$0xff]  }
 0x3bc   :  { %3316 = vmatprep.mubr.bf16.mxu0 %v6301_v45  ;;  %v5833_v12 = vld [vmem:[#allocation3 + $0x298] ss:$36 sps:$4 sm:$0xff]  }
 0x3bd   :  { %3246 = vmatpush1.bf16.msra.mxu1 %v5755_v14  ;;  %v5836_v13 = vld [vmem:[#allocation3 + $0x718] ss:$36 sps:$4 sm:$0xff]  }
 0x3be   :  { %3287 = vmatpush1.bf16.msra.mxu0 %v5758_v4  ;;  %3247 = vmatprep.subr.bf16.mxu1 %v5763_v16  ;;  %v5841_v14 = vld [vmem:[#allocation3 + $0x254] ss:$36 sps:$4 sm:$0xff]  }
 0x3bf   :  { %3288 = vmatprep.subr.bf16.mxu0 %v5766_v5  ;;  %v5844_v4 = vld [vmem:[#allocation3 + $0x6d4] ss:$36 sps:$4 sm:$0xff]  }
 0x3c0   :  { %v5839_v16 = vld [vmem:[#allocation3 + $0x250] ss:$36 sps:$4 sm:$0xff]  }
 0x3c1   :  { %3248 = vmatpush1.bf16.msra.mxu1 %v5761_v17  ;;  %v5842_v5 = vld [vmem:[#allocation3 + $0x6d0] ss:$36 sps:$4 sm:$0xff]  }
 0x3c2   :  { %3289 = vmatpush1.bf16.msra.mxu0 %v5764_v18  ;;  %3249 = vmatprep.subr.bf16.mxu1 %v5769_v19  ;;  %v5847_v17 = vld [vmem:[#allocation3 + $0x214] ss:$36 sps:$4 sm:$0xff]  }
 0x3c3   :  { %3290 = vmatprep.subr.bf16.mxu0 %v5772_v20  ;;  %v5850_v18 = vld [vmem:[#allocation3 + $0x694] ss:$36 sps:$4 sm:$0xff]  }
 0x3c4   :  { %v5845_v19 = vld [vmem:[#allocation3 + $0x210] ss:$36 sps:$4 sm:$0xff]  }
 0x3c5   :  { %3250 = vmatpush1.bf16.msra.mxu1 %v5767_v21  ;;  %v5848_v20 = vld [vmem:[#allocation3 + $0x690] ss:$36 sps:$4 sm:$0xff]  }
 0x3c6   :  { %3291 = vmatpush1.bf16.msra.mxu0 %v5770_v22  ;;  %3251 = vmatprep.subr.bf16.mxu1 %v5775_v23  ;;  %v5853_v21 = vld [vmem:[#allocation3 + $0x1cc] ss:$36 sps:$4 sm:$0xff]  }
 0x3c7   :  { %3292 = vmatprep.subr.bf16.mxu0 %v5778_v24  ;;  %v5856_v22 = vld [vmem:[#allocation3 + $0x64c] ss:$36 sps:$4 sm:$0xff]  }
 0x3c8   :  { %v5851_v23 = vld [vmem:[#allocation3 + $0x1c8] ss:$36 sps:$4 sm:$0xff]  }
 0x3c9   :  { %3252 = vmatpush1.bf16.msra.mxu1 %v5773_v25  ;;  %v5854_v24 = vld [vmem:[#allocation3 + $0x648] ss:$36 sps:$4 sm:$0xff]  }
 0x3ca   :  { %3293 = vmatpush1.bf16.msra.mxu0 %v5776_v28  ;;  %3253 = vmatprep.subr.bf16.mxu1 %v5781_v29  ;;  %v5859_v25 = vld [vmem:[#allocation3 + $0x184] ss:$36 sps:$4 sm:$0xff]  }
 0x3cb   :  { %3294 = vmatprep.subr.bf16.mxu0 %v5784_v30  ;;  %v5862_v28 = vld [vmem:[#allocation3 + $0x604] ss:$36 sps:$4 sm:$0xff]  }
 0x3cc   :  { %v5857_v29 = vld [vmem:[#allocation3 + $0x180] ss:$36 sps:$4 sm:$0xff]  }
 0x3cd   :  { %3254 = vmatpush1.bf16.msra.mxu1 %v5779_v31  ;;  %v5860_v30 = vld [vmem:[#allocation3 + $0x600] ss:$36 sps:$4 sm:$0xff]  }
 0x3ce   :  { %3295 = vmatpush1.bf16.msra.mxu0 %v5782_v32  ;;  %3255 = vmatprep.subr.bf16.mxu1 %v5787_v33  ;;  %v5865_v31 = vld [vmem:[#allocation3 + $0x13c] ss:$36 sps:$4 sm:$0xff]  }
 0x3cf   :  { %3296 = vmatprep.subr.bf16.mxu0 %v5790_v34  ;;  %v5868_v32 = vld [vmem:[#allocation3 + $0x5bc] ss:$36 sps:$4 sm:$0xff]  }
 0x3d0   :  { %v5863_v33 = vld [vmem:[#allocation3 + $0x138] ss:$36 sps:$4 sm:$0xff]  }
 0x3d1   :  { %3256 = vmatpush1.bf16.msra.mxu1 %v5785_v35  ;;  %v5866_v34 = vld [vmem:[#allocation3 + $0x5b8] ss:$36 sps:$4 sm:$0xff]  }
 0x3d2   :  { %3297 = vmatpush1.bf16.msra.mxu0 %v5788_v36  ;;  %3257 = vmatprep.subr.bf16.mxu1 %v5793_v37  ;;  %v5871_v35 = vld [vmem:[#allocation3 + $0xf4] ss:$36 sps:$4 sm:$0xff]  }
 0x3d3   :  { %3298 = vmatprep.subr.bf16.mxu0 %v5796_v38  ;;  %v5874_v36 = vld [vmem:[#allocation3 + $0x574] ss:$36 sps:$4 sm:$0xff]  }
 0x3d4   :  { %v5869_v37 = vld [vmem:[#allocation3 + $0xf0] ss:$36 sps:$4 sm:$0xff]  }
 0x3d5   :  { %3258 = vmatpush1.bf16.msra.mxu1 %v5791_v39  ;;  %v5872_v38 = vld [vmem:[#allocation3 + $0x570] ss:$36 sps:$4 sm:$0xff]  }
 0x3d6   :  { %3299 = vmatpush1.bf16.msra.mxu0 %v5794_v40  ;;  %3259 = vmatprep.subr.bf16.mxu1 %v5799_v41  ;;  %v5877_v39 = vld [vmem:[#allocation3 + $0xac] ss:$36 sps:$4 sm:$0xff]  }
 0x3d7   :  { %3300 = vmatprep.subr.bf16.mxu0 %v5802_v43  ;;  %v5880_v40 = vld [vmem:[#allocation3 + $0x52c] ss:$36 sps:$4 sm:$0xff]  }
 0x3d8   :  { %v5875_v41 = vld [vmem:[#allocation3 + $0xa8] ss:$36 sps:$4 sm:$0xff]  }
 0x3d9   :  { %3260 = vmatpush2.bf16.msra.mxu1 %v5797_v46  ;;  %v5878_v43 = vld [vmem:[#allocation3 + $0x528] ss:$36 sps:$4 sm:$0xff]  }
 0x3da   :  { %3301 = vmatpush2.bf16.msra.mxu0 %v5800_v47  ;;  %3261 = vmatprep.subr.bf16.mxu1 %v5805_v48  ;;  %v5883_v46 = vld [vmem:[#allocation3 + $0x64] ss:$36 sps:$4 sm:$0xff]  }
 0x3db   :  { %3302 = vmatprep.subr.bf16.mxu0 %v5808_v49  ;;  %v5886_v47 = vld [vmem:[#allocation3 + $0x4e4] ss:$36 sps:$4 sm:$0xff]  }
 0x3dc   :  { %v5881_v48 = vld [vmem:[#allocation3 + $0x60] ss:$36 sps:$4 sm:$0xff]  }
 0x3dd   :  { %3262 = vmatpush2.bf16.msra.mxu1 %v5803_v52  ;;  %v5884_v49 = vld [vmem:[#allocation3 + $0x4e0] ss:$36 sps:$4 sm:$0xff]  }
 0x3de   :  { %3303 = vmatpush2.bf16.msra.mxu0 %v5806_v54  ;;  %3263 = vmatprep.subr.bf16.mxu1 %v5811_v55  ;;  %v5889_v52 = vld [vmem:[#allocation3 + $0x1c] ss:$36 sps:$4 sm:$0xff]  }
 0x3df   :  { %3304 = vmatprep.subr.bf16.mxu0 %v5814_v56  ;;  %v5892_v54 = vld [vmem:[#allocation3 + $0x49c] ss:$36 sps:$4 sm:$0xff]  }
 0x3e0   :  { %v5887_v55 = vld [vmem:[#allocation3 + $0x18] ss:$36 sps:$4 sm:$0xff]  }
 0x3e1   :  { %3264 = vmatpush2.bf16.msra.mxu1 %v5809_v57  ;;  %v5890_v56 = vld [vmem:[#allocation3 + $0x498] ss:$36 sps:$4 sm:$0xff]  }
 0x3e2   :  { %3305 = vmatpush2.bf16.msra.mxu0 %v5812_v58  ;;  %3265 = vmatprep.subr.bf16.mxu1 %v5817_v59  ;;  %v5895_v57 = vld [vmem:[#allocation3 + $0x454] ss:$36 sps:$4 sm:$0xff]  }
 0x3e3   :  { %3306 = vmatprep.subr.bf16.mxu0 %v5820_v60  ;;  %v5898_v58 = vld [vmem:[#allocation3 + $0x8d4] ss:$36 sps:$4 sm:$0xff]  }
 0x3e4   :  { %v5893_v59 = vld [vmem:[#allocation3 + $0x450] ss:$36 sps:$4 sm:$0xff]  }
 0x3e5   :  { %3266 = vmatpush2.bf16.msra.mxu1 %v5815_v63  ;;  %v5896_v60 = vld [vmem:[#allocation3 + $0x8d0] ss:$36 sps:$4 sm:$0xff]  }
 0x3e6   :  { %3307 = vmatpush2.bf16.msra.mxu0 %v5818_v0  ;;  %3267 = vmatprep.subr.bf16.mxu1 %v5823_v2  ;;  %v5901_v63 = vld [vmem:[#allocation3 + $0x40c] ss:$36 sps:$4 sm:$0xff]  }
 0x3e7   :  { %3308 = vmatprep.subr.bf16.mxu0 %v5826_v3  ;;  %v5904_v0 = vld [vmem:[#allocation3 + $0x88c] ss:$36 sps:$4 sm:$0xff]  }
 0x3e8   :  { %v5899_v2 = vld [vmem:[#allocation3 + $0x408] ss:$36 sps:$4 sm:$0xff]  }
 0x3e9   :  { %3268 = vmatpush2.bf16.msra.mxu1 %v5821_v6  ;;  %v5902_v3 = vld [vmem:[#allocation3 + $0x888] ss:$36 sps:$4 sm:$0xff]  }
 0x3ea   :  { %3309 = vmatpush2.bf16.msra.mxu0 %v5824_v7  ;;  %3269 = vmatprep.subr.bf16.mxu1 %v5829_v15  ;;  %v5907_v6 = vld [vmem:[#allocation3 + $0x3c4] ss:$36 sps:$4 sm:$0xff]  }
 0x3eb   :  { %3310 = vmatprep.subr.bf16.mxu0 %v5832_v42  ;;  %v5910_v7 = vld [vmem:[#allocation3 + $0x844] ss:$36 sps:$4 sm:$0xff]  }
 0x3ec   :  { %v5905_v15 = vld [vmem:[#allocation3 + $0x3c0] ss:$36 sps:$4 sm:$0xff]  }
 0x3ed   :  { %3270 = vmatpush2.bf16.msra.mxu1 %v5827_v8  ;;  %v5908_v42 = vld [vmem:[#allocation3 + $0x840] ss:$36 sps:$4 sm:$0xff]  }
 0x3ee   :  { %3311 = vmatpush2.bf16.msra.mxu0 %v5830_v9  ;;  %3271 = vmatprep.subr.bf16.mxu1 %v5835_v10  ;;  %v5913_v8 = vld [vmem:[#allocation3 + $0x37c] ss:$36 sps:$4 sm:$0xff]  }
 0x3ef   :  { %3312 = vmatprep.subr.bf16.mxu0 %v5838_v11  ;;  %v5916_v9 = vld [vmem:[#allocation3 + $0x7fc] ss:$36 sps:$4 sm:$0xff]  }
 0x3f0   :  { %v5911_v10 = vld [vmem:[#allocation3 + $0x378] ss:$36 sps:$4 sm:$0xff]  }
 0x3f1   :  { %3272 = vmatpush2.bf16.msra.mxu1 %v5833_v12  ;;  %v5914_v11 = vld [vmem:[#allocation3 + $0x7f8] ss:$36 sps:$4 sm:$0xff]  }
 0x3f2   :  { %3313 = vmatpush2.bf16.msra.mxu0 %v5836_v13  ;;  %3273 = vmatprep.subr.bf16.mxu1 %v5841_v14  ;;  %v5919_v12 = vld [vmem:[#allocation3 + $0x334] ss:$36 sps:$4 sm:$0xff]  }
 0x3f3   :  { %3314 = vmatprep.subr.bf16.mxu0 %v5844_v4  ;;  %v5922_v13 = vld [vmem:[#allocation3 + $0x7b4] ss:$36 sps:$4 sm:$0xff]  }
 0x3f4   :  { %v5917_v14 = vld [vmem:[#allocation3 + $0x330] ss:$36 sps:$4 sm:$0xff]  }
 0x3f5   :  { %3274 = vmatpush2.bf16.msra.mxu1 %v5839_v16  ;;  %v5920_v4 = vld [vmem:[#allocation3 + $0x7b0] ss:$36 sps:$4 sm:$0xff]  }
 0x3f6   :  { %3315 = vmatpush2.bf16.msra.mxu0 %v5842_v5  ;;  %3325 = vmatprep.subr.bf16.mxu1 %v5847_v17  ;;  %v5925_v16 = vld [vmem:[#allocation3 + $0x2ec] ss:$36 sps:$4 sm:$0xff]  }
 0x3f7   :  { %3366 = vmatprep.subr.bf16.mxu0 %v5850_v18  ;;  %v5928_v5 = vld [vmem:[#allocation3 + $0x76c] ss:$36 sps:$4 sm:$0xff]  }
 0x3f8   :  { %3276 = vmatmul.mubr.bf16.vlgmr.msra.gmra.mxu1 %v6307_v61  ;;  %v5923_v17 = vld [vmem:[#allocation3 + $0x2e8] ss:$36 sps:$4 sm:$0xff]  }
 0x3f9   :  { %3317 = vmatmul.mubr.bf16.vlgmr.msra.gmra.mxu0 %v6311_v62  ;;  %3326 = vmatpush1.bf16.msra.mxu1 %v5845_v19  ;;  %v5926_v18 = vld [vmem:[#allocation3 + $0x768] ss:$36 sps:$4 sm:$0xff]  }
 0x3fa   :  { %3367 = vmatpush1.bf16.msra.mxu0 %v5848_v20  ;;  %3327 = vmatprep.subr.bf16.mxu1 %v5853_v21  ;;  %v5931_v19 = vld [vmem:[#allocation3 + $0x2a4] ss:$36 sps:$4 sm:$0xff]  }
 0x3fb   :  { %3368 = vmatprep.subr.bf16.mxu0 %v5856_v22  ;;  %3357 = vmatprep.mubr.bf16.mxu1 %v6299_v44  ;;  %v5934_v20 = vld [vmem:[#allocation3 + $0x724] ss:$36 sps:$4 sm:$0xff]  }
 0x3fc   :  { %3398 = vmatprep.mubr.bf16.mxu0 %v6301_v45  ;;  %v5929_v21 = vld [vmem:[#allocation3 + $0x2a0] ss:$36 sps:$4 sm:$0xff]  }
 0x3fd   :  { %3328 = vmatpush1.bf16.msra.mxu1 %v5851_v23  ;;  %v5932_v22 = vld [vmem:[#allocation3 + $0x720] ss:$36 sps:$4 sm:$0xff]  }
 0x3fe   :  { %3369 = vmatpush1.bf16.msra.mxu0 %v5854_v24  ;;  %3329 = vmatprep.subr.bf16.mxu1 %v5859_v25  ;;  %v5937_v23 = vld [vmem:[#allocation3 + $0x25c] ss:$36 sps:$4 sm:$0xff]  }
 0x3ff   :  { %3370 = vmatprep.subr.bf16.mxu0 %v5862_v28  ;;  %v5940_v24 = vld [vmem:[#allocation3 + $0x6dc] ss:$36 sps:$4 sm:$0xff]  }
 0x400   :  { %v5935_v25 = vld [vmem:[#allocation3 + $0x258] ss:$36 sps:$4 sm:$0xff]  }
 0x401   :  { %3330 = vmatpush1.bf16.msra.mxu1 %v5857_v29  ;;  %v5938_v28 = vld [vmem:[#allocation3 + $0x6d8] ss:$36 sps:$4 sm:$0xff]  }
 0x402   :  { %3371 = vmatpush1.bf16.msra.mxu0 %v5860_v30  ;;  %3331 = vmatprep.subr.bf16.mxu1 %v5865_v31  ;;  %v5941_v29 = vld [vmem:[#allocation3 + $0x458] ss:$36 sps:$4 sm:$0xff]  }
 0x403   :  { %3372 = vmatprep.subr.bf16.mxu0 %v5868_v32  ;;  %v5942_v30 = vld [vmem:[#allocation3 + $0x8d8] ss:$36 sps:$4 sm:$0xff]  }
 0x404   :  { %v5943_v31 = vld [vmem:[#allocation3 + $0x218] ss:$36 sps:$4 sm:$0xff]  }
 0x405   :  { %3332 = vmatpush1.bf16.msra.mxu1 %v5863_v33  ;;  %v5944_v32 = vld [vmem:[#allocation3 + $0x698] ss:$36 sps:$4 sm:$0xff]   ;;  %v5945_v33 = vld [vmem:[#allocation3 + $0x410] ss:$36 sps:$4 sm:$0xff]  }
 0x406   :  { %3373 = vmatpush1.bf16.msra.mxu0 %v5866_v34  ;;  %3333 = vmatprep.subr.bf16.mxu1 %v5871_v35  ;;  %v5946_v34 = vld [vmem:[#allocation3 + $0x890] ss:$36 sps:$4 sm:$0xff]  }
 0x407   :  { %3374 = vmatprep.subr.bf16.mxu0 %v5874_v36 }
 0x409   :  { %3334 = vmatpush1.bf16.msra.mxu1 %v5869_v37 }
 0x40a   :  { %3375 = vmatpush1.bf16.msra.mxu0 %v5872_v38  ;;  %3335 = vmatprep.subr.bf16.mxu1 %v5877_v39  ;;  %v5947_v38 = vld [vmem:[#allocation3 + $0x1d0] ss:$36 sps:$4 sm:$0xff]  }
 0x40b   :  { %3376 = vmatprep.subr.bf16.mxu0 %v5880_v40  ;;  %v5948_v39 = vld [vmem:[#allocation3 + $0x650] ss:$36 sps:$4 sm:$0xff]  }
 0x40d   :  { %3336 = vmatpush1.bf16.msra.mxu1 %v5875_v41 }
 0x40e   :  { %3377 = vmatpush1.bf16.msra.mxu0 %v5878_v43  ;;  %3337 = vmatprep.subr.bf16.mxu1 %v5883_v46  ;;  %v5949_v43 = vld [vmem:[#allocation3 + $0x3c8] ss:$36 sps:$4 sm:$0xff]  }
 0x40f   :  { %3378 = vmatprep.subr.bf16.mxu0 %v5886_v47  ;;  %v5950_v46 = vld [vmem:[#allocation3 + $0x848] ss:$36 sps:$4 sm:$0xff]  }
 0x411   :  { %3338 = vmatpush1.bf16.msra.mxu1 %v5881_v48 }
 0x412   :  { %3379 = vmatpush1.bf16.msra.mxu0 %v5884_v49  ;;  %3339 = vmatprep.subr.bf16.mxu1 %v5889_v52 }
 0x413   :  { %3380 = vmatprep.subr.bf16.mxu0 %v5892_v54 }
 0x415   :  { %3340 = vmatpush1.bf16.msra.mxu1 %v5887_v55 }
 0x416   :  { %3381 = vmatpush1.bf16.msra.mxu0 %v5890_v56  ;;  %3341 = vmatprep.subr.bf16.mxu1 %v5895_v57  ;;  %v5951_v56 = vld [vmem:[#allocation3 + $0x188] ss:$36 sps:$4 sm:$0xff]  }
 0x417   :  { %3382 = vmatprep.subr.bf16.mxu0 %v5898_v58  ;;  %v5952_v57 = vld [vmem:[#allocation3 + $0x608] ss:$36 sps:$4 sm:$0xff]  }
 0x419   :  { %3342 = vmatpush2.bf16.msra.mxu1 %v5893_v59 }
 0x41a   :  { %3383 = vmatpush2.bf16.msra.mxu0 %v5896_v60  ;;  %3343 = vmatprep.subr.bf16.mxu1 %v5901_v63  ;;  %v5953_v60 = vld [vmem:[#allocation3 + $0x380] ss:$36 sps:$4 sm:$0xff]  }
 0x41b   :  { %3384 = vmatprep.subr.bf16.mxu0 %v5904_v0  ;;  %v5954_v63 = vld [vmem:[#allocation3 + $0x800] ss:$36 sps:$4 sm:$0xff]  }
 0x41d   :  { %3344 = vmatpush2.bf16.msra.mxu1 %v5899_v2 }
 0x41e   :  { %3385 = vmatpush2.bf16.msra.mxu0 %v5902_v3  ;;  %3345 = vmatprep.subr.bf16.mxu1 %v5907_v6  ;;  %v5956_v6 = vld [vmem:[#allocation3 + $0x5c0] ss:$36 sps:$4 sm:$0xff]  }
 0x41f   :  { %3386 = vmatprep.subr.bf16.mxu0 %v5910_v7  ;;  %v5957_v7 = vld [vmem:[#allocation3 + $0x338] ss:$36 sps:$4 sm:$0xff]  }
 0x421   :  { %3346 = vmatpush2.bf16.msra.mxu1 %v5905_v15  ;;  %v5958_v15 = vld [vmem:[#allocation3 + $0x7b8] ss:$36 sps:$4 sm:$0xff]  }
 0x422   :  { %3387 = vmatpush2.bf16.msra.mxu0 %v5908_v42  ;;  %3347 = vmatprep.subr.bf16.mxu1 %v5913_v8 }
 0x423   :  { %3388 = vmatprep.subr.bf16.mxu0 %v5916_v9 }
 0x425   :  { %3348 = vmatpush2.bf16.msra.mxu1 %v5911_v10 }
 0x426   :  { %3389 = vmatpush2.bf16.msra.mxu0 %v5914_v11  ;;  %3349 = vmatprep.subr.bf16.mxu1 %v5919_v12  ;;  %v5959_v11 = vld [vmem:[#allocation3 + $0xf8] ss:$36 sps:$4 sm:$0xff]  }
 0x427   :  { %3390 = vmatprep.subr.bf16.mxu0 %v5922_v13  ;;  %v5960_v12 = vld [vmem:[#allocation3 + $0x578] ss:$36 sps:$4 sm:$0xff]   ;;  %v5961_v13 = vld [vmem:[#allocation3 + $0x2f0] ss:$36 sps:$4 sm:$0xff]  }
 0x429   :  { %3350 = vmatpush2.bf16.msra.mxu1 %v5917_v14  ;;  %v5962_v14 = vld [vmem:[#allocation3 + $0x770] ss:$36 sps:$4 sm:$0xff]  }
 0x42a   :  { %3391 = vmatpush2.bf16.msra.mxu0 %v5920_v4  ;;  %3351 = vmatprep.subr.bf16.mxu1 %v5925_v16 }
 0x42b   :  { %3392 = vmatprep.subr.bf16.mxu0 %v5928_v5 }
 0x42d   :  { %3352 = vmatpush2.bf16.msra.mxu1 %v5923_v17 }
 0x42e   :  { %3393 = vmatpush2.bf16.msra.mxu0 %v5926_v18  ;;  %3353 = vmatprep.subr.bf16.mxu1 %v5931_v19  ;;  %v5963_v18 = vld [vmem:[#allocation3 + $0xb0] ss:$36 sps:$4 sm:$0xff]  }
 0x42f   :  { %3394 = vmatprep.subr.bf16.mxu0 %v5934_v20  ;;  %v5964_v19 = vld [vmem:[#allocation3 + $0x530] ss:$36 sps:$4 sm:$0xff]   ;;  %v5965_v20 = vld [vmem:[#allocation3 + $0x2a8] ss:$36 sps:$4 sm:$0xff]  }
 0x431   :  { %3354 = vmatpush2.bf16.msra.mxu1 %v5929_v21  ;;  %v5966_v21 = vld [vmem:[#allocation3 + $0x728] ss:$36 sps:$4 sm:$0xff]  }
 0x432   :  { %3395 = vmatpush2.bf16.msra.mxu0 %v5932_v22  ;;  %3355 = vmatprep.subr.bf16.mxu1 %v5937_v23 }
 0x433   :  { %3396 = vmatprep.subr.bf16.mxu0 %v5940_v24 }
 0x435   :  { %3356 = vmatpush2.bf16.msra.mxu1 %v5935_v25 }
 0x436   :  { %3397 = vmatpush2.bf16.msra.mxu0 %v5938_v28  ;;  %5227 = vmatprep.subr.bf16.mxu1 %v5941_v29  ;;  %v5967_v28 = vld [vmem:[#allocation3 + $0x68] ss:$36 sps:$4 sm:$0xff]  }
 0x437   :  { %5249 = vmatprep.subr.bf16.mxu0 %v5942_v30  ;;  %v5968_v29 = vld [vmem:[#allocation3 + $0x4e8] ss:$36 sps:$4 sm:$0xff]   ;;  %v5969_v30 = vld [vmem:[#allocation3 + $0x260] ss:$36 sps:$4 sm:$0xff]  }
 0x438   :  { %v3113_v35 = vpop.f32.mrf.mxu1  ;;  %3358 = vmatmul.mubr.bf16.vlgmr.msra.gmra.mxu1 %v6307_v61 }
 0x439   :  { %v3154_v36 = vpop.f32.mrf.mxu0  ;;  %3399 = vmatmul.mubr.bf16.vlgmr.msra.gmra.mxu0 %v6311_v62  ;;  %5228 = vmatpush3.bf16.msra.mxu1 %v5943_v31  ;;  %v5970_v31 = vld [vmem:[#allocation3 + $0x6e0] ss:$36 sps:$4 sm:$0xff]  }
 0x43a   :  { %v3155_v37 = vadd.f32 %v3154_v36, %v3113_v35  ;;  %5250 = vmatpush3.bf16.msra.mxu0 %v5944_v32  ;;  %v3115_v40 = vpop.f32.mrf.mxu1  ;;  %5229 = vmatprep.subr.bf16.mxu1 %v5945_v33  ;;  %v5971_v36 = vld [vmem:[#allocation3 + $0x20] ss:$36 sps:$4 sm:$0xff]  }
 0x43b   :  { %v3156_v41 = vpop.f32.mrf.mxu0  ;;  %5251 = vmatprep.subr.bf16.mxu0 %v5946_v34  ;;  %3439 = vmatprep.mubr.bf16.mxu1 %v6299_v44 }
 0x43c   :  { %v3499_v47 = vrot.slane %v3155_v37, 4  ;;  %v3157_v48 = vadd.f32 %v3156_v41, %v3115_v40  ;;  %3479 = vmatprep.mubr.bf16.mxu0 %v6301_v45  ;;  %v3117_v49 = vpop.f32.mrf.mxu1  ;;  %v5955_v45 = vld [vmem:[#allocation3 + $0x140] ss:$36 sps:$4 sm:$0xff]  }
 0x43d   :  { %v3158_v52 = vpop.f32.mrf.mxu0  ;;  %5230 = vmatpush3.bf16.msra.mxu1 %v5947_v38 }
 0x43e   :  { %v3500_v54 = vadd.f32 %v3499_v47, %v3155_v37  ;;  %v3505_v55 = vrot.slane %v3157_v48, 4  ;;  %5252 = vmatpush3.bf16.msra.mxu0 %v5948_v39  ;;  %v3118_v58 = vpop.f32.mrf.mxu1  ;;  %5231 = vmatprep.subr.bf16.mxu1 %v5949_v43 }
 0x43f   :  { %v3159_v59 = vpop.f32.mrf.mxu0  ;;  %5253 = vmatprep.subr.bf16.mxu0 %v5950_v46  ;;  %v3495_v58 = vld [vmem:[#allocation6 + $0x6] ss:$8 sm:$0xf0] }
 0x440   :  { %v3501_v0 = vrot.slane %v3500_v54, 2  ;;  %v3506_v2 = vadd.f32 %v3505_v55, %v3157_v48  ;;  %v3488_v55 = vld [vmem:[#allocation6 + $0x5] ss:$8 sm:$0xf] }
 0x441   :  { %5232 = vmatpush3.bf16.msra.mxu1 %v5951_v56  ;;  %v3489_v56 = vld [vmem:[#allocation6 + $0x5] ss:$8 sm:$0xf0] }
 0x442   :  { %v3502_v3 = vadd.f32 %v3501_v0, %v3500_v54  ;;  %v3507_v44 = vrot.slane %v3506_v2, 2  ;;  %5254 = vmatpush3.bf16.msra.mxu0 %v5952_v57  ;;  %5233 = vmatprep.subr.bf16.mxu1 %v5953_v60  ;;  %v3494_v57 = vld [vmem:[#allocation6 + $0x6] ss:$8 sm:$0xf]  ;;  %v6331_v59 = vor.u32 %v3489_v56, %v3488_v55 }
 0x443   :  { %5255 = vmatprep.subr.bf16.mxu0 %v5954_v63  ;;  %v6333_v60 = vor.u32 %v3495_v58, %v3494_v57 }
 0x444   :  { %v3503_v42 = vrot.slane %v3502_v3, 1  ;;  %v3508_v8 = vadd.f32 %v3507_v44, %v3506_v2  ;;  %v3679_v2 = vrot.slane %v6331_v59, %v6269_v53 }
 0x445   :  { %5234 = vmatpush3.bf16.msra.mxu1 %v5955_v45  ;;  %v3731_v0 = vrot.slane %v6333_v60, %v6266_v51 }
 0x446   :  { %v3504_v9 = vadd.f32 %v3503_v42, %v3502_v3  ;;  %v3509_v10 = vrot.slane %v3508_v8, 1  ;;  %5256 = vmatpush3.bf16.msra.mxu0 %v5956_v6  ;;  %5235 = vmatprep.subr.bf16.mxu1 %v5957_v7  ;;  %v3735_v6 = vrot.slane %v6333_v60, %v6269_v53 }
 0x447   :  { %5257 = vmatprep.subr.bf16.mxu0 %v5958_v15 }
 0x448   :  { %v3553_v4 = vmul.f32 0.125, %v3504_v9  ;;  %v3510_v16 = vadd.f32 %v3509_v10, %v3508_v8 }
 0x449   :  { %5236 = vmatpush3.bf16.msra.mxu1 %v5959_v11 }
 0x44a   :  { %v3562_v5 = vsub.f32 %v3155_v37, %v3553_v4  ;;  %v3554_v17 = vmul.f32 0.125, %v3510_v16  ;;  %5258 = vmatpush3.bf16.msra.mxu0 %v5960_v12  ;;  %5237 = vmatprep.subr.bf16.mxu1 %v5961_v13  ;;  %v5972_v37 = vld [vmem:[#allocation3 + $0x4a0] ss:$36 sps:$4 sm:$0xff]  }
 0x44b   :  { %5259 = vmatprep.subr.bf16.mxu0 %v5962_v14 }
 0x44c   :  { %v3571_v22 = vmul.f32 %v3562_v5, %v3562_v5  ;;  %v3563_v23 = vsub.f32 %v3157_v48, %v3554_v17 }
 0x44d   :  { %5238 = vmatpush3.bf16.msra.mxu1 %v5963_v18 }
 0x44e   :  { %v3580_v24 = vrot.slane %v3571_v22, 4  ;;  %v3572_v25 = vmul.f32 %v3563_v23, %v3563_v23  ;;  %5260 = vmatpush3.bf16.msra.mxu0 %v5964_v19  ;;  %5239 = vmatprep.subr.bf16.mxu1 %v5965_v20 }
 0x44f   :  { %5261 = vmatprep.subr.bf16.mxu0 %v5966_v21 }
 0x450   :  { %v3581_v32 = vadd.f32 %v3580_v24, %v3571_v22  ;;  %v3586_v33 = vrot.slane %v3572_v25, 4 }
 0x451   :  { %5240 = vmatpush3.bf16.msra.mxu1 %v5967_v28 }
 0x452   :  { %v3582_v34 = vrot.slane %v3581_v32, 2  ;;  %v3587_v35 = vadd.f32 %v3586_v33, %v3572_v25  ;;  %5262 = vmatpush3.bf16.msra.mxu0 %v5968_v29  ;;  %5241 = vmatprep.subr.bf16.mxu1 %v5969_v30 }
 0x453   :  { %5263 = vmatprep.subr.bf16.mxu0 %v5970_v31 }
 0x454   :  { %v3583_v38 = vadd.f32 %v3582_v34, %v3581_v32  ;;  %v3588_v39 = vrot.slane %v3587_v35, 2 }
 0x455   :  { %5242 = vmatpush3.bf16.msra.mxu1 %v5971_v36 }
 0x456   :  { %v3584_v40 = vrot.slane %v3583_v38, 1  ;;  %v3589_v41 = vadd.f32 %v3588_v39, %v3587_v35  ;;  %5264 = vmatpush3.bf16.msra.mxu0 %v5972_v37 }
 0x458   :  { %v3585_v43 = vadd.f32 %v3584_v40, %v3583_v38  ;;  %v3590_v46 = vrot.slane %v3589_v41, 1  ;;  %3440 = vmatmul.mubr.bf16.vlgmr.msra.gmra.mxu1 %v6307_v61  ;;  %v3675_v61 = vrot.slane %v6331_v59, %v6266_v51 }
 0x459   :  { %3480 = vmatmul.mubr.bf16.vlgmr.msra.gmra.mxu0 %v6311_v62 }
 0x45a   :  { %v3634_v47 = vmul.f32 0.125, %v3585_v43  ;;  %v3591_v48 = vadd.f32 %v3590_v46, %v3589_v41 }
 0x45c   :  { %v3643_v49 = vadd.f32 0.8, %v3634_v47  ;;  %v3635_v52 = vmul.f32 0.125, %v3591_v48 }
 0x45e   :  { %5973 = vrsqrt.f32 %v3643_v49  ;;  %v3644_v54 = vadd.f32 0.8, %v3635_v52 }
 0x460   :  { %5975 = vrsqrt.f32 %v3644_v54 }
 0x46b   :  { %v5974_v63 = vpop.eup %5973 }
 0x46c   :  { %v3661_v62 = vmul.f32 %v5974_v63, %v3562_v5 }
 0x46d   :  { %v5976_v3 = vpop.eup %5975 }
 0x46e   :  { %v3717_v44 = vmul.f32 %v3675_v61, %v3661_v62  ;;  %v3662_v45 = vmul.f32 %v5976_v3, %v3563_v23 }
 0x470   :  { %v3773_v7 = vadd.f32 %v3731_v0, %v3717_v44  ;;  %v3718_v15 = vmul.f32 %v3679_v2, %v3662_v45  ;;  %v3683_v0 = vrot.slane %v6331_v59, %v6288_v26  ;;  %v3739_v44 = vrot.slane %v6333_v60, %v6288_v26 }
 0x471   :  { %v3687_v45 = vrot.slane %v6331_v59, %v6291_v27 }
 0x472   :  { %vm3782_vm8 = vcmp.gt.f32.partialorder %v3773_v7, 0.0  ;;  %v3791_v42 = vmul.f32 0.2, %v3773_v7  ;;  %v3774_v8 = vadd.f32 %v3735_v6, %v3718_v15 }
 0x474   :  { %v6343_v9 = vsel %vm3782_vm8, %v3773_v7, %v3791_v42  ;;  %vm3783_vm9 = vcmp.gt.f32.partialorder %v3774_v8, 0.0  ;;  %v3792_v10 = vmul.f32 0.2, %v3774_v8  ;;  %v3743_v42 = vrot.slane %v6333_v60, %v6291_v27 }
 0x476   :  { %v6345_v11 = vsel %vm3783_vm9, %v3774_v8, %v3792_v10 }
 0x478   :  { %v3195_v12 = vpop.f32.mrf.mxu1 }
 0x479   :  { %v3236_v13 = vpop.f32.mrf.mxu0 }
 0x47a   :  { %v3237_v14 = vadd.f32 %v3236_v13, %v3195_v12  ;;  %v3197_v4 = vpop.f32.mrf.mxu1 }
 0x47b   :  { %v3238_v16 = vpop.f32.mrf.mxu0 }
 0x47c   :  { %v3511_v5 = vrot.slane %v3237_v14, 4  ;;  %v3239_v17 = vadd.f32 %v3238_v16, %v3197_v4  ;;  %v3199_v18 = vpop.f32.mrf.mxu1 }
 0x47d   :  { %v3240_v53 = vpop.f32.mrf.mxu0 }
 0x47e   :  { %v3512_v19 = vadd.f32 %v3511_v5, %v3237_v14  ;;  %v3517_v20 = vrot.slane %v3239_v17, 4  ;;  %v3200_v21 = vpop.f32.mrf.mxu1 }
 0x47f   :  { %v3241_v22 = vpop.f32.mrf.mxu0 }
 0x480   :  { %v3513_v23 = vrot.slane %v3512_v19, 2  ;;  %v3518_v24 = vadd.f32 %v3517_v20, %v3239_v17 }
 0x482   :  { %v3514_v25 = vadd.f32 %v3513_v23, %v3512_v19  ;;  %v3519_v28 = vrot.slane %v3518_v24, 2 }
 0x484   :  { %v3515_v29 = vrot.slane %v3514_v25, 1  ;;  %v3520_v30 = vadd.f32 %v3519_v28, %v3518_v24 }
 0x486   :  { %v3516_v31 = vadd.f32 %v3515_v29, %v3514_v25  ;;  %v3521_v32 = vrot.slane %v3520_v30, 1 }
 0x488   :  { %v3555_v33 = vmul.f32 0.125, %v3516_v31  ;;  %v3522_v34 = vadd.f32 %v3521_v32, %v3520_v30 }
 0x48a   :  { %v3564_v35 = vsub.f32 %v3237_v14, %v3555_v33  ;;  %v3556_v36 = vmul.f32 0.125, %v3522_v34 }
 0x48c   :  { %v3573_v37 = vmul.f32 %v3564_v35, %v3564_v35  ;;  %v3565_v38 = vsub.f32 %v3239_v17, %v3556_v36 }
 0x48e   :  { %v3592_v39 = vrot.slane %v3573_v37, 4  ;;  %v3574_v40 = vmul.f32 %v3565_v38, %v3565_v38 }
 0x490   :  { %v3593_v41 = vadd.f32 %v3592_v39, %v3573_v37  ;;  %v3598_v43 = vrot.slane %v3574_v40, 4 }
 0x492   :  { %v3594_v46 = vrot.slane %v3593_v41, 2  ;;  %v3599_v47 = vadd.f32 %v3598_v43, %v3574_v40 }
 0x494   :  { %v3595_v48 = vadd.f32 %v3594_v46, %v3593_v41  ;;  %v3600_v49 = vrot.slane %v3599_v47, 2 }
 0x496   :  { %v3596_v52 = vrot.slane %v3595_v48, 1  ;;  %v3601_v54 = vadd.f32 %v3600_v49, %v3599_v47 }
 0x498   :  { %v3597_v55 = vadd.f32 %v3596_v52, %v3595_v48  ;;  %v3602_v56 = vrot.slane %v3601_v54, 1 }
 0x49a   :  { %v3636_v57 = vmul.f32 0.125, %v3597_v55  ;;  %v3603_v58 = vadd.f32 %v3602_v56, %v3601_v54 }
 0x49c   :  { %v3645_v61 = vadd.f32 0.8, %v3636_v57  ;;  %v3637_v63 = vmul.f32 0.125, %v3603_v58 }
 0x49e   :  { %5977 = vrsqrt.f32 %v3645_v61  ;;  %v3646_v62 = vadd.f32 0.8, %v3637_v63 }
 0x4a0   :  { %5979 = vrsqrt.f32 %v3646_v62 }
 0x4ab   :  { %v5978_v2 = vpop.eup %5977 }
 0x4ac   :  { %v3663_v3 = vmul.f32 %v5978_v2, %v3564_v35 }
 0x4ad   :  { %v5980_v6 = vpop.eup %5979 }
 0x4ae   :  { %v3719_v7 = vmul.f32 %v3683_v0, %v3663_v3  ;;  %v3664_v15 = vmul.f32 %v5980_v6, %v3565_v38 }
 0x4b0   :  { %v3775_v8 = vadd.f32 %v3739_v44, %v3719_v7  ;;  %v3720_v10 = vmul.f32 %v3687_v45, %v3664_v15  ;;  %v3690_v44 = vsub.s32 4, %v6263_v50  ;;  %v3694_v45 = vsub.s32 5, %v6263_v50 }
 0x4b2   :  { %vm3784_vm10 = vcmp.gt.f32.partialorder %v3775_v8, 0.0  ;;  %v3793_v12 = vmul.f32 0.2, %v3775_v8  ;;  %v3776_v13 = vadd.f32 %v3743_v42, %v3720_v10  ;;  %v3691_v6 = vrot.slane %v6331_v59, %v3690_v44 }
 0x4b3   :  { %v3747_v42 = vrot.slane %v6333_v60, %v3690_v44 }
 0x4b4   :  { %v6355_v14 = vsel %vm3784_vm10, %v3775_v8, %v3793_v12  ;;  %vm3785_vm11 = vcmp.gt.f32.partialorder %v3776_v13, 0.0  ;;  %v3794_v4 = vmul.f32 0.2, %v3776_v13  ;;  %v3695_v8 = vrot.slane %v6331_v59, %v3694_v45 }
 0x4b6   :  { %v6357_v16 = vsel %vm3785_vm11, %v3776_v13, %v3794_v4  ;;  %v3751_v4 = vrot.slane %v6333_v60, %v3694_v45 }
 0x4b8   :  { %v3277_v26 = vpop.f32.mrf.mxu1 }
 0x4b9   :  { %v3318_v5 = vpop.f32.mrf.mxu0 }
 0x4ba   :  { %v3319_v17 = vadd.f32 %v3318_v5, %v3277_v26  ;;  %v3279_v18 = vpop.f32.mrf.mxu1 }
 0x4bb   :  { %v3320_v53 = vpop.f32.mrf.mxu0 }
 0x4bc   :  { %v3523_v19 = vrot.slane %v3319_v17, 4  ;;  %v3321_v20 = vadd.f32 %v3320_v53, %v3279_v18  ;;  %v3281_v21 = vpop.f32.mrf.mxu1 }
 0x4bd   :  { %v3322_v27 = vpop.f32.mrf.mxu0 }
 0x4be   :  { %v3524_v22 = vadd.f32 %v3523_v19, %v3319_v17  ;;  %v3529_v23 = vrot.slane %v3321_v20, 4  ;;  %v3282_v24 = vpop.f32.mrf.mxu1 }
 0x4bf   :  { %v3323_v25 = vpop.f32.mrf.mxu0 }
 0x4c0   :  { %v3525_v28 = vrot.slane %v3524_v22, 2  ;;  %v3530_v29 = vadd.f32 %v3529_v23, %v3321_v20 }
 0x4c2   :  { %v3526_v30 = vadd.f32 %v3525_v28, %v3524_v22  ;;  %v3531_v31 = vrot.slane %v3530_v29, 2 }
 0x4c4   :  { %v3527_v32 = vrot.slane %v3526_v30, 1  ;;  %v3532_v33 = vadd.f32 %v3531_v31, %v3530_v29 }
 0x4c6   :  { %v3528_v34 = vadd.f32 %v3527_v32, %v3526_v30  ;;  %v3533_v35 = vrot.slane %v3532_v33, 1 }
 0x4c8   :  { %v3557_v36 = vmul.f32 0.125, %v3528_v34  ;;  %v3534_v37 = vadd.f32 %v3533_v35, %v3532_v33 }
 0x4ca   :  { %v3566_v38 = vsub.f32 %v3319_v17, %v3557_v36  ;;  %v3558_v39 = vmul.f32 0.125, %v3534_v37 }
 0x4cc   :  { %v3575_v40 = vmul.f32 %v3566_v38, %v3566_v38  ;;  %v3567_v41 = vsub.f32 %v3321_v20, %v3558_v39 }
 0x4ce   :  { %v3604_v43 = vrot.slane %v3575_v40, 4  ;;  %v3576_v46 = vmul.f32 %v3567_v41, %v3567_v41 }
 0x4d0   :  { %v3605_v47 = vadd.f32 %v3604_v43, %v3575_v40  ;;  %v3610_v48 = vrot.slane %v3576_v46, 4 }
 0x4d2   :  { %v3606_v49 = vrot.slane %v3605_v47, 2  ;;  %v3611_v52 = vadd.f32 %v3610_v48, %v3576_v46 }
 0x4d4   :  { %v3607_v54 = vadd.f32 %v3606_v49, %v3605_v47  ;;  %v3612_v55 = vrot.slane %v3611_v52, 2 }
 0x4d6   :  { %v3608_v56 = vrot.slane %v3607_v54, 1  ;;  %v3613_v57 = vadd.f32 %v3612_v55, %v3611_v52 }
 0x4d8   :  { %v3609_v58 = vadd.f32 %v3608_v56, %v3607_v54  ;;  %v3614_v61 = vrot.slane %v3613_v57, 1 }
 0x4da   :  { %v3638_v63 = vmul.f32 0.125, %v3609_v58  ;;  %v3615_v62 = vadd.f32 %v3614_v61, %v3613_v57 }
 0x4dc   :  { %v3647_v0 = vadd.f32 0.8, %v3638_v63  ;;  %v3639_v2 = vmul.f32 0.125, %v3615_v62 }
 0x4de   :  { %5981 = vrsqrt.f32 %v3647_v0  ;;  %v3648_v3 = vadd.f32 0.8, %v3639_v2 }
 0x4e0   :  { %5983 = vrsqrt.f32 %v3648_v3 }
 0x4eb   :  { %v5982_v7 = vpop.eup %5981 }
 0x4ec   :  { %v3665_v15 = vmul.f32 %v5982_v7, %v3566_v38 }
 0x4ed   :  { %v5984_v10 = vpop.eup %5983 }
 0x4ee   :  { %v3721_v12 = vmul.f32 %v3691_v6, %v3665_v15  ;;  %v3666_v13 = vmul.f32 %v5984_v10, %v3567_v41 }
 0x4f0   :  { %v3777_v26 = vadd.f32 %v3747_v42, %v3721_v12  ;;  %v3722_v5 = vmul.f32 %v3695_v8, %v3666_v13 }
 0x4f2   :  { %vm3786_vm12 = vcmp.gt.f32.partialorder %v3777_v26, 0.0  ;;  %v3795_v17 = vmul.f32 0.2, %v3777_v26  ;;  %v3778_v18 = vadd.f32 %v3751_v4, %v3722_v5 }
 0x4f4   :  { %v6365_v53 = vsel %vm3786_vm12, %v3777_v26, %v3795_v17  ;;  %vm3787_vm13 = vcmp.gt.f32.partialorder %v3778_v18, 0.0  ;;  %v3796_v19 = vmul.f32 0.2, %v3778_v18 }
 0x4f6   :  { %v6367_v20 = vsel %vm3787_vm13, %v3778_v18, %v3796_v19 }
 0x4f8   :  { %v3359_v21 = vpop.f32.mrf.mxu1 }
 0x4f9   :  { %v3400_v27 = vpop.f32.mrf.mxu0 }
 0x4fa   :  { %v3401_v22 = vadd.f32 %v3400_v27, %v3359_v21  ;;  %v3361_v23 = vpop.f32.mrf.mxu1 }
 0x4fb   :  { %v3402_v24 = vpop.f32.mrf.mxu0 }
 0x4fc   :  { %v3535_v25 = vrot.slane %v3401_v22, 4  ;;  %v3403_v28 = vadd.f32 %v3402_v24, %v3361_v23  ;;  %v3363_v29 = vpop.f32.mrf.mxu1 }
 0x4fd   :  { %v3404_v30 = vpop.f32.mrf.mxu0  ;;  %v3702_v29 = vsub.s32 7, %v6263_v50 }
 0x4fe   :  { %v3536_v31 = vadd.f32 %v3535_v25, %v3401_v22  ;;  %v3541_v32 = vrot.slane %v3403_v28, 4  ;;  %v3364_v33 = vpop.f32.mrf.mxu1  ;;  %v3698_v25 = vsub.s32 6, %v6263_v50 }
 0x4ff   :  { %v3405_v34 = vpop.f32.mrf.mxu0 }
 0x500   :  { %v3537_v35 = vrot.slane %v3536_v31, 2  ;;  %v3542_v36 = vadd.f32 %v3541_v32, %v3403_v28 }
 0x502   :  { %v3538_v37 = vadd.f32 %v3537_v35, %v3536_v31  ;;  %v3543_v38 = vrot.slane %v3542_v36, 2  ;;  %v3699_v31 = vrot.slane %v6331_v59, %v3698_v25  ;;  %v3755_v35 = vrot.slane %v6333_v60, %v3698_v25 }
 0x504   :  { %v3539_v39 = vrot.slane %v3538_v37, 1  ;;  %v3544_v40 = vadd.f32 %v3543_v38, %v3542_v36  ;;  %v3703_v36 = vrot.slane %v6331_v59, %v3702_v29 }
 0x506   :  { %v3540_v41 = vadd.f32 %v3539_v39, %v3538_v37  ;;  %v3545_v43 = vrot.slane %v3544_v40, 1 }
 0x508   :  { %v3559_v46 = vmul.f32 0.125, %v3540_v41  ;;  %v3546_v47 = vadd.f32 %v3545_v43, %v3544_v40  ;;  %v3759_v41 = vrot.slane %v6333_v60, %v3702_v29 }
 0x50a   :  { %v3568_v48 = vsub.f32 %v3401_v22, %v3559_v46  ;;  %v3560_v49 = vmul.f32 0.125, %v3546_v47 }
 0x50c   :  { %v3577_v52 = vmul.f32 %v3568_v48, %v3568_v48  ;;  %v3569_v54 = vsub.f32 %v3403_v28, %v3560_v49 }
 0x50e   :  { %v3616_v55 = vrot.slane %v3577_v52, 4  ;;  %v3578_v56 = vmul.f32 %v3569_v54, %v3569_v54 }
 0x510   :  { %v3617_v57 = vadd.f32 %v3616_v55, %v3577_v52  ;;  %v3622_v58 = vrot.slane %v3578_v56, 4 }
 0x512   :  { %v3618_v61 = vrot.slane %v3617_v57, 2  ;;  %v3623_v63 = vadd.f32 %v3622_v58, %v3578_v56 }
 0x514   :  { %v3619_v62 = vadd.f32 %v3618_v61, %v3617_v57  ;;  %v3624_v0 = vrot.slane %v3623_v63, 2 }
 0x516   :  { %v3620_v2 = vrot.slane %v3619_v62, 1  ;;  %v3625_v3 = vadd.f32 %v3624_v0, %v3623_v63  ;;  %v3492_v0 = vld [vmem:[#allocation6 + $0x45] ss:$8 sm:$0x1] }
 0x518   :  { %v3621_v44 = vadd.f32 %v3620_v2, %v3619_v62  ;;  %v3626_v45 = vrot.slane %v3625_v3, 1  ;;  %v5243_v6 = vpop.f32.mrf.mxu1  ;;  %v3498_v2 = vld [vmem:[#allocation6 + $0x46] ss:$8 sm:$0x1] }
 0x519   :  { %v5265_v7 = vpop.f32.mrf.mxu0 }
 0x51a   :  { %v3640_v15 = vmul.f32 0.125, %v3621_v44  ;;  %v3627_v42 = vadd.f32 %v3626_v45, %v3625_v3  ;;  %v5244_v8 = vpop.f32.mrf.mxu1  ;;  %v3707_v3 = vrot.slane %v3492_v0, %v6266_v51 }
 0x51b   :  { %v5266_v10 = vpop.f32.mrf.mxu0  ;;  %v5245_v4 = vadd.f32 %v5244_v8, %v5243_v6  ;;  %v3763_v6 = vrot.slane %v3498_v2, %v6266_v51 }
 0x51c   :  { %v3649_v12 = vadd.f32 0.8, %v3640_v15  ;;  %v3641_v13 = vmul.f32 0.125, %v3627_v42  ;;  %v5267_v26 = vadd.f32 %v5266_v10, %v5265_v7  ;;  %v5246_v5 = vpop.f32.mrf.mxu1 }
 0x51d   :  { %v5268_v17 = vpop.f32.mrf.mxu0 }
 0x51e   :  { %5985 = vrsqrt.f32 %v3649_v12  ;;  %v3650_v18 = vadd.f32 0.8, %v3641_v13  ;;  %v3482_v19 = vadd.f32 %v5267_v26, %v5245_v4  ;;  %v5247_v21 = vpop.f32.mrf.mxu1 }
 0x51f   :  { %v5269_v27 = vpop.f32.mrf.mxu0 }
 0x520   :  { %5987 = vrsqrt.f32 %v3650_v18  ;;  %v3547_v22 = vrot.slane %v3482_v19, 4 }
 0x522   :  { %v3548_v23 = vadd.f32 %v3547_v22, %v3482_v19 }
 0x524   :  { %v3549_v24 = vrot.slane %v3548_v23, 2 }
 0x526   :  { %v3550_v28 = vadd.f32 %v3549_v24, %v3548_v23 }
 0x528   :  { %v3551_v30 = vrot.slane %v3550_v28, 1 }
 0x52a   :  { %v3552_v32 = vadd.f32 %v3551_v30, %v3550_v28 }
 0x52b   :  { %v5986_v33 = vpop.eup %5985 }
 0x52c   :  { %v3667_v34 = vmul.f32 %v5986_v33, %v3568_v48  ;;  %v3561_v37 = vmul.f32 0.125, %v3552_v32 }
 0x52d   :  { %v5988_v38 = vpop.eup %5987 }
 0x52e   :  { %v3723_v39 = vmul.f32 %v3699_v31, %v3667_v34  ;;  %v3668_v40 = vmul.f32 %v5988_v38, %v3569_v54  ;;  %v3570_v43 = vsub.f32 %v3482_v19, %v3561_v37 }
 0x530   :  { %v3779_v46 = vadd.f32 %v3755_v35, %v3723_v39  ;;  %v3724_v47 = vmul.f32 %v3703_v36, %v3668_v40  ;;  %v3579_v50 = vmul.f32 %v3570_v43, %v3570_v43 }
 0x532   :  { %vm3788_vm14 = vcmp.gt.f32.partialorder %v3779_v46, 0.0  ;;  %v3797_v49 = vmul.f32 0.2, %v3779_v46  ;;  %v3780_v52 = vadd.f32 %v3759_v41, %v3724_v47  ;;  %v3628_v55 = vrot.slane %v3579_v50, 4 }
 0x534   :  { %v6375_v56 = vsel %vm3788_vm14, %v3779_v46, %v3797_v49  ;;  %vm3789_vm15 = vcmp.gt.f32.partialorder %v3780_v52, 0.0  ;;  %v3798_v48 = vmul.f32 0.2, %v3780_v52  ;;  %v3629_v57 = vadd.f32 %v3628_v55, %v3579_v50 }
 0x536   :  { %v6377_v59 = vsel %vm3789_vm15, %v3780_v52, %v3798_v48  ;;  %v3630_v58 = vrot.slane %v3629_v57, 2 }
 0x538   :  { %v3631_v61 = vadd.f32 %v3630_v58, %v3629_v57 }
 0x53a   :  { %v3632_v54 = vrot.slane %v3631_v61, 1 }
 0x53c   :  { %v3633_v63 = vadd.f32 %v3632_v54, %v3631_v61 }
 0x53e   :  { %v3642_v60 = vmul.f32 0.125, %v3633_v63 }
 0x540   :  { %v3651_v62 = vadd.f32 0.8, %v3642_v60 }
 0x542   :  { %5989 = vrsqrt.f32 %v3651_v62 }
 0x54f   :  { %v5990_v44 = vpop.eup %5989 }
 0x550   :  { %v3669_v45 = vmul.f32 %v5990_v44, %v3570_v43 }
 0x552   :  { %v3725_v7 = vmul.f32 %v3707_v3, %v3669_v45 }
 0x554   :  { %v3781_v15 = vadd.f32 %v3763_v6, %v3725_v7 }
 0x556   :  { %vm3790_vm1 = vcmp.gt.f32.partialorder %v3781_v15, 0.0  ;;  %v3799_v42 = vmul.f32 0.2, %v3781_v15 }
 0x558   :  { %v6381_v8 = vsel %vm3790_vm1, %v3781_v15, %v3799_v42 }
 0x559   :  { %6171 = dma.done.wait [#allocation5 + $0x2], 9216 }
 0x55a   :  { %6172 = vsyncadd [#allocation5 + $0x2], 4294958080  ;;  %v3814_v10 = vpack.c.bf16 %v6345_v11, %v6345_v11  ;;  %v3816_v12 = vpack.c.bf16 %v6357_v16, %v6357_v16  ;;  %v5991_v13 = vld [vmem:[#allocation4 + $0x78] sm:$0xff]   ;;  %v5995_v5 = vld [vmem:[#allocation4 + $0x70] sm:$0xff]   ;;  %v3813_v47 = vpack.c.bf16 %v6343_v9, %v6343_v9  ;;  %v3815_v50 = vpack.c.bf16 %v6355_v14, %v6355_v14  ;;  %s6183_s0 = smov [#allocation9]  }
 0x55b   :  { %v5992_v4 = vld [vmem:[#allocation4 + $0xf8] sm:$0xff]   ;;  %5271 = vmatprep.subr.bf16.mxu1 %v5991_v13  ;;  %v5996_v17 = vld [vmem:[#allocation4 + $0xf0] sm:$0xff]   ;;  %v5999_v11 = vld [vmem:[#allocation4 + $0x68] sm:$0xff]   ;;  %v3818_v55 = vpack.c.bf16 %v6367_v20, %v6367_v20  ;;  %v3820_v58 = vpack.c.bf16 %v6377_v59, %v6377_v59  ;;  %s4632_s3 = sshll.u32 %s6183_s0, 4  ;;  %vm4624_vm2 = vcmask 130048   ;;  %s4633_s3 = int_to_ptr.vmem [resolvable:$true] %s4632_s3 }
 0x55c   :  { %4430 = vmatprep.mubr.bf16.mxu1 %v3814_v10  ;;  %4470 = vmatprep.mubr.bf16.mxu0 %v3816_v12  ;;  %v5993_v51 = vld [vmem:[#allocation4 + $0x38] sm:$0xff]   ;;  %v5997_v18 = vld [vmem:[#allocation4 + $0x30] sm:$0xff]   ;;  %v6000_v16 = vld [vmem:[#allocation4 + $0xe8] sm:$0xff]   ;;  %s6145_s4 = scalar_lea.vmem %s4633_s3, 128  ;;  %p6150_p7 = scmp.lt.s32.totalorder %s4633_s3, %s4633_s3 }
 0x55d   :  { %5293 = vmatprep.subr.bf16.mxu0 %v5992_v4  ;;  %v5994_v26 = vld [vmem:[#allocation4 + $0xb8] sm:$0xff]   ;;  %5272 = vmatpush3.bf16.msra.mxu1 %v5993_v51  ;;  %v5998_v19 = vld [vmem:[#allocation4 + $0xb0] sm:$0xff]   ;;  %v6001_v21 = vld [vmem:[#allocation4 + $0x28] sm:$0xff]   ;;  %p6146_p6 = scmp.ne.s32.totalorder %s4633_s3, %s6145_s4  ;;  %p6151_p8 = scmp.lt.s32.totalorder %s6145_s4, %s6145_s4 }
 0x55e   :  { %5294 = vmatpush3.bf16.msra.mxu0 %v5994_v26  ;;  %5273 = vmatprep.subr.bf16.mxu1 %v5995_v5  ;;  %v6002_v27 = vld [vmem:[#allocation4 + $0xa8] sm:$0xff]   ;;  %v6003_v22 = vld [vmem:[#allocation4 + $0x60] sm:$0xff]   ;;  %v6007_v28 = vld [vmem:[#allocation4 + $0x58] sm:$0xff]  }
 0x55f   :  { %5295 = vmatprep.subr.bf16.mxu0 %v5996_v17  ;;  %v6004_v23 = vld [vmem:[#allocation4 + $0xe0] sm:$0xff]   ;;  %v6008_v29 = vld [vmem:[#allocation4 + $0xd8] sm:$0xff]   ;;  %v6011_v32 = vld [vmem:[#allocation4 + $0x50] sm:$0xff]   ;;  %p6152_p9 = por %p6151_p8, %p6150_p7 }
 0x560   :  { %v6005_v24 = vld [vmem:[#allocation4 + $0x20] sm:$0xff]   ;;  %v6009_v30 = vld [vmem:[#allocation4 + $0x18] sm:$0xff]   ;;  %v6012_v33 = vld [vmem:[#allocation4 + $0xd0] sm:$0xff]  }
 0x561   :  { %5274 = vmatpush3.bf16.msra.mxu1 %v5997_v18  ;;  %v6006_v25 = vld [vmem:[#allocation4 + $0xa0] sm:$0xff]   ;;  %v6010_v31 = vld [vmem:[#allocation4 + $0x98] sm:$0xff]   ;;  %v6013_v34 = vld [vmem:[#allocation4 + $0x10] sm:$0xff]   ;;  %p6153_p10 = pnand %p6152_p9, %p6146_p6 }
 0x562   :  { %5296 = vmatpush3.bf16.msra.mxu0 %v5998_v19  ;;  %5275 = vmatprep.subr.bf16.mxu1 %v5999_v11  ;;  %v6014_v35 = vld [vmem:[#allocation4 + $0x90] sm:$0xff]   ;;  %v6015_v36 = vld [vmem:[#allocation4 + $0x48] sm:$0xff]   ;;  %v6019_v40 = vld [vmem:[#allocation4 + $0x40] sm:$0xff]   ;;  %v3817_v11 = vpack.c.bf16 %v6365_v53, %v6365_v53 }
 0x563   :  { %5297 = vmatprep.subr.bf16.mxu0 %v6000_v16  ;;  %v6016_v37 = vld [vmem:[#allocation4 + $0xc8] sm:$0xff]   ;;  %v6020_v41 = vld [vmem:[#allocation4 + $0xc0] sm:$0xff]   ;;  %v6023_v49 = vld [vmem:[#allocation4 + $0x178] sm:$0xff]  }
 0x564   :  { %v6017_v38 = vld [vmem:[#allocation4 + $0x8] sm:$0xff]   ;;  %v6021_v43 = vld [vmem:[#allocation4] sm:$0xff]   ;;  %v6024_v52 = vld [vmem:[#allocation4 + $0x138] sm:$0xff]  }
 0x565   :  { %5276 = vmatpush3.bf16.msra.mxu1 %v6001_v21  ;;  %v6018_v39 = vld [vmem:[#allocation4 + $0x88] sm:$0xff]   ;;  %v6022_v46 = vld [vmem:[#allocation4 + $0x80] sm:$0xff]   ;;  %v6025_v48 = vld [vmem:[#allocation4 + $0x1f8] sm:$0xff]   ;;  %v3819_v21 = vpack.c.bf16 %v6375_v56, %v6375_v56 }
 0x566   :  { %5298 = vmatpush3.bf16.msra.mxu0 %v6002_v27  ;;  %5277 = vmatprep.subr.bf16.mxu1 %v6003_v22  ;;  %v6026_v57 = vld [vmem:[#allocation4 + $0x1b8] sm:$0xff]   ;;  %v6027_v9 = vld [vmem:[#allocation4 + $0x170] sm:$0xff]   ;;  %v6031_v20 = vld [vmem:[#allocation4 + $0x168] sm:$0xff]  }
 0x567   :  { %5299 = vmatprep.subr.bf16.mxu0 %v6004_v23  ;;  %v6028_v61 = vld [vmem:[#allocation4 + $0x130] sm:$0xff]   ;;  %v6032_v63 = vld [vmem:[#allocation4 + $0x128] sm:$0xff]   ;;  %v6035_v59 = vld [vmem:[#allocation4 + $0x160] sm:$0xff]  }
 0x568   :  { %v6029_v14 = vld [vmem:[#allocation4 + $0x1f0] sm:$0xff]   ;;  %v6033_v60 = vld [vmem:[#allocation4 + $0x1e8] sm:$0xff]   ;;  %v6036_v0 = vld [vmem:[#allocation4 + $0x120] sm:$0xff]  }
 0x569   :  { %5278 = vmatpush3.bf16.msra.mxu1 %v6005_v24  ;;  %v6030_v54 = vld [vmem:[#allocation4 + $0x1b0] sm:$0xff]   ;;  %v6034_v62 = vld [vmem:[#allocation4 + $0x1a8] sm:$0xff]   ;;  %v6037_v2 = vld [vmem:[#allocation4 + $0x1e0] sm:$0xff]  }
 0x56a   :  { %5300 = vmatpush3.bf16.msra.mxu0 %v6006_v25  ;;  %5279 = vmatprep.subr.bf16.mxu1 %v6007_v28  ;;  %v6038_v3 = vld [vmem:[#allocation4 + $0x1a0] sm:$0xff]   ;;  %v6039_v44 = vld [vmem:[#allocation4 + $0x158] sm:$0xff]   ;;  %v6043_v15 = vld [vmem:[#allocation4 + $0x150] sm:$0xff]   ;;  %v3821_v28 = vpack.c.bf16 %v6381_v8, %v6381_v8 }
 0x56b   :  { %5301 = vmatprep.subr.bf16.mxu0 %v6008_v29  ;;  %v6040_v45 = vld [vmem:[#allocation4 + $0x118] sm:$0xff]   ;;  %v6044_v42 = vld [vmem:[#allocation4 + $0x110] sm:$0xff]   ;;  %v6047_v13 = vld [vmem:[#allocation4 + $0x148] sm:$0xff]  }
 0x56c   :  { %v6041_v6 = vld [vmem:[#allocation4 + $0x1d8] sm:$0xff]   ;;  %v6045_v10 = vld [vmem:[#allocation4 + $0x1d0] sm:$0xff]   ;;  %v6048_v4 = vld [vmem:[#allocation4 + $0x108] sm:$0xff]  }
 0x56d   :  { %5280 = vmatpush3.bf16.msra.mxu1 %v6009_v30  ;;  %v6042_v7 = vld [vmem:[#allocation4 + $0x198] sm:$0xff]   ;;  %v6046_v12 = vld [vmem:[#allocation4 + $0x190] sm:$0xff]   ;;  %v6049_v51 = vld [vmem:[#allocation4 + $0x1c8] sm:$0xff]  }
 0x56e   :  { %5302 = vmatpush3.bf16.msra.mxu0 %v6010_v31  ;;  %5281 = vmatprep.subr.bf16.mxu1 %v6011_v32  ;;  %v6050_v26 = vld [vmem:[#allocation4 + $0x188] sm:$0xff]   ;;  %v6051_v5 = vld [vmem:[#allocation4 + $0x140] sm:$0xff]   ;;  %v6055_v16 = vld [vmem:[#allocation4 + $0x238] sm:$0xff]  }
 0x56f   :  { %5303 = vmatprep.subr.bf16.mxu0 %v6012_v33  ;;  %v6052_v17 = vld [vmem:[#allocation4 + $0x100] sm:$0xff]   ;;  %v6056_v27 = vld [vmem:[#allocation4 + $0x230] sm:$0xff]   ;;  %v6057_v53 = vld [vmem:[#allocation4 + $0x228] sm:$0xff]  }
 0x570   :  { %v6053_v18 = vld [vmem:[#allocation4 + $0x1c0] sm:$0xff]   ;;  %v6059_v56 = vld [vmem:[#allocation4 + $0x218] sm:$0xff]   ;;  %v6060_v23 = vld [vmem:[#allocation4 + $0x210] sm:$0xff]  }
 0x571   :  { %5282 = vmatpush3.bf16.msra.mxu1 %v6013_v34  ;;  %v6054_v19 = vld [vmem:[#allocation4 + $0x180] sm:$0xff]   ;;  %v6061_v24 = vld [vmem:[#allocation4 + $0x208] sm:$0xff]  }
 0x572   :  { %5304 = vmatpush3.bf16.msra.mxu0 %v6014_v35  ;;  %5283 = vmatprep.subr.bf16.mxu1 %v6015_v36  ;;  %v6058_v22 = vld [vmem:[#allocation4 + $0x220] sm:$0xff]  }
 0x573   :  { %5305 = vmatprep.subr.bf16.mxu0 %v6016_v37  ;;  %v6062_v25 = vld [vmem:[#allocation4 + $0x200] sm:$0xff]  }
 0x575   :  { %5284 = vmatpush3.bf16.msra.mxu1 %v6017_v38 }
 0x576   :  { %5306 = vmatpush3.bf16.msra.mxu0 %v6018_v39  ;;  %5285 = vmatprep.subr.bf16.mxu1 %v6019_v40 }
 0x577   :  { %5307 = vmatprep.subr.bf16.mxu0 %v6020_v41 }
 0x579   :  { %5286 = vmatpush3.bf16.msra.mxu1 %v6021_v43 }
 0x57a   :  { %5308 = vmatpush3.bf16.msra.mxu0 %v6022_v46  ;;  %5315 = vmatprep.subr.bf16.mxu1 %v6023_v49 }
 0x57b   :  { %5337 = vmatprep.subr.bf16.mxu0 %v6025_v48 }
 0x57c   :  { %4431 = vmatmul.mubr.bf16.vlgmr.msra.gmra.mxu1 %v3813_v47 }
 0x57d   :  { %4471 = vmatmul.mubr.bf16.vlgmr.msra.gmra.mxu0 %v3815_v50  ;;  %5316 = vmatpush3.bf16.msra.mxu1 %v6024_v52 }
 0x57e   :  { %4510 = vmatprep.mubr.bf16.mxu1 %v3818_v55  ;;  %5338 = vmatpush3.bf16.msra.mxu0 %v6026_v57 }
 0x57f   :  { %5317 = vmatprep.subr.bf16.mxu1 %v6027_v9  ;;  %4550 = vmatprep.mubr.bf16.mxu0 %v3820_v58 }
 0x580   :  { %5339 = vmatprep.subr.bf16.mxu0 %v6029_v14 }
 0x581   :  { %5318 = vmatpush3.bf16.msra.mxu1 %v6028_v61 }
 0x582   :  { %5340 = vmatpush3.bf16.msra.mxu0 %v6030_v54  ;;  %5319 = vmatprep.subr.bf16.mxu1 %v6031_v20 }
 0x583   :  { %5341 = vmatprep.subr.bf16.mxu0 %v6033_v60 }
 0x585   :  { %5320 = vmatpush3.bf16.msra.mxu1 %v6032_v63 }
 0x586   :  { %5342 = vmatpush3.bf16.msra.mxu0 %v6034_v62  ;;  %5321 = vmatprep.subr.bf16.mxu1 %v6035_v59 }
 0x587   :  { %5343 = vmatprep.subr.bf16.mxu0 %v6037_v2 }
 0x589   :  { %5322 = vmatpush3.bf16.msra.mxu1 %v6036_v0 }
 0x58a   :  { %5344 = vmatpush3.bf16.msra.mxu0 %v6038_v3  ;;  %5323 = vmatprep.subr.bf16.mxu1 %v6039_v44 }
 0x58b   :  { %5345 = vmatprep.subr.bf16.mxu0 %v6041_v6 }
 0x58d   :  { %5324 = vmatpush3.bf16.msra.mxu1 %v6040_v45 }
 0x58e   :  { %5346 = vmatpush3.bf16.msra.mxu0 %v6042_v7  ;;  %5325 = vmatprep.subr.bf16.mxu1 %v6043_v15 }
 0x58f   :  { %5347 = vmatprep.subr.bf16.mxu0 %v6045_v10 }
 0x591   :  { %5326 = vmatpush3.bf16.msra.mxu1 %v6044_v42 }
 0x592   :  { %5348 = vmatpush3.bf16.msra.mxu0 %v6046_v12  ;;  %5327 = vmatprep.subr.bf16.mxu1 %v6047_v13 }
 0x593   :  { %5349 = vmatprep.subr.bf16.mxu0 %v6049_v51 }
 0x595   :  { %5328 = vmatpush3.bf16.msra.mxu1 %v6048_v4  ;;  %v4598_v4 = vld [vmem:[#allocation6 + $0x7] ss:$0 sm:$0xff] }
 0x596   :  { %5350 = vmatpush3.bf16.msra.mxu0 %v6050_v26  ;;  %5329 = vmatprep.subr.bf16.mxu1 %v6051_v5  ;;  %v4599_v26 = vld [vmem:[#allocation6 + $0x48] ss:$0 sm:$0xff] }
 0x597   :  { %5351 = vmatprep.subr.bf16.mxu0 %v6053_v18 }
 0x599   :  { %5330 = vmatpush3.bf16.msra.mxu1 %v6052_v17 }
 0x59a   :  { %5428 = vmatprep.subr.bf16.mxu1 %v6181_v1  ;;  %5352 = vmatpush3.bf16.msra.mxu0 %v6054_v19 }
 0x59c   :  { %4511 = vmatmul.mubr.bf16.vlgmr.msra.gmra.mxu1 %v3817_v11 }
 0x59d   :  { %5429 = vmatpush3.bf16.msra.mxu1 %v6055_v16  ;;  %5444 = vmatprep.mubr.msk.bf16.mxu1 %vm6182_vm0, %v6181_v1 }
 0x59e   :  { %4551 = vmatmul.mubr.bf16.vlgmr.msra.gmra.mxu0 %v3819_v21  ;;  %5430 = vmatprep.subr.bf16.mxu1 %v6181_v1 }
 0x5a1   :  { %5431 = vmatpush3.bf16.msra.mxu1 %v6056_v27 }
 0x5a2   :  { %5432 = vmatprep.subr.bf16.mxu1 %v6181_v1 }
 0x5a5   :  { %5433 = vmatpush3.bf16.msra.mxu1 %v6057_v53 }
 0x5a6   :  { %5434 = vmatprep.subr.bf16.mxu1 %v6181_v1 }
 0x5a9   :  { %5435 = vmatpush3.bf16.msra.mxu1 %v6058_v22 }
 0x5aa   :  { %5436 = vmatprep.subr.bf16.mxu1 %v6181_v1 }
 0x5ad   :  { %5437 = vmatpush3.bf16.msra.mxu1 %v6059_v56 }
 0x5ae   :  { %5438 = vmatprep.subr.bf16.mxu1 %v6181_v1 }
 0x5b1   :  { %5439 = vmatpush3.bf16.msra.mxu1 %v6060_v23 }
 0x5b2   :  { %5440 = vmatprep.subr.bf16.mxu1 %v6181_v1 }
 0x5b5   :  { %5441 = vmatpush3.bf16.msra.mxu1 %v6061_v24 }
 0x5b6   :  { %5442 = vmatprep.subr.bf16.mxu1 %v6181_v1 }
 0x5b9   :  { %5443 = vmatpush3.bf16.msra.mxu1 %v6062_v25 }
 0x5bc   :  { %5445 = vmatmul.mubr.bf16.vlgmr.msra.gmra.mxu1 %v3821_v28 }
 0x63c   :  { %v5287_v29 = vpop.f32.mrf.mxu1 }
 0x63d   :  { %v5309_v30 = vpop.f32.mrf.mxu0 }
 0x63e   :  { %v5288_v31 = vpop.f32.mrf.mxu1 }
 0x63f   :  { %v5310_v32 = vpop.f32.mrf.mxu0  ;;  %v5289_v47 = vadd.f32 %v5288_v31, %v5287_v29 }
 0x640   :  { %v5290_v33 = vpop.f32.mrf.mxu1  ;;  %v5311_v8 = vadd.f32 %v5310_v32, %v5309_v30 }
 0x641   :  { %v5312_v34 = vpop.f32.mrf.mxu0 }
 0x642   :  { %v5291_v35 = vpop.f32.mrf.mxu1  ;;  %v4473_v49 = vadd.f32 %v5311_v8, %v5289_v47 }
 0x643   :  { %v5313_v36 = vpop.f32.mrf.mxu0 }
 0x65c   :  { %v5331_v37 = vpop.f32.mrf.mxu1 }
 0x65e   :  { %v5332_v38 = vpop.f32.mrf.mxu1  ;;  %v5353_v39 = vpop.f32.mrf.mxu0 }
 0x65f   :  { %v5333_v50 = vadd.f32 %v5332_v38, %v5331_v37 }
 0x660   :  { %v5334_v40 = vpop.f32.mrf.mxu1  ;;  %v5354_v41 = vpop.f32.mrf.mxu0 }
 0x661   :  { %v4513_v52 = vadd.f32 %v5333_v50, %v4473_v49  ;;  %v5355_v55 = vadd.f32 %v5354_v41, %v5353_v39 }
 0x662   :  { %v5335_v43 = vpop.f32.mrf.mxu1  ;;  %v5356_v1 = vpop.f32.mrf.mxu0 }
 0x663   :  { %v4553_v48 = vadd.f32 %v5355_v55, %v4513_v52 }
 0x664   :  { %v5357_v46 = vpop.f32.mrf.mxu0 }
 0x67c   :  { %v4592_v57 = vpop.f32.mrf.mxu1 }
 0x67d   :  { %v4593_v58 = vadd.f32 %v4592_v57, %v4553_v48 }
 0x67e   :  { %v5446_v9 = vpop.f32.mrf.mxu1 }
 0x67f   :  { %v4600_v61 = vrot.slane %v4593_v58, 4 }
 0x680   :  { %v4595_v14 = vpop.f32.mrf.mxu1 }
 0x681   :  { %v4601_v54 = vadd.f32 %v4600_v61, %v4593_v58 }
 0x682   :  { %v5447_v20 = vpop.f32.mrf.mxu1 }
 0x683   :  { %v4602_v63 = vrot.slane %v4601_v54, 2 }
 0x685   :  { %v4603_v60 = vadd.f32 %v4602_v63, %v4601_v54 }
 0x687   :  { %v4604_v62 = vrot.slane %v4603_v60, 1 }
 0x689   :  { %v4605_v59 = vadd.f32 %v4604_v62, %v4603_v60 }
 0x68b   :  { %v4606_v0 = vmul.f32 0.125, %v4605_v59 }
 0x68d   :  { %v4607_v2 = vsub.f32 %v4593_v58, %v4606_v0 }
 0x68f   :  { %v4608_v3 = vmul.f32 %v4607_v2, %v4607_v2 }
 0x691   :  { %v4609_v44 = vrot.slane %v4608_v3, 4 }
 0x693   :  { %v4610_v45 = vadd.f32 %v4609_v44, %v4608_v3 }
 0x695   :  { %v4611_v6 = vrot.slane %v4610_v45, 2 }
 0x697   :  { %v4612_v7 = vadd.f32 %v4611_v6, %v4610_v45 }
 0x699   :  { %v4613_v15 = vrot.slane %v4612_v7, 1 }
 0x69b   :  { %v4614_v42 = vadd.f32 %v4613_v15, %v4612_v7 }
 0x69d   :  { %v4615_v10 = vmul.f32 0.125, %v4614_v42 }
 0x69f   :  { %v4616_v12 = vadd.f32 0.8, %v4615_v10 }
 0x6a1   :  { %6063 = vrsqrt.f32 %v4616_v12 }
 0x6ae   :  { %v6064_v13 = vpop.eup %6063 }
 0x6af   :  { %v4618_v51 = vmul.f32 %v6064_v13, %v4607_v2 }
 0x6b1   :  { %v4619_v5 = vmul.f32 %v4618_v51, %v4598_v4 }
 0x6b3   :  { %v4620_v17 = vadd.f32 %v4619_v5, %v4599_v26 }
 0x6b5   :  { %vm4621_vm0 = vcmp.gt.f32.partialorder %v4620_v17, 0.0  ;;  %v4622_v18 = vmul.f32 0.2, %v4620_v17 }
 0x6b7   :  { %v4623_v19 = vsel %vm4621_vm0, %v4620_v17, %v4622_v18 }
 0x6b8   :  { %4625 = vst.msk [vmem:[#allocation9] sm:$0xff] %vm4624_vm2, %v4623_v19 }
 0x6b9   :  { %6156 = shalt.err (!%p6153_p10)
}
 0x6ba   :  { %4635 = dma.vmem_to_hbm [thread:$0]  %s4633_s3, 128, %s6419_s5, [#allocation8]  }
 0x6bb   :  { %6173 = dma.done.wait [#allocation8], 128  }
 0x6bc   :  { %6174 = vsyncadd [#allocation8], 4294967168 }
 0x6bd   :  { %4639 = vsyncpa [#allocation7], 1 }
 0x6be   :  { %4640 = vsyncpa [#allocation8], 1 }
 0x6bf   :  { %4641 = vsyncmov [#allocation5] }
 0x6c2   :  { %s4642_s17 = vpop.sfrf %4641 }
 0x6c3   :  { %p5109_p11 = scmp.ne.s32.totalorder %s4642_s17, 0 }
 0x6c5   :  { %4646 = shalt.err (%p5109_p11)  }
 0x6c6   :  { %4648 = vsyncmov [#allocation5 + $0x1] }
 0x6c9   :  { %s4649_s18 = vpop.sfrf %4648 }
 0x6ca   :  { %p5110_p12 = scmp.ne.s32.totalorder %s4649_s18, 0 }
 0x6cc   :  { %4653 = shalt.err (%p5110_p12)  }
 0x6cd   :  { %4655 = vsyncmov [#allocation5 + $0x2] }
 0x6d0   :  { %s4656_s19 = vpop.sfrf %4655 }
 0x6d1   :  { %p5111_p13 = scmp.ne.s32.totalorder %s4656_s19, 0 }
 0x6d3   :  { %4660 = shalt.err (%p5111_p13)  }

</bundles_post_ra>
